<compile_context>
chip_gen: v7x
topology: tpu7x:2x2x1
jax: 0.10.0
libtpu: 0.0.40
codegen_flags: <defaults>
</compile_context>

<pallas_src>
import jax
import jax.numpy as jnp
import numpy as np
from jax.experimental import pallas as pl
from jax.experimental.pallas import tpu as pltpu

MINUS_INF = -1.0e8
TINY = 1e-45                     # allennlp masked_log_softmax constant
LOG_TINY = float(np.log(TINY))   # ~ -103.6 (avoids TPU denormal flush -> -inf)


def _elu(x):
    return jnp.where(x > 0, x, jnp.exp(x) - 1.0)


def _log_softmax(x, axis):
    m = jnp.max(x, axis=axis, keepdims=True)
    s = x - m
    return s - jnp.log(jnp.sum(jnp.exp(s), axis=axis, keepdims=True))


def deep_tree_parser_kernel(
    q_ref, k_ref, m_ref,
    wq_ref, bq_ref, wk_ref, bk_ref,
    ub_ref, wb_ref, rm_ref, seg_ref, bb_ref,
    reps_ref, hll_ref, tll_ref,
):
    f32 = jnp.float32
    TB, Qn, Dq = q_ref.shape
    _, K1, Dk = k_ref.shape
    F = wq_ref.shape[1]
    L = bb_ref.shape[1]
    TQ = TB * Qn

    q2 = q_ref[...].reshape(TQ, Dq)
    k2 = k_ref[...].reshape(TB * K1, Dk)
    # int8 mask in HBM (4x fewer bytes); explicit widen before the compare keeps
    # the select mask in the same (8,128) layout as the f32 scores.
    valid = m_ref[...].astype(jnp.int32) > 0                        # [TB,Q,K1]

    # fused (head|type) projections + ELU  (Dropout2d(p=0) is the identity)
    eq = _elu(jnp.dot(q2, wq_ref[...], preferred_element_type=f32) + bq_ref[...])
    ek = _elu(jnp.dot(k2, wk_ref[...], preferred_element_type=f32) + bk_ref[...])
    ek3 = ek.reshape(TB, K1, F)                                     # [ehk|etk]

    # biaffine head scores: score[b,i,j] = eq[b,i] @ U_pad @ ek[b,j]
    qU = jnp.dot(eq, ub_ref[...], preferred_element_type=f32).reshape(TB, Qn, F)
    score = jnp.einsum("bqf,bkf->bqk", qU, ek3, preferred_element_type=f32)
    masked_score = jnp.where(valid, score, MINUS_INF)               # [TB,Q,K1]

    # greedy head argmax (first max per row) as a one-hot row selector
    col = jax.lax.broadcasted_iota(jnp.int32, (TB, Qn, K1), 2)
    row_max = jnp.max(masked_score, axis=2, keepdims=True)
    heads = jnp.min(jnp.where(masked_score == row_max, col, K1),
                    axis=2, keepdims=True)                          # [TB,Q,1]
    onehot = (col == heads).astype(f32)                             # [TB,Q,K1]

    # softmax statistics (computed once; reused for reps AND head LL)
    e = jnp.exp(masked_score - row_max)
    denom = jnp.sum(e, axis=2, keepdims=True)
    p = e * pl.reciprocal(denom, approx=True)

    # one merged batched matmul for (selected key, weighted reps)
    op = jnp.concatenate([onehot, p], axis=1)                       # [TB,2Q,K1]
    both = jnp.einsum("bqk,bkf->bqf", op, ek3, preferred_element_type=f32)
    sel = both[:, :Qn, :].reshape(TQ, F)                            # key at argmax head
    reps_ref[...] = both[:, Qn:, :]                                 # [ehk|etk] weighted

    # bilinear label scores at width L*Et:
    #   qw[tq, l*Et+j]      = sum_i etq[tq,i] * W_bil[l,i,j]
    #   sel_rep[tq, l*Et+j] = etk_sel[tq,j]        (constant 0/1 repeat matrix)
    #   ts[tq, l]           = sum_j qw*sel_rep  (+ bias)  via segment-sum matmul
    qw = jnp.dot(eq, wb_ref[...], preferred_element_type=f32)       # [TQ, L*Et]
    sel_rep = jnp.dot(sel, rm_ref[...], preferred_element_type=f32) # [TQ, L*Et]
    ts = jnp.dot(qw * sel_rep, seg_ref[...],
                 preferred_element_type=f32) + bb_ref[...]          # [TQ, L]
    tll_ref[...] = _log_softmax(ts.reshape(TB, Qn, L), axis=2)

    # head log-likelihood reuses row_max / denom (identical math: log_mask is 0
    # at valid positions and masked positions underflow to exactly 0 either way)
    log_mask = jnp.where(valid, 0.0, LOG_TINY)
    hll_ref[...] = masked_score + log_mask - row_max - jnp.log(denom)


def _choose_tb(B, Q, target_rows=256, min_tiles=2):
    """Pick the batch tile TB (divisor of B): keep >= min_tiles grid steps
    (v7x megacore -> both TensorCores busy), and within that prefer the
    smallest TB that already fills target_rows MXU rows, else the largest."""
    divisors = [d for d in range(1, B + 1) if B % d == 0]
    cands = [d for d in divisors if B // d >= min_tiles] or divisors
    good = [d for d in cands if d * Q >= target_rows]
    return min(good) if good else max(cands)


def deep_tree_parser_forward(query, key, edge_head_mask, params,
                             *, target_rows=256, min_grid_tiles=2):
    """query [B,Q,Dq], key [B,K,Dk], edge_head_mask [B,Q,K] (1 = valid)."""
    f32 = jnp.float32
    B, Q, Dq = query.shape
    _, K, Dk = key.shape
    Eh = params["W_hq"].shape[1]
    Et = params["W_tq"].shape[1]
    L = params["W_bil"].shape[0]
    K1 = K + 1
    F = Eh + Et
    TB = _choose_tb(B, Q, target_rows=target_rows, min_tiles=min_grid_tiles)
    NB = B // TB

    # ---- glue (trace time): sentinel prepend, int8 mask, fused/padded weights
    sentinel = jnp.broadcast_to(params["sentinel"].astype(f32), (B, 1, Dk))
    key_s = jnp.concatenate([sentinel, key.astype(f32)], axis=1)        # [B,K1,Dk]
    mask_s = jnp.concatenate(
        [jnp.ones((B, Q, 1), jnp.int8), (edge_head_mask > 0).astype(jnp.int8)],
        axis=2)                                                         # [B,Q,K1] int8

    wq = jnp.concatenate([params["W_hq"], params["W_tq"]], axis=1)      # [Dq,F]
    bq = jnp.concatenate([params["b_hq"], params["b_tq"]], axis=1)      # [1,F]
    wk = jnp.concatenate([params["W_hk"], params["W_tk"]], axis=1)      # [Dk,F]
    bk = jnp.concatenate([params["b_hk"], params["b_tk"]], axis=1)      # [1,F]
    u_pad = jnp.pad(params["U"], ((0, Et), (0, Et)))                    # [F,F]

    # Label path at width L*Et (not L*F): zero-pad only on the contraction axis.
    # NOTE(prod sizes): wb/rep_mat are [F, L*Et]; for very large L*Et tile the
    # label dim over an extra "arbitrary" grid axis (or single-buffer these
    # constant specs) so v7x's 64 MiB VMEM is not exceeded.
    wb = jnp.transpose(params["W_bil"], (1, 0, 2)).reshape(Et, L * Et)  # [Et,L*Et]
    wb = jnp.pad(wb, ((Eh, 0), (0, 0)))                                 # [F, L*Et]
    rep_mat = jnp.pad(jnp.tile(jnp.eye(Et, dtype=f32), (1, L)),
                      ((Eh, 0), (0, 0)))                                # [F, L*Et]
    seg = jnp.repeat(jnp.eye(L, dtype=f32), Et, axis=0)                 # [L*Et, L]
    bb = params["b_bil"].astype(f32)                                    # [1,L]

    def bcast(shape):
        nd = len(shape)
        return pl.BlockSpec(shape, lambda b, _n=nd: (0,) * _n)

    def batch3(shape):
        return pl.BlockSpec(shape, lambda b: (b, 0, 0))

    in_specs = [
        batch3((TB, Q, Dq)),
        batch3((TB, K1, Dk)),
        batch3((TB, Q, K1)),
        bcast((Dq, F)), bcast((1, F)),
        bcast((Dk, F)), bcast((1, F)),
        bcast((F, F)),
        bcast((F, L * Et)), bcast((F, L * Et)), bcast((L * Et, L)), bcast((1, L)),
    ]
    out_specs = [
        batch3((TB, Q, F)),
        batch3((TB, Q, K1)),
        batch3((TB, Q, L)),
    ]
    out_shape = [
        jax.ShapeDtypeStruct((B, Q, F), f32),
        jax.ShapeDtypeStruct((B, Q, K1), f32),
        jax.ShapeDtypeStruct((B, Q, L), f32),
    ]

    # vmem limit derived from actual per-step tiles (double-buffered ins/outs +
    # headroom for intermediates), clamped to a cross-generation-safe ceiling.
    bpe = 4
    in_bytes = ((TB * Q * Dq + TB * K1 * Dk) * bpe + TB * Q * K1
                + (Dq * F + F + Dk * F + F + F * F
                   + 2 * F * L * Et + L * Et * L + L) * bpe)
    out_bytes = (TB * Q * F + TB * Q * K1 + TB * Q * L) * bpe
    vmem_limit = int(min(max(8 * (in_bytes + out_bytes), 16 * 2**20), 48 * 2**20))

    reps, hll, tll = pl.pallas_call(
        deep_tree_parser_kernel,
        grid_spec=pltpu.PrefetchScalarGridSpec(
            num_scalar_prefetch=0,
            grid=(NB,),
            in_specs=in_specs,
            out_specs=out_specs,
        ),
        out_shape=out_shape,
        compiler_params=pltpu.CompilerParams(
            dimension_semantics=("parallel",),
            vmem_limit_bytes=vmem_limit,
        ),
    )(query.astype(f32), key_s, mask_s,
      wq, bq, wk, bk, u_pad, wb, rep_mat, seg, bb)

    # argmax in the wrapper: hll is a per-row monotone shift of the masked head
    # score (and tll of the label score), so ordering / first-max tie-breaking
    # match the in-kernel one-hot head selection.  Assumes no valid score ever
    # approaches MINUS_INF (-1e8), which holds at these weight scales.
    edge_heads = jnp.argmax(hll, axis=-1).astype(jnp.int32)
    edge_types = jnp.argmax(tll, axis=-1).astype(jnp.int32)
    return dict(edge_heads=edge_heads, edge_types=edge_types,
                edge_reps=reps, edge_head_ll=hll, edge_type_ll=tll)


def reference_forward(query, key, edge_head_mask, params):
    """Pure-JAX reference (mirrors the PyTorch semantics)."""
    hp = jax.lax.Precision.HIGHEST
    B, Q, _ = query.shape
    Dk = key.shape[2]
    sentinel = jnp.broadcast_to(params["sentinel"], (B, 1, Dk))
    key_s = jnp.concatenate([sentinel, key], axis=1)
    mask = jnp.concatenate(
        [jnp.ones((B, Q, 1), jnp.float32), edge_head_mask.astype(jnp.float32)], axis=2)
    elu = lambda x: jnp.where(x > 0, x, jnp.exp(x) - 1.0)
    mm = lambda a, b: jnp.matmul(a, b, precision=hp)
    ehq = elu(mm(query, params["W_hq"]) + params["b_hq"])
    ehk = elu(mm(key_s, params["W_hk"]) + params["b_hk"])
    etq = elu(mm(query, params["W_tq"]) + params["b_tq"])
    etk = elu(mm(key_s, params["W_tk"]) + params["b_tk"])
    score = jnp.einsum("bqe,ef,bkf->bqk", ehq, params["U"], ehk, precision=hp)
    masked = jnp.where(mask > 0, score, MINUS_INF)
    heads = jnp.argmax(masked, axis=2)
    sel = jnp.take_along_axis(etk, heads[..., None], axis=1)
    ts = jnp.einsum("bqe,lef,bqf->bql", etq, params["W_bil"], sel,
                    precision=hp) + params["b_bil"][0]
    types = jnp.argmax(ts, axis=2)
    p = jax.nn.softmax(masked, axis=2)
    reps = jnp.concatenate([mm(p, ehk), mm(p, etk)], axis=2)
    hll = jax.nn.log_softmax(masked + jnp.log(mask + TINY), axis=2)
    tll = jax.nn.log_softmax(ts, axis=2)
    return heads, types, reps, hll, tll, mask


def init_params(rng, Dq, Dk, Eh, Et, L):
    ks = jax.random.split(rng, 12)
    n = lambda k, shp, s: (jax.random.normal(k, shp, jnp.float32) * s)
    return dict(
        W_hq=n(ks[0], (Dq, Eh), 1.0 / np.sqrt(Dq)),
        b_hq=n(ks[1], (1, Eh), 0.1),
        W_hk=n(ks[2], (Dk, Eh), 1.0 / np.sqrt(Dk)),
        b_hk=n(ks[3], (1, Eh), 0.1),
        W_tq=n(ks[4], (Dq, Et), 1.0 / np.sqrt(Dq)),
        b_tq=n(ks[5], (1, Et), 0.1),
        W_tk=n(ks[6], (Dk, Et), 1.0 / np.sqrt(Dk)),
        b_tk=n(ks[7], (1, Et), 0.1),
        U=n(ks[8], (Eh, Eh), 1.0 / np.sqrt(Eh)),
        W_bil=n(ks[9], (L, Et, Et), 1.0 / np.sqrt(Et)),
        b_bil=n(ks[10], (1, L), 0.1),
        sentinel=n(ks[11], (1, 1, Dk), 1.0),
    )


if __name__ == "__main__":
    B, Q, K = 32, 8, 7    # -> TB=16 (128 MXU rows/step), NB=2 (both v7x TCs busy)
    Dq = Dk = 32          # query_vector_dim / key_vector_dim
    Eh = Et = 32          # edge_head_vector_dim / edge_type_vector_dim
    L = 8                 # num_labels

    root = jax.random.PRNGKey(0)
    k_par, k_q, k_k, k_m = jax.random.split(root, 4)
    params = init_params(k_par, Dq, Dk, Eh, Et, L)
    query = jax.random.normal(k_q, (B, Q, Dq), jnp.float32)
    key = jax.random.normal(k_k, (B, K, Dk), jnp.float32)
    edge_head_mask = (jax.random.uniform(k_m, (B, Q, K)) > 0.3).astype(jnp.int32)

    out = deep_tree_parser_forward(query, key, edge_head_mask, params)
    jax.block_until_ready(out)

    r_heads, r_types, r_reps, r_hll, r_tll, mask = reference_forward(
        query, key, edge_head_mask, params)

    np.testing.assert_array_equal(np.asarray(out["edge_heads"]), np.asarray(r_heads))
    np.testing.assert_array_equal(np.asarray(out["edge_types"]), np.asarray(r_types))
    np.testing.assert_allclose(np.asarray(out["edge_reps"]), np.asarray(r_reps),
                               rtol=2e-2, atol=2e-2)
    valid = np.asarray(mask) > 0
    np.testing.assert_allclose(np.asarray(out["edge_head_ll"])[valid],
                               np.asarray(r_hll)[valid], rtol=2e-2, atol=2e-2)
    np.testing.assert_allclose(np.asarray(out["edge_type_ll"]), np.asarray(r_tll),
                               rtol=2e-2, atol=2e-2)

    print("KERNEL_OK")
</pallas_src>

<mosaic_0001>
module attributes {stable_mosaic.version = 11 : i64} {
  func.func @deep_tree_parser_kernel(%arg0: i32, %arg1: memref<16x8x32xf32, #tpu.memory_space<vmem>>, %arg2: memref<16x8x32xf32, #tpu.memory_space<vmem>>, %arg3: memref<16x8x8xi8, #tpu.memory_space<vmem>>, %arg4: memref<32x64xf32, #tpu.memory_space<vmem>>, %arg5: memref<1x64xf32, #tpu.memory_space<vmem>>, %arg6: memref<32x64xf32, #tpu.memory_space<vmem>>, %arg7: memref<1x64xf32, #tpu.memory_space<vmem>>, %arg8: memref<64x64xf32, #tpu.memory_space<vmem>>, %arg9: memref<64x256xf32, #tpu.memory_space<vmem>>, %arg10: memref<64x256xf32, #tpu.memory_space<vmem>>, %arg11: memref<256x8xf32, #tpu.memory_space<vmem>>, %arg12: memref<1x8xf32, #tpu.memory_space<vmem>>, %arg13: memref<16x8x64xf32, #tpu.memory_space<vmem>>, %arg14: memref<16x8x8xf32, #tpu.memory_space<vmem>>, %arg15: memref<16x8x8xf32, #tpu.memory_space<vmem>>) attributes {dimension_semantics = [#tpu.dimension_semantics<parallel>], iteration_bounds = array<i64: 2>, scalar_prefetch = 0 : i64, scratch_operands = 0 : i64, tpu.core_type = #tpu.core_type<tc>, window_params = [{transform_indices = @transform_0, window_bounds = array<i64: 16, 8, 32>}, {transform_indices = @transform_1, window_bounds = array<i64: 16, 8, 32>}, {transform_indices = @transform_2, window_bounds = array<i64: 16, 8, 8>}, {pipeline_mode = #tpu.pipeline_mode<synchronous>, transform_indices = @transform_3, window_bounds = array<i64: 32, 64>}, {pipeline_mode = #tpu.pipeline_mode<synchronous>, transform_indices = @transform_4, window_bounds = array<i64: 1, 64>}, {pipeline_mode = #tpu.pipeline_mode<synchronous>, transform_indices = @transform_5, window_bounds = array<i64: 32, 64>}, {pipeline_mode = #tpu.pipeline_mode<synchronous>, transform_indices = @transform_6, window_bounds = array<i64: 1, 64>}, {pipeline_mode = #tpu.pipeline_mode<synchronous>, transform_indices = @transform_7, window_bounds = array<i64: 64, 64>}, {pipeline_mode = #tpu.pipeline_mode<synchronous>, transform_indices = @transform_8, window_bounds = array<i64: 64, 256>}, {pipeline_mode = #tpu.pipeline_mode<synchronous>, transform_indices = @transform_9, window_bounds = array<i64: 64, 256>}, {pipeline_mode = #tpu.pipeline_mode<synchronous>, transform_indices = @transform_10, window_bounds = array<i64: 256, 8>}, {pipeline_mode = #tpu.pipeline_mode<synchronous>, transform_indices = @transform_11, window_bounds = array<i64: 1, 8>}, {transform_indices = @transform_12, window_bounds = array<i64: 16, 8, 64>}, {transform_indices = @transform_13, window_bounds = array<i64: 16, 8, 8>}, {transform_indices = @transform_14, window_bounds = array<i64: 16, 8, 8>}]} {
    %c0 = arith.constant 0 : index
    %c0_0 = arith.constant 0 : index
    %c0_1 = arith.constant 0 : index
    %0 = vector.load %arg1[%c0, %c0_0, %c0_1] : memref<16x8x32xf32, #tpu.memory_space<vmem>>, vector<16x8x32xf32>
    %1 = vector.shape_cast %0 : vector<16x8x32xf32> to vector<128x32xf32>
    %c0_2 = arith.constant 0 : index
    %c0_3 = arith.constant 0 : index
    %c0_4 = arith.constant 0 : index
    %2 = vector.load %arg2[%c0_2, %c0_3, %c0_4] : memref<16x8x32xf32, #tpu.memory_space<vmem>>, vector<16x8x32xf32>
    %3 = vector.shape_cast %2 : vector<16x8x32xf32> to vector<128x32xf32>
    %c0_5 = arith.constant 0 : index
    %c0_6 = arith.constant 0 : index
    %c0_7 = arith.constant 0 : index
    %4 = vector.load %arg3[%c0_5, %c0_6, %c0_7] : memref<16x8x8xi8, #tpu.memory_space<vmem>>, vector<16x8x8xi8>
    %5 = arith.extsi %4 : vector<16x8x8xi8> to vector<16x8x8xi32>
    %c0_i32 = arith.constant 0 : i32
    %6 = vector.broadcast %c0_i32 : i32 to vector<16x8x8xi32>
    %7 = arith.cmpi sgt, %5, %6 : vector<16x8x8xi32>
    %c0_8 = arith.constant 0 : index
    %c0_9 = arith.constant 0 : index
    %8 = vector.load %arg4[%c0_8, %c0_9] : memref<32x64xf32, #tpu.memory_space<vmem>>, vector<32x64xf32>
    %cst = arith.constant dense<0.000000e+00> : vector<128x64xf32>
    %9 = tpu.matmul %1, %8, %cst {dimension_numbers = #tpu.dot_dimension_numbers<[1], [0], [0], [1], [0, 0, 1, 1], [], []>} : vector<128x32xf32>, vector<32x64xf32>, vector<128x64xf32> -> vector<128x64xf32>
    %c0_10 = arith.constant 0 : index
    %c0_11 = arith.constant 0 : index
    %10 = vector.load %arg5[%c0_10, %c0_11] : memref<1x64xf32, #tpu.memory_space<vmem>>, vector<1x64xf32>
    %11 = vector.broadcast %10 : vector<1x64xf32> to vector<128x64xf32>
    %12 = arith.addf %9, %11 : vector<128x64xf32>
    %cst_12 = arith.constant 0.000000e+00 : f32
    %13 = vector.broadcast %cst_12 : f32 to vector<128x64xf32>
    %14 = arith.cmpf ogt, %12, %13 : vector<128x64xf32>
    %15 = math.exp %12 : vector<128x64xf32>
    %cst_13 = arith.constant 1.000000e+00 : f32
    %16 = vector.broadcast %cst_13 : f32 to vector<128x64xf32>
    %17 = arith.subf %15, %16 : vector<128x64xf32>
    %18 = arith.select %14, %12, %17 : vector<128x64xi1>, vector<128x64xf32>
    %c0_14 = arith.constant 0 : index
    %c0_15 = arith.constant 0 : index
    %19 = vector.load %arg6[%c0_14, %c0_15] : memref<32x64xf32, #tpu.memory_space<vmem>>, vector<32x64xf32>
    %cst_16 = arith.constant dense<0.000000e+00> : vector<128x64xf32>
    %20 = tpu.matmul %3, %19, %cst_16 {dimension_numbers = #tpu.dot_dimension_numbers<[1], [0], [0], [1], [0, 0, 1, 1], [], []>} : vector<128x32xf32>, vector<32x64xf32>, vector<128x64xf32> -> vector<128x64xf32>
    %c0_17 = arith.constant 0 : index
    %c0_18 = arith.constant 0 : index
    %21 = vector.load %arg7[%c0_17, %c0_18] : memref<1x64xf32, #tpu.memory_space<vmem>>, vector<1x64xf32>
    %22 = vector.broadcast %21 : vector<1x64xf32> to vector<128x64xf32>
    %23 = arith.addf %20, %22 : vector<128x64xf32>
    %cst_19 = arith.constant 0.000000e+00 : f32
    %24 = vector.broadcast %cst_19 : f32 to vector<128x64xf32>
    %25 = arith.cmpf ogt, %23, %24 : vector<128x64xf32>
    %26 = math.exp %23 : vector<128x64xf32>
    %cst_20 = arith.constant 1.000000e+00 : f32
    %27 = vector.broadcast %cst_20 : f32 to vector<128x64xf32>
    %28 = arith.subf %26, %27 : vector<128x64xf32>
    %29 = arith.select %25, %23, %28 : vector<128x64xi1>, vector<128x64xf32>
    %30 = vector.shape_cast %29 : vector<128x64xf32> to vector<16x8x64xf32>
    %c0_21 = arith.constant 0 : index
    %c0_22 = arith.constant 0 : index
    %31 = vector.load %arg8[%c0_21, %c0_22] : memref<64x64xf32, #tpu.memory_space<vmem>>, vector<64x64xf32>
    %cst_23 = arith.constant dense<0.000000e+00> : vector<128x64xf32>
    %32 = tpu.matmul %18, %31, %cst_23 {dimension_numbers = #tpu.dot_dimension_numbers<[1], [0], [0], [1], [0, 0, 1, 1], [], []>} : vector<128x64xf32>, vector<64x64xf32>, vector<128x64xf32> -> vector<128x64xf32>
    %33 = vector.shape_cast %32 : vector<128x64xf32> to vector<16x8x64xf32>
    "tpu.trace_start"() <{level = 10 : i32, message = "bqf,bkf->bqk"}> : () -> ()
    %cst_24 = arith.constant dense<0.000000e+00> : vector<16x8x8xf32>
    %34 = tpu.matmul %33, %30, %cst_24 {dimension_numbers = #tpu.dot_dimension_numbers<[2], [2], [1], [1], [0, 0, 0, 1, 1, 1], [0], [0]>} : vector<16x8x64xf32>, vector<16x8x64xf32>, vector<16x8x8xf32> -> vector<16x8x8xf32>
    %cst_25 = arith.constant -1.000000e+08 : f32
    "tpu.trace_stop"() : () -> ()
    %35 = vector.broadcast %cst_25 : f32 to vector<16x8x8xf32>
    %36 = arith.select %7, %34, %35 : vector<16x8x8xi1>, vector<16x8x8xf32>
    %37 = tpu.iota {dimensions = array<i32: 2>} : vector<16x8x8xi32>
    %cst_26 = arith.constant dense<0xFF800000> : vector<16x8xf32>
    %38 = vector.multi_reduction <maximumf>, %36, %cst_26 [2] : vector<16x8x8xf32> to vector<16x8xf32>
    %39 = vector.shape_cast %38 : vector<16x8xf32> to vector<16x8x1xf32>
    %40 = vector.broadcast %39 : vector<16x8x1xf32> to vector<16x8x8xf32>
    %41 = arith.cmpf oeq, %36, %40 : vector<16x8x8xf32>
    %c8_i32 = arith.constant 8 : i32
    %42 = vector.broadcast %c8_i32 : i32 to vector<16x8x8xi32>
    %43 = arith.select %41, %37, %42 : vector<16x8x8xi1>, vector<16x8x8xi32>
    %cst_27 = arith.constant dense<2147483647> : vector<16x8xi32>
    %44 = vector.multi_reduction <minsi>, %43, %cst_27 [2] : vector<16x8x8xi32> to vector<16x8xi32>
    %45 = vector.shape_cast %44 : vector<16x8xi32> to vector<16x8x1xi32>
    %46 = vector.broadcast %45 : vector<16x8x1xi32> to vector<16x8x8xi32>
    %47 = arith.cmpi eq, %37, %46 : vector<16x8x8xi32>
    %48 = arith.extui %47 : vector<16x8x8xi1> to vector<16x8x8xi32>
    %49 = arith.sitofp %48 : vector<16x8x8xi32> to vector<16x8x8xf32>
    %50 = vector.broadcast %39 : vector<16x8x1xf32> to vector<16x8x8xf32>
    %51 = arith.subf %36, %50 : vector<16x8x8xf32>
    %52 = math.exp %51 : vector<16x8x8xf32>
    %cst_28 = arith.constant dense<0.000000e+00> : vector<16x8xf32>
    %53 = vector.multi_reduction <add>, %52, %cst_28 [2] : vector<16x8x8xf32> to vector<16x8xf32>
    %54 = vector.shape_cast %53 : vector<16x8xf32> to vector<16x8x1xf32>
    %55 = tpu.reciprocal %54 {approx = true} : vector<16x8x1xf32> -> vector<16x8x1xf32>
    %56 = vector.broadcast %55 : vector<16x8x1xf32> to vector<16x8x8xf32>
    %57 = arith.mulf %52, %56 : vector<16x8x8xf32>
    %58 = tpu.concatenate %49, %57 in 1 : vector<16x8x8xf32>, vector<16x8x8xf32> -> vector<16x16x8xf32>
    "tpu.trace_start"() <{level = 10 : i32, message = "bqk,bkf->bqf"}> : () -> ()
    %cst_29 = arith.constant dense<0.000000e+00> : vector<16x16x64xf32>
    %59 = tpu.matmul %58, %30, %cst_29 {dimension_numbers = #tpu.dot_dimension_numbers<[2], [1], [1], [2], [0, 0, 0, 1, 1, 2], [0], [0]>} : vector<16x16x8xf32>, vector<16x8x64xf32>, vector<16x16x64xf32> -> vector<16x16x64xf32>
    "tpu.trace_stop"() : () -> ()
    %60 = vector.extract_strided_slice %59 {offsets = [0, 0, 0], sizes = [16, 8, 64], strides = [1, 1, 1]} : vector<16x16x64xf32> to vector<16x8x64xf32>
    %61 = vector.shape_cast %60 : vector<16x8x64xf32> to vector<128x64xf32>
    %62 = vector.extract_strided_slice %59 {offsets = [0, 8, 0], sizes = [16, 8, 64], strides = [1, 1, 1]} : vector<16x16x64xf32> to vector<16x8x64xf32>
    %c0_30 = arith.constant 0 : index
    %c0_31 = arith.constant 0 : index
    %c0_32 = arith.constant 0 : index
    %63 = vector.load %arg13[%c0_30, %c0_31, %c0_32] : memref<16x8x64xf32, #tpu.memory_space<vmem>>, vector<16x8x64xf32>
    tpu.vector_store %arg13[%c0_30, %c0_31, %c0_32], %62 {strides = array<i32>} : memref<16x8x64xf32, #tpu.memory_space<vmem>>, vector<16x8x64xf32>,
    %c0_33 = arith.constant 0 : index
    %c0_34 = arith.constant 0 : index
    %64 = vector.load %arg9[%c0_33, %c0_34] : memref<64x256xf32, #tpu.memory_space<vmem>>, vector<64x256xf32>
    %cst_35 = arith.constant dense<0.000000e+00> : vector<128x256xf32>
    %65 = tpu.matmul %18, %64, %cst_35 {dimension_numbers = #tpu.dot_dimension_numbers<[1], [0], [0], [1], [0, 0, 1, 1], [], []>} : vector<128x64xf32>, vector<64x256xf32>, vector<128x256xf32> -> vector<128x256xf32>
    %c0_36 = arith.constant 0 : index
    %c0_37 = arith.constant 0 : index
    %66 = vector.load %arg10[%c0_36, %c0_37] : memref<64x256xf32, #tpu.memory_space<vmem>>, vector<64x256xf32>
    %cst_38 = arith.constant dense<0.000000e+00> : vector<128x256xf32>
    %67 = tpu.matmul %61, %66, %cst_38 {dimension_numbers = #tpu.dot_dimension_numbers<[1], [0], [0], [1], [0, 0, 1, 1], [], []>} : vector<128x64xf32>, vector<64x256xf32>, vector<128x256xf32> -> vector<128x256xf32>
    %68 = arith.mulf %65, %67 : vector<128x256xf32>
    %c0_39 = arith.constant 0 : index
    %c0_40 = arith.constant 0 : index
    %69 = vector.load %arg11[%c0_39, %c0_40] : memref<256x8xf32, #tpu.memory_space<vmem>>, vector<256x8xf32>
    %cst_41 = arith.constant dense<0.000000e+00> : vector<128x8xf32>
    %70 = tpu.matmul %68, %69, %cst_41 {dimension_numbers = #tpu.dot_dimension_numbers<[1], [0], [0], [1], [0, 0, 1, 1], [], []>} : vector<128x256xf32>, vector<256x8xf32>, vector<128x8xf32> -> vector<128x8xf32>
    %c0_42 = arith.constant 0 : index
    %c0_43 = arith.constant 0 : index
    %71 = vector.load %arg12[%c0_42, %c0_43] : memref<1x8xf32, #tpu.memory_space<vmem>>, vector<1x8xf32>
    %72 = vector.broadcast %71 : vector<1x8xf32> to vector<128x8xf32>
    %73 = arith.addf %70, %72 : vector<128x8xf32>
    %74 = vector.shape_cast %73 : vector<128x8xf32> to vector<16x8x8xf32>
    %cst_44 = arith.constant dense<0xFF800000> : vector<16x8xf32>
    %75 = vector.multi_reduction <maximumf>, %74, %cst_44 [2] : vector<16x8x8xf32> to vector<16x8xf32>
    %76 = vector.shape_cast %75 : vector<16x8xf32> to vector<16x8x1xf32>
    %77 = vector.broadcast %76 : vector<16x8x1xf32> to vector<16x8x8xf32>
    %78 = arith.subf %74, %77 : vector<16x8x8xf32>
    %79 = math.exp %78 : vector<16x8x8xf32>
    %cst_45 = arith.constant dense<0.000000e+00> : vector<16x8xf32>
    %80 = vector.multi_reduction <add>, %79, %cst_45 [2] : vector<16x8x8xf32> to vector<16x8xf32>
    %81 = vector.shape_cast %80 : vector<16x8xf32> to vector<16x8x1xf32>
    %82 = math.log %81 : vector<16x8x1xf32>
    %83 = vector.broadcast %82 : vector<16x8x1xf32> to vector<16x8x8xf32>
    %84 = arith.subf %78, %83 : vector<16x8x8xf32>
    %c0_46 = arith.constant 0 : index
    %c0_47 = arith.constant 0 : index
    %c0_48 = arith.constant 0 : index
    %85 = vector.load %arg15[%c0_46, %c0_47, %c0_48] : memref<16x8x8xf32, #tpu.memory_space<vmem>>, vector<16x8x8xf32>
    tpu.vector_store %arg15[%c0_46, %c0_47, %c0_48], %84 {strides = array<i32>} : memref<16x8x8xf32, #tpu.memory_space<vmem>>, vector<16x8x8xf32>,
    %cst_49 = arith.constant 0.000000e+00 : f32
    %cst_50 = arith.constant -103.616325 : f32
    %86 = vector.broadcast %cst_49 : f32 to vector<16x8x8xf32>
    %87 = vector.broadcast %cst_50 : f32 to vector<16x8x8xf32>
    %88 = arith.select %7, %86, %87 : vector<16x8x8xi1>, vector<16x8x8xf32>
    %89 = arith.addf %36, %88 : vector<16x8x8xf32>
    %90 = vector.broadcast %39 : vector<16x8x1xf32> to vector<16x8x8xf32>
    %91 = arith.subf %89, %90 : vector<16x8x8xf32>
    %92 = math.log %54 : vector<16x8x1xf32>
    %93 = vector.broadcast %92 : vector<16x8x1xf32> to vector<16x8x8xf32>
    %94 = arith.subf %91, %93 : vector<16x8x8xf32>
    %c0_51 = arith.constant 0 : index
    %c0_52 = arith.constant 0 : index
    %c0_53 = arith.constant 0 : index
    %95 = vector.load %arg14[%c0_51, %c0_52, %c0_53] : memref<16x8x8xf32, #tpu.memory_space<vmem>>, vector<16x8x8xf32>
    tpu.vector_store %arg14[%c0_51, %c0_52, %c0_53], %94 {strides = array<i32>} : memref<16x8x8xf32, #tpu.memory_space<vmem>>, vector<16x8x8xf32>,
    return
  }
  func.func @transform_0(%arg0: i32) -> (i32, i32, i32) {
    %c0_i32 = arith.constant 0 : i32
    %c0_i32_0 = arith.constant 0 : i32
    %c0_i32_1 = arith.constant 0 : i32
    return %arg0, %c0_i32, %c0_i32_0 : i32, i32, i32
  }
  func.func @transform_1(%arg0: i32) -> (i32, i32, i32) {
    %c0_i32 = arith.constant 0 : i32
    %c0_i32_0 = arith.constant 0 : i32
    %c0_i32_1 = arith.constant 0 : i32
    return %arg0, %c0_i32, %c0_i32_0 : i32, i32, i32
  }
  func.func @transform_2(%arg0: i32) -> (i32, i32, i32) {
    %c0_i32 = arith.constant 0 : i32
    %c0_i32_0 = arith.constant 0 : i32
    %c0_i32_1 = arith.constant 0 : i32
    return %arg0, %c0_i32, %c0_i32_0 : i32, i32, i32
  }
  func.func @transform_3(%arg0: i32) -> (i32, i32) {
    %c0_i32 = arith.constant 0 : i32
    %c0_i32_0 = arith.constant 0 : i32
    %c0_i32_1 = arith.constant 0 : i32
    return %c0_i32, %c0_i32_0 : i32, i32
  }
  func.func @transform_4(%arg0: i32) -> (i32, i32) {
    %c0_i32 = arith.constant 0 : i32
    %c0_i32_0 = arith.constant 0 : i32
    %c0_i32_1 = arith.constant 0 : i32
    return %c0_i32, %c0_i32_0 : i32, i32
  }
  func.func @transform_5(%arg0: i32) -> (i32, i32) {
    %c0_i32 = arith.constant 0 : i32
    %c0_i32_0 = arith.constant 0 : i32
    %c0_i32_1 = arith.constant 0 : i32
    return %c0_i32, %c0_i32_0 : i32, i32
  }
  func.func @transform_6(%arg0: i32) -> (i32, i32) {
    %c0_i32 = arith.constant 0 : i32
    %c0_i32_0 = arith.constant 0 : i32
    %c0_i32_1 = arith.constant 0 : i32
    return %c0_i32, %c0_i32_0 : i32, i32
  }
  func.func @transform_7(%arg0: i32) -> (i32, i32) {
    %c0_i32 = arith.constant 0 : i32
    %c0_i32_0 = arith.constant 0 : i32
    %c0_i32_1 = arith.constant 0 : i32
    return %c0_i32, %c0_i32_0 : i32, i32
  }
  func.func @transform_8(%arg0: i32) -> (i32, i32) {
    %c0_i32 = arith.constant 0 : i32
    %c0_i32_0 = arith.constant 0 : i32
    %c0_i32_1 = arith.constant 0 : i32
    return %c0_i32, %c0_i32_0 : i32, i32
  }
  func.func @transform_9(%arg0: i32) -> (i32, i32) {
    %c0_i32 = arith.constant 0 : i32
    %c0_i32_0 = arith.constant 0 : i32
    %c0_i32_1 = arith.constant 0 : i32
    return %c0_i32, %c0_i32_0 : i32, i32
  }
  func.func @transform_10(%arg0: i32) -> (i32, i32) {
    %c0_i32 = arith.constant 0 : i32
    %c0_i32_0 = arith.constant 0 : i32
    %c0_i32_1 = arith.constant 0 : i32
    return %c0_i32, %c0_i32_0 : i32, i32
  }
  func.func @transform_11(%arg0: i32) -> (i32, i32) {
    %c0_i32 = arith.constant 0 : i32
    %c0_i32_0 = arith.constant 0 : i32
    %c0_i32_1 = arith.constant 0 : i32
    return %c0_i32, %c0_i32_0 : i32, i32
  }
  func.func @transform_12(%arg0: i32) -> (i32, i32, i32) {
    %c0_i32 = arith.constant 0 : i32
    %c0_i32_0 = arith.constant 0 : i32
    %c0_i32_1 = arith.constant 0 : i32
    return %arg0, %c0_i32, %c0_i32_0 : i32, i32, i32
  }
  func.func @transform_13(%arg0: i32) -> (i32, i32, i32) {
    %c0_i32 = arith.constant 0 : i32
    %c0_i32_0 = arith.constant 0 : i32
    %c0_i32_1 = arith.constant 0 : i32
    return %arg0, %c0_i32, %c0_i32_0 : i32, i32, i32
  }
  func.func @transform_14(%arg0: i32) -> (i32, i32, i32) {
    %c0_i32 = arith.constant 0 : i32
    %c0_i32_0 = arith.constant 0 : i32
    %c0_i32_1 = arith.constant 0 : i32
    return %arg0, %c0_i32, %c0_i32_0 : i32, i32, i32
  }
}

</mosaic_0001>

<bundles_post_ra>
// kernel: tpu_custom_call.1
= control target key start
LH: loop header
LB: loop body
LE: loop exit
PB: predicated region body
PF: predicated region fallthrough
CT: control target
= control target key end

     0   :  { %s9193_s0 = inlined_call_operand.vmem [shape: f32[32,8,32], index: 0, kind: input, shape index: {}]   ;;  %s9194_s1 = inlined_call_operand.hbm [shape: f32[32,8,32], index: 1, kind: input, shape index: {}]   ;;  %s9195_s2 = inlined_call_operand.vmem [shape: s8[32,8,8], index: 2, kind: input, shape index: {}]   ;;  %s9196_s3 = inlined_call_operand.vmem [shape: f32[32,64], index: 3, kind: input, shape index: {}]   ;;  %s9197_s4 = inlined_call_operand.vmem [shape: f32[1,64], index: 4, kind: input, shape index: {}]   ;;  %s9198_s5 = inlined_call_operand.hbm [shape: f32[32,64], index: 5, kind: input, shape index: {}]   ;;  %s9199_s6 = inlined_call_operand.vmem [shape: f32[1,64], index: 6, kind: input, shape index: {}]   ;;  %s9200_s7 = inlined_call_operand.vmem [shape: f32[64,64], index: 7, kind: input, shape index: {}]   ;;  %s9201_s8 = inlined_call_operand.hbm [shape: f32[64,256], index: 8, kind: input, shape index: {}]   ;;  %s9202_s9 = inlined_call_operand.hbm [shape: f32[64,256], index: 9, kind: input, shape index: {}]   ;;  %s9203_s10 = inlined_call_operand.vmem [shape: f32[256,8], index: 10, kind: input, shape index: {}]   ;;  %s9204_s11 = inlined_call_operand.vmem [shape: f32[1,8], index: 11, kind: input, shape index: {}]   ;;  %s9205_s12 = inlined_call_operand.hbm [shape: f32[32,8,64], index: 12, kind: output, shape index: {0}]   ;;  %s9206_s13 = inlined_call_operand.vmem [shape: f32[32,8,8], index: 13, kind: output, shape index: {1}]   ;;  %s9207_s14 = inlined_call_operand.vmem [shape: f32[32,8,8], index: 14, kind: output, shape index: {2}]  }
   0x1   :  { %9310 = sst [smem:[#allocation89_spill]] %s9195_s2 }
   0x2   :  { %9311 = sst [smem:[#allocation90_spill]] %s9198_s5 }
   0x3   :  { %9312 = sst [smem:[#allocation91_spill]] %s9203_s10 }
   0x4   :  { %9313 = sst [smem:[#allocation92_spill]] %s9204_s11 }
   0x5   :  { %9314 = sst [smem:[#allocation93_spill]] %s9205_s12 }
   0x6   :  { %9315 = sst [smem:[#allocation94_spill]] %s9206_s13 }
   0x7   :  { %9316 = sst [smem:[#allocation95_spill]] %s9207_s14 }
   0x8   :  { %20 = vsyncpa [#allocation3], 0 }
   0x9   :  { %22 = vsyncpa [#allocation3 + $0x1], 0 }
   0xa   :  { %23 = vsyncpa [#allocation6], 0 }
   0xb   :  { %24 = vsyncpa [#allocation9], 0 }
   0xc   :  { %25 = vsyncpa [#allocation4], 0 }
   0xd   :  { %27 = vsyncpa [#allocation4 + $0x1], 0  ;;  %s7080_s29 = smov 0   ;;  %s7082_s30 = smov 0  }
   0xe   :  { %s7084_s15 = smov 0   ;;  %s7086_s16 = smov 0  }
   0xf LB: > { %9317 = sst [smem:[#allocation15_spill]] %s6977_s29  ;;  %s7101_s17 = sadd.s32 4294967295, %s6989_s16   ;;  %s6989_s16 = sphi %s7086_s16, %s9578_s16   ;;  %s6985_s15 = sphi %s7084_s15, %s9577_s15   ;;  %s6981_s30 = sphi %s7082_s30, %s9576_s30   ;;  %s6977_s29 = sphi %s7080_s29, %s9575_s29  }
  0x10   : > { %s5643_s18 = sadd.s32 4294967294, %s6989_s16   ;;  %p79_p0 = scmp.ne.s32.totalorder %s6981_s30, %s6977_s29 }
  0x11   : > { %p9210_p1 = scmp.eq.s32.totalorder %s7101_s17, 0  ;;  %p324_p3 = scmp.eq.s32.totalorder %s5643_s18, 1 }
  0x12   : > { %p5644_p5 = scmp.ge.s32.totalorder %s6989_s16, 1  ;;  %p383_p7 = scmp.lt.s32.totalorder %s6989_s16, 3 }
  0x13   : > { %p7110_p4 = por %p9210_p1, %p79_p0  ;;  %p7115_p6 = por %p324_p3, %p79_p0 }
  0x14   : > { %p7120_p8 = pnand %p5644_p5, %p383_p7  ;;  %s6991_s22 = smov [#allocation5]  }
  0x15   : > { %s9318_s19 = scalar_select %p7110_p4, 1, 0 }
  0x16   : > { %s9319_s20 = scalar_select %p7115_p6, 1, 0 }
  0x17   : > { %s9321_s21 = scalar_select %p7120_p8, 1, 0 }
  0x18   : > { %9320 = sst [smem:[#allocation16_spill]] %s9319_s20  ;;  %s401_s23 = sshll.u32 %s6991_s22, 4  ;;  %s7124_s23 = int_to_ptr.vmem [resolvable:$true] %s401_s23 }
  0x19   : > { %p6507_p9 = pneg %p7120_p8  ;;  %s6992_s25 = smov [#allocation7]  }
  0x1a   : > { %s420_s26 = sshll.u32 %s6992_s25, 4  ;;  %s9323_s5 = sld [smem:[#allocation90_spill]]  ;;  %s7135_s26 = int_to_ptr.vmem [resolvable:$true] %s420_s26 }
  0x1b   : > { %p7131_p11 = pnand %p6507_p9, %p9210_p1 }
  0x1d   : > { %p7145_p13 = pneg %p7131_p11 }
  0x20   : > { %s6801_s18 = scalar_lea.hbm %s9323_s5, 512 }
  0x21   : > { %p6802_p12 = scmp.ne.s32.totalorder %s9323_s5, %s6801_s18  ;;  %p6808_p5 = scmp.lt.u32.totalorder %s6801_s18, %s9323_s5 }
  0x23   : > { %p6804_p0 = pnand %p7145_p13, %p6802_p12 }
  0x25   : > { %p6805_p3 = pneg %p6804_p0 }
  0x27   : > { %p6810_p7 = pnand %p6808_p5, %p6805_p3 }
  0x29   : > { %6813 = shalt.err (!%p6810_p7)
}
  0x2a   : > { %s6814_s20 = scalar_lea.vmem %s7124_s23, 512  ;;  %p6822_p2 = scmp.lt.s32.totalorder %s7124_s23, %s7124_s23 }
  0x2b   : > { %p6815_p9 = scmp.ne.s32.totalorder %s7124_s23, %s6814_s20  ;;  %p6823_p6 = scmp.lt.s32.totalorder %s6814_s20, %s6814_s20 }
  0x2d   : > { %p6817_p10 = pnand %p6815_p9, %p7145_p13  ;;  %p6824_p12 = por %p6823_p6, %p6822_p2 }
  0x2f   : > { %p6818_p1 = pneg %p6817_p10 }
  0x31   : > { %p6825_p0 = pnand %p6824_p12, %p6818_p1 }
  0x33   : > { %6828 = shalt.err (!%p6825_p0)
}
  0x34   : > { %s9213_s27 = smov 128   ;;  %s9214_s14 = smov 8  }
  0x35   : > { %6510 = dma.hbm_to_vmem [thread:$0]  (!%p7131_p11), %s9323_s5, 512, %s7124_s23, [#allocation6], %s9213_s27, %s9213_s27, %s9214_s14  }
  0x36   : > { %s6829_s20 = scalar_lea.hbm %s9201_s8, 2048 }
  0x37   : > { %p6830_p1 = scmp.ne.s32.totalorder %s9201_s8, %s6829_s20  ;;  %p6836_p10 = scmp.lt.u32.totalorder %s6829_s20, %s9201_s8 }
  0x39   : > { %p6832_p2 = pnand %p6830_p1, %p7145_p13 }
  0x3b   : > { %p6833_p6 = pneg %p6832_p2 }
  0x3d   : > { %p6838_p3 = pnand %p6836_p10, %p6833_p6 }
  0x3f   : > { %6841 = shalt.err (!%p6838_p3)
}
  0x40   : > { %s6842_s23 = scalar_lea.vmem %s7135_s26, 2048  ;;  %p6850_p12 = scmp.lt.s32.totalorder %s7135_s26, %s7135_s26 }
  0x41   : > { %p6843_p5 = scmp.ne.s32.totalorder %s7135_s26, %s6842_s23  ;;  %p6851_p0 = scmp.lt.s32.totalorder %s6842_s23, %s6842_s23 }
  0x43   : > { %p6845_p7 = pnand %p6843_p5, %p7145_p13  ;;  %p6852_p1 = por %p6851_p0, %p6850_p12 }
  0x45   : > { %p6846_p9 = pneg %p6845_p7 }
  0x47   : > { %p6853_p2 = pnand %p6852_p1, %p6846_p9 }
  0x49   : > { %6856 = shalt.err (!%p6853_p2)
}
  0x4a   : > { %s6995_s11 = smov 256   ;;  %s6996_s10 = smov 16  }
  0x4b   : > { %6513 = dma.hbm_to_vmem [thread:$0]  (!%p7131_p11), %s9201_s8, 2048, %s7135_s26, [#allocation6], %s6995_s11, %s6995_s11, %s6996_s10  }
  0x4c   : > { %s6997_s28 = smov [#allocation8]   ;;  %s7193_s22 = sadd.s32 1, %s6989_s16  }
  0x4d   : > { %s433_s18 = sshll.u32 %s6997_s28, 4  ;;  %s6857_s23 = scalar_lea.hbm %s9202_s9, 2048  ;;  %s434_s18 = int_to_ptr.vmem [resolvable:$true] %s433_s18 }
  0x4e   : > { %p6858_p6 = scmp.ne.s32.totalorder %s9202_s9, %s6857_s23  ;;  %p6864_p5 = scmp.lt.u32.totalorder %s6857_s23, %s9202_s9 }
  0x50   : > { %p6860_p10 = pnand %p6858_p6, %p7145_p13 }
  0x52   : > { %p6861_p3 = pneg %p6860_p10 }
  0x54   : > { %p6866_p7 = pnand %p6864_p5, %p6861_p3 }
  0x56   : > { %6869 = shalt.err (!%p6866_p7)
}
  0x57   : > { %s6870_s26 = scalar_lea.vmem %s434_s18, 2048  ;;  %p6878_p1 = scmp.lt.s32.totalorder %s434_s18, %s434_s18 }
  0x58   : > { %p6871_p9 = scmp.ne.s32.totalorder %s434_s18, %s6870_s26  ;;  %p6879_p2 = scmp.lt.s32.totalorder %s6870_s26, %s6870_s26 }
  0x5a   : > { %p6873_p12 = pnand %p6871_p9, %p7145_p13  ;;  %p6880_p4 = por %p6879_p2, %p6878_p1 }
  0x5c   : > { %p6874_p0 = pneg %p6873_p12 }
  0x5e   : > { %p6881_p8 = pnand %p6880_p4, %p6874_p0 }
  0x60   : > { %6884 = shalt.err (!%p6881_p8)
}
  0x61   : > { %6516 = dma.hbm_to_vmem [thread:$0]  (!%p7131_p11), %s9202_s9, 2048, %s434_s18, [#allocation9], %s6995_s11, %s6995_s11, %s6996_s10  }
  0x62   : > { %s63_s2 = ssub.s32 %s6989_s16, %s7193_s22  ;;  %s66_s5 = sadd.s32 1, %s6985_s15 }
  0x63   : > { %p64_p4 = scmp.eq.s32.totalorder %s63_s2, 0  ;;  %p73_p8 = scmp.ne.s32.totalorder %s6985_s15, %s6981_s30 }
  0x64   : > { %p74_p13 = scmp.eq.s32.totalorder %s6989_s16, 0  ;;  %p6528_p6 = scmp.lt.s32.totalorder %s6989_s16, 2 }
  0x65   : > { %s7221_s29 = scalar_select %p64_p4, %s6985_s15, %s66_s5  }
  0x66   : > { %p75_p10 = por %p74_p13, %p73_p8  ;;  %p9325_p3 = scmp.eq.s32.totalorder %s7101_s17, 1 }
  0x67   : > { %s462_s12 = sand.u32 1, %s6985_s15   ;;  %s5866_s13 = sshll.u32 %s6989_s16, 11 }
  0x68   : > { %p7225_p5 = por %p9325_p3, %p73_p8  ;;  %s5649_s28 = sshll.u32 %s462_s12, 7 }
  0x69   : > { %s7234_s11 = scalar_lea.hbm %s9194_s1, %s5866_s13  ;;  %s466_s10 = scalar_lea.vmem [#allocation2], %s5649_s28 }
  0x6a   : > { %s473_s18 = sshll.u32 %s466_s10, 4  ;;  %p7236_p11 = pnand %p6528_p6, %p75_p10  ;;  %s7240_s18 = int_to_ptr.vmem [resolvable:$true] %s473_s18 }
  0x6b   : > { %s7242_s26 = scalar_lea.sflag [#allocation3], %s462_s12  ;;  %s6885_s27 = scalar_lea.hbm %s7234_s11, 2048 }
  0x6c   : > { %p6886_p7 = scmp.ne.s32.totalorder %s7234_s11, %s6885_s27  ;;  %p6887_p9 = pneg %p7236_p11 }
  0x6d   : > { %s6890_s5 = scalar_lea.hbm %s9194_s1, 4096  ;;  %p6891_p1 = scmp.lt.u32.totalorder %s7234_s11, %s9194_s1 }
  0x6e   : > { %p6888_p12 = pnand %p6887_p9, %p6886_p7  ;;  %p6892_p2 = scmp.lt.u32.totalorder %s6890_s5, %s6885_s27 }
  0x6f   : > { %p6894_p8 = scmp.lt.u32.totalorder %s6885_s27, %s7234_s11 }
  0x70   : > { %p6889_p0 = pneg %p6888_p12  ;;  %p6893_p4 = por %p6892_p2, %p6891_p1 }
  0x72   : > { %p6895_p13 = por %p6894_p8, %p6893_p4 }
  0x74   : > { %p6896_p6 = pnand %p6895_p13, %p6889_p0 }
  0x76   : > { %6899 = shalt.err (!%p6896_p6)
}
  0x77   : > { %s6900_s12 = scalar_lea.vmem %s7240_s18, 2048  ;;  %s6998_s25 = smov [#allocation2]  }
  0x78   : > { %p6901_p10 = scmp.ne.s32.totalorder %s7240_s18, %s6900_s12  ;;  %s6905_s20 = sshll.u32 %s6998_s25, 4  ;;  %s6906_s20 = int_to_ptr.vmem [resolvable:$false] %s6905_s20 }
  0x79   : > { %s6907_s10 = scalar_lea.vmem %s6906_s20, 4096  ;;  %p6908_p12 = scmp.lt.s32.totalorder %s7240_s18, %s6906_s20 }
  0x7a   : > { %p6903_p3 = pnand %p6901_p10, %p6887_p9  ;;  %p6909_p1 = scmp.lt.s32.totalorder %s6907_s10, %s6900_s12 }
  0x7c   : > { %p6904_p7 = pneg %p6903_p3  ;;  %p6910_p2 = por %p6909_p1, %p6908_p12 }
  0x7e   : > { %p6911_p4 = pnand %p6910_p2, %p6904_p7 }
  0x80   : > { %6914 = shalt.err (!%p6911_p4)
}
  0x81   : > { %s9328_s27 = smov 8   ;;  %s9329_s14 = smov 128  }
  0x82   : > { %6520 = dma.hbm_to_vmem [thread:$0]  (!%p7236_p11), %s7234_s11, 2048, %s7240_s18, %s7242_s26, %s9329_s14, %s9329_s14, %s9328_s27  }
  0x83   : > { %p9330_p9 = scmp.ne.s32.totalorder %s9321_s21, 0 }
  0x85   : > { %494 = sbr.rel (%p9330_p9) target bundleno = 2286 (0x8ee), region = 68 }
  0x8c   : > { %s7276_s2 = sand.u32 1, %s6981_s30   ;;  %p9331_p0 = scmp.ne.s32.totalorder %s9318_s19, 0 }
  0x8d   : > { %s5653_s5 = sshll.u32 %s7276_s2, 7  ;;  %s497_s13 = scalar_lea.sflag [#allocation3], %s7276_s2 }
  0x8e   : > { %s7282_s23 = scalar_lea.vmem [#allocation2], %s5653_s5 }
  0x8f   : > { %6960 = dma.done.wait (%p9331_p0), %s497_s13, 2048  }
  0x90   : > { %6962 = vsyncadd (%p9331_p0), %s497_s13, 4294965248  ;;  %p9332_p11 = scmp.eq.s32.totalorder %s7101_s17, 0 }
  0x92   : > { %6964 = dma.done.wait (%p9332_p11), [#allocation6], 2560   ;;  %p9333_p8 = pmov %p9332_p11 }
  0x94   : > { %6966 = vsyncadd (%p9333_p8), [#allocation6], 4294964736  ;;  %p9334_p13 = pmov %p9333_p8 }
  0x95   : > { %p9335_p6 = pmov %p9333_p8 }
  0x96   : > { %6968 = dma.done.wait (%p9334_p13), [#allocation9], 2048  }
  0x97   : > { %6970 = vsyncadd (%p9335_p6), [#allocation9], 4294965248  ;;  %s5658_s21 = sshll.u32 %s7101_s17, 4  ;;  %vm694_vm0 = vcmask 261120   ;;  %v683_v0 = vld [vmem:[%s9196_s3] sm:$0xff]  ;;  %v684_v1 = vld [vmem:[%s9196_s3 + $0x8] sm:$0xff] }
  0x98   : > { %p578_p10 = scmp.lt.s32.totalorder %s5658_s21, 31  ;;  %v685_v2 = vld [vmem:[%s9196_s3 + $0x10] sm:$0xff]  ;;  %v6388_v3 = vpack.c.bf16 %v684_v1, %v683_v0  ;;  %v686_v4 = vld [vmem:[%s9196_s3 + $0x18] sm:$0xff]  ;;  %v968_v7 = vld [vmem:[#allocation5] sm:$0xff]  ;;  %v9217_v56 = vmov 0.0   ;;  %vm9223_vm1 = vcmask 523264  }
  0x99   : > { %v6392_v6 = vpack.c.bf16 %v686_v4, %v685_v2  ;;  %v969_v8 = vld [vmem:[#allocation5 + $0x8] sm:$0xff]  ;;  %v970_v9 = vld [vmem:[#allocation5 + $0x10] sm:$0xff]  ;;  %v971_v10 = vld [vmem:[#allocation5 + $0x18] sm:$0xff]  ;;  %s9366_s11 = sld [smem:[#allocation89_spill]]  ;;  %s9446_s12 = sld [smem:[#allocation94_spill]] }
  0x9a   : > { %s9580_s21 = smov (!%p578_p10, %s5658_s21), 31  ;;  %6389 = vmatprep.subr.bf16.mxu0 %v6388_v3  ;;  %v6396_v12 = vpack.c.bf16 %v969_v8, %v968_v7  ;;  %v6400_v13 = vpack.c.bf16 %v971_v10, %v970_v9  ;;  %v619_v14 = vld [vmem:[%s7282_s23] sm:$0xff]  ;;  %v1253_v17 = vld [vmem:[%s9200_s7 + $0x8] sm:$0xff]  ;;  %v1254_v21 = vld [vmem:[%s9200_s7 + $0x10] sm:$0xff]  ;;  %s9541_s10 = sld [smem:[#allocation91_spill]] }
  0x9b   : > { %s7300_s19 = sshll.u32 %s9580_s21, 3  ;;  %6391 = vmatpush3.bf16.msra.mxu0 %v6388_v3  ;;  %6164 = vmatprep.mubr.msk.f32.mxu1 %vm694_vm0, %v619_v14  ;;  %v1252_v16 = vld [vmem:[%s9200_s7] sm:$0xff]  ;;  %v1255_v22 = vld [vmem:[%s9200_s7 + $0x18] sm:$0xff]  ;;  %v620_v23 = vld [vmem:[%s7282_s23 + $0x8] sm:$0xff]  ;;  %s5661_s14 = sshll.u32 %s9580_s21, 1 }
  0x9c   : > { %s7306_s26 = scalar_lea.vmem %s9193_s0, %s7300_s19  ;;  %6393 = vmatprep.subr.bf16.mxu0 %v6392_v6  ;;  %6397 = vmatprep.subr.bf16.mxu1 %v6396_v12  ;;  %v6404_v19 = vpack.c.bf16 %v1253_v17, %v1252_v16  ;;  %v621_v25 = vld [vmem:[%s7282_s23 + $0x10] sm:$0xff]  ;;  %v6408_v27 = vpack.c.bf16 %v1255_v22, %v1254_v21  ;;  %v622_v28 = vld [vmem:[%s7282_s23 + $0x18] sm:$0xff]  ;;  %v623_v30 = vld [vmem:[%s7282_s23 + $0x20] sm:$0xff]  ;;  %s5436_s20 = scalar_lea.sflag [#allocation4], %s7276_s2 }
  0x9d   : > { %v603_v5 = vld [vmem:[%s7306_s26] sm:$0xff]  ;;  %v604_v11 = vld [vmem:[%s7306_s26 + $0x8] sm:$0xff]  ;;  %v605_v15 = vld [vmem:[%s7306_s26 + $0x10] sm:$0xff]  ;;  %6399 = vmatpush3.bf16.msra.mxu1 %v6396_v12 }
  0x9e   : > { %6132 = vmatprep.mubr.msk.f32.mxu0 %vm694_vm0, %v603_v5  ;;  %v606_v18 = vld [vmem:[%s7306_s26 + $0x18] sm:$0xff]  ;;  %6401 = vmatprep.subr.bf16.mxu1 %v6400_v13  ;;  %v607_v20 = vld [vmem:[%s7306_s26 + $0x20] sm:$0xff]  ;;  %v608_v24 = vld [vmem:[%s7306_s26 + $0x28] sm:$0xff] }
  0x9f   : > { %6395 = vmatpush3.bf16.msra.mxu0 %v6392_v6  ;;  %v609_v26 = vld [vmem:[%s7306_s26 + $0x30] sm:$0xff]  ;;  %v610_v29 = vld [vmem:[%s7306_s26 + $0x38] sm:$0xff]  ;;  %v611_v31 = vld [vmem:[%s7306_s26 + $0x40] sm:$0xff]  ;;  %s7821_s18 = scalar_lea.vmem %s9366_s11, %s5661_s14  ;;  %s8375_s25 = scalar_lea.vmem %s9446_s12, %s7300_s19 }
  0xa0   : > { %v624_v32 = vld [vmem:[%s7282_s23 + $0x28] sm:$0xff]  ;;  %v625_v34 = vld [vmem:[%s7282_s23 + $0x30] sm:$0xff]  ;;  %v626_v36 = vld [vmem:[%s7282_s23 + $0x38] sm:$0xff]  ;;  %6268 = vmatprep.subr.mxu0 %v9217_v56  ;;  %s9567_s11 = sld [smem:[#allocation92_spill]]  ;;  %s9568_s12 = sld [smem:[#allocation93_spill]] }
  0xa1   : > { %6403 = vmatpush3.bf16.msra.mxu1 %v6400_v13  ;;  %v612_v33 = vld [vmem:[%s7306_s26 + $0x48] sm:$0xff]  ;;  %v613_v35 = vld [vmem:[%s7306_s26 + $0x50] sm:$0xff]  ;;  %v614_v37 = vld [vmem:[%s7306_s26 + $0x58] sm:$0xff]  ;;  %s7002_s14 = smov [#allocation10]  }
  0xa2   : > { %6133 = vmatmul.mubr.msk.f32.vlgmr.msra.gmra.mrb[0].mxu0 %vm694_vm0, %v604_v11  ;;  %6405 = vmatprep.subr.bf16.mxu1 %v6404_v19  ;;  %v627_v38 = vld [vmem:[%s7282_s23 + $0x40] sm:$0xff]  ;;  %v628_v40 = vld [vmem:[%s7282_s23 + $0x48] sm:$0xff]  ;;  %v629_v42 = vld [vmem:[%s7282_s23 + $0x50] sm:$0xff]  ;;  %s6919_s13 = sshll.u32 %s7002_s14, 4  ;;  %s6920_s13 = int_to_ptr.vmem [resolvable:$false] %s6919_s13 }
  0xa3   : > { %6135 = vmatprep.mubr.msk.f32.mxu0 %vm694_vm0, %v605_v15  ;;  %v615_v39 = vld [vmem:[%s7306_s26 + $0x60] sm:$0xff]  ;;  %v616_v41 = vld [vmem:[%s7306_s26 + $0x68] sm:$0xff]  ;;  %v617_v43 = vld [vmem:[%s7306_s26 + $0x70] sm:$0xff] }
  0xa4   : > { %6165 = vmatmul.mubr.msk.f32.vlgmr.msra.gmra.mrb[0].mxu1 %vm694_vm0, %v620_v23  ;;  %v630_v44 = vld [vmem:[%s7282_s23 + $0x58] sm:$0xff]  ;;  %v631_v46 = vld [vmem:[%s7282_s23 + $0x60] sm:$0xff]  ;;  %v632_v47 = vld [vmem:[%s7282_s23 + $0x68] sm:$0xff] }
  0xa5   : > { %6167 = vmatprep.mubr.msk.f32.mxu1 %vm694_vm0, %v621_v25  ;;  %6407 = vmatpush3.bf16.msra.mxu1 %v6404_v19  ;;  %v618_v45 = vld [vmem:[%s7306_s26 + $0x78] sm:$0xff]  ;;  %v633_v48 = vld [vmem:[%s7282_s23 + $0x70] sm:$0xff]  ;;  %v1256_v50 = vld [vmem:[%s9200_s7 + $0x20] sm:$0xff] }
  0xa6   : > { %6136 = vmatmul.mubr.msk.f32.gmra.mrb[2].mxu0 %vm694_vm0, %v606_v18  ;;  %6409 = vmatprep.subr.bf16.mxu1 %v6408_v27  ;;  %v634_v49 = vld [vmem:[%s7282_s23 + $0x78] sm:$0xff]  ;;  %v1257_v51 = vld [vmem:[%s9200_s7 + $0x28] sm:$0xff]  ;;  %v1258_v53 = vld [vmem:[%s9200_s7 + $0x30] sm:$0xff]  ;;  %s8714_s23 = scalar_lea.vmem [#allocation10], %s5653_s5 }
  0xa7   : > { %6138 = vmatprep.mubr.msk.f32.mxu0 %vm694_vm0, %v607_v20  ;;  %v6412_v52 = vpack.c.bf16 %v1257_v51, %v1256_v50  ;;  %v1259_v54 = vld [vmem:[%s9200_s7 + $0x38] sm:$0xff]  ;;  %v7413_v57 = vld [vmem:[%s9197_s4] ss:$0 sm:$0xff]  ;;  %s5459_s5 = sshll.u32 %s8714_s23, 4  ;;  %s9095_s5 = int_to_ptr.vmem [resolvable:$true] %s5459_s5 }
  0xa8   : > { %6168 = vmatmul.mubr.msk.f32.gmra.mrb[2].mxu1 %vm694_vm0, %v622_v28  ;;  %v6416_v55 = vpack.c.bf16 %v1259_v54, %v1258_v53  ;;  %v7426_v4 = vld [vmem:[%s9199_s6] ss:$0 sm:$0xff]  ;;  %s6915_s27 = scalar_lea.vmem %s9095_s5, 2048  ;;  %p6922_p1 = scmp.lt.s32.totalorder %s9095_s5, %s6920_s13 }
  0xa9   : > { %6170 = vmatprep.mubr.msk.f32.mxu1 %vm694_vm0, %v623_v30  ;;  %6411 = vmatpush3.bf16.msra.mxu1 %v6408_v27  ;;  %p6916_p3 = scmp.ne.s32.totalorder %s9095_s5, %s6915_s27 }
  0xaa   : > { %6139 = vmatmul.mubr.msk.f32.gmra.mrb[4].mxu0 %vm694_vm0, %v608_v24  ;;  %6413 = vmatprep.subr.bf16.mxu1 %v6412_v52 }
  0xab   : > { %6141 = vmatprep.mubr.msk.f32.mxu0 %vm694_vm0, %v609_v26  ;;  %p6917_p7 = pnand %p6916_p3, %p7225_p5 }
  0xac   : > { %6171 = vmatmul.mubr.msk.f32.gmra.mrb[4].mxu1 %vm694_vm0, %v624_v32 }
  0xad   : > { %6173 = vmatprep.mubr.msk.f32.mxu1 %vm694_vm0, %v625_v34  ;;  %6415 = vmatpush3.bf16.msra.mxu1 %v6412_v52  ;;  %p6918_p12 = pneg %p6917_p7 }
  0xae   : > { %6142 = vmatmul.mubr.msk.f32.gmra.mrb[6].mxu0 %vm694_vm0, %v610_v29  ;;  %6417 = vmatprep.subr.bf16.mxu1 %v6416_v55 }
  0xaf   : > { %6144 = vmatprep.mubr.msk.f32.mxu0 %vm694_vm0, %v611_v31 }
  0xb0   : > { %6174 = vmatmul.mubr.msk.f32.gmra.mrb[6].mxu1 %vm694_vm0, %v626_v36 }
  0xb1   : > { %6176 = vmatprep.mubr.msk.f32.mxu1 %vm694_vm0, %v627_v38  ;;  %6419 = vmatpush3.bf16.msra.mxu1 %v6416_v55 }
  0xb2   : > { %6145 = vmatmul.mubr.msk.f32.gmra.mrb[8].mxu0 %vm694_vm0, %v612_v33  ;;  %6228 = vmatprep.subr.mxu1 %v9217_v56 }
  0xb3   : > { %6147 = vmatprep.mubr.msk.f32.mxu0 %vm694_vm0, %v613_v35 }
  0xb4   : > { %6177 = vmatmul.mubr.msk.f32.gmra.mrb[8].mxu1 %vm694_vm0, %v628_v40 }
  0xb5   : > { %6179 = vmatprep.mubr.msk.f32.mxu1 %vm694_vm0, %v629_v42 }
  0xb6   : > { %6148 = vmatmul.mubr.msk.f32.gmra.mrb[10].mxu0 %vm694_vm0, %v614_v37 }
  0xb7   : > { %6150 = vmatprep.mubr.msk.f32.mxu0 %vm694_vm0, %v615_v39 }
  0xb8   : > { %6180 = vmatmul.mubr.msk.f32.gmra.mrb[10].mxu1 %vm694_vm0, %v630_v44 }
  0xb9   : > { %6182 = vmatprep.mubr.msk.f32.mxu1 %vm694_vm0, %v631_v46 }
  0xba   : > { %6151 = vmatmul.mubr.msk.f32.gmra.mrb[12].mxu0 %vm694_vm0, %v616_v41 }
  0xbb   : > { %6153 = vmatprep.mubr.msk.f32.mxu0 %vm694_vm0, %v617_v43 }
  0xbc   : > { %6183 = vmatmul.mubr.msk.f32.gmra.mrb[12].mxu1 %vm694_vm0, %v632_v47 }
  0xbd   : > { %6185 = vmatprep.mubr.msk.f32.mxu1 %vm694_vm0, %v633_v48 }
  0xbe   : > { %6154 = vmatmul.mubr.msk.f32.gmra.mrb[14].mxu0 %vm694_vm0, %v618_v45 }
  0xc0   : > { %6186 = vmatmul.mubr.msk.f32.gmra.mrb[14].mxu1 %vm694_vm0, %v634_v49 }
 0x175   : > { %v6134_v58 = vpop.f32.mrb[0].mxu0 }
 0x176   : > { %v815_v59 = vadd.f32 %v6134_v58, %v7413_v57  ;;  %v809_v60 = vpop.f32.mrb[1].mxu0 }
 0x177   : > { %v810_v61 = vadd.f32 %v7413_v57, %v809_v60  ;;  %v7429_v6 = vpop.f32.mrb[0].mxu1 }
 0x178   : > { %v906_v62 = vmul.f32 1.442695, %v815_v59  ;;  %v1093_v9 = vpop.f32.mrb[1].mxu1  ;;  %vm889_vm3 = vcmp.gt.f32.partialorder %v815_v59, 0.0 }
 0x179   : > { %v904_v63 = vmul.f32 1.442695, %v810_v61  ;;  %v6137_v0 = vpop.f32.mrb[2].mxu0  ;;  %v7436_v12 = vadd.f32 %v7426_v4, %v1093_v9  ;;  %vm888_vm2 = vcmp.gt.f32.partialorder %v810_v61, 0.0 }
 0x17a   : > { %6577 = vpow2.f32 %v906_v62  ;;  %v7418_v1 = vadd.f32 %v6137_v0, %v7413_v57  ;;  %v819_v2 = vpop.f32.mrb[3].mxu0 }
 0x17b   : > { %6579 = vpow2.f32 %v904_v63  ;;  %v7421_v3 = vadd.f32 %v7413_v57, %v819_v2  ;;  %v1188_v15 = vmul.f32 1.442695, %v7436_v12  ;;  %v7444_v18 = vpop.f32.mrb[2].mxu1  ;;  %vm1172_vm6 = vcmp.gt.f32.partialorder %v7436_v12, 0.0 }
 0x17c   : > { %v910_v5 = vmul.f32 1.442695, %v7418_v1  ;;  %v7449_v21 = vpop.f32.mrb[3].mxu1  ;;  %vm891_vm5 = vcmp.gt.f32.partialorder %v7418_v1, 0.0 }
 0x17d   : > { %v908_v7 = vmul.f32 1.442695, %v7421_v3  ;;  %v6140_v8 = vpop.f32.mrb[4].mxu0  ;;  %vm890_vm4 = vcmp.gt.f32.partialorder %v7421_v3, 0.0 }
 0x17e   : > { %6581 = vpow2.f32 %v910_v5  ;;  %v7433_v10 = vadd.f32 %v6140_v8, %v7413_v57  ;;  %v829_v11 = vpop.f32.mrb[5].mxu0 }
 0x17f   : > { %6583 = vpow2.f32 %v908_v7  ;;  %v7439_v13 = vadd.f32 %v7413_v57, %v829_v11  ;;  %v7455_v25 = vpop.f32.mrb[4].mxu1 }
 0x180   : > { %v914_v14 = vmul.f32 1.442695, %v7433_v10  ;;  %v7461_v33 = vpop.f32.mrb[5].mxu1  ;;  %vm893_vm8 = vcmp.gt.f32.partialorder %v7433_v10, 0.0 }
 0x181   : > { %v912_v16 = vmul.f32 1.442695, %v7439_v13  ;;  %v6143_v17 = vpop.f32.mrb[6].mxu0  ;;  %vm892_vm7 = vcmp.gt.f32.partialorder %v7439_v13, 0.0 }
 0x182   : > { %6585 = vpow2.f32 %v914_v14  ;;  %v7447_v19 = vadd.f32 %v6143_v17, %v7413_v57  ;;  %v839_v20 = vpop.f32.mrb[7].mxu0 }
 0x183   : > { %6587 = vpow2.f32 %v912_v16  ;;  %v7452_v22 = vadd.f32 %v7413_v57, %v839_v20  ;;  %v7469_v38 = vpop.f32.mrb[6].mxu1 }
 0x184   : > { %v6578_v23 = vpop.eup %6577  ;;  %v918_v24 = vmul.f32 1.442695, %v7447_v19  ;;  %6589 = vpow2.f32 %v1188_v15  ;;  %v7476_v44 = vpop.f32.mrb[7].mxu1  ;;  %vm895_vm10 = vcmp.gt.f32.partialorder %v7447_v19, 0.0 }
 0x185   : > { %v6580_v26 = vpop.eup %6579  ;;  %v5684_v27 = vadd.f32 -1.0, %v6578_v23  ;;  %v916_v28 = vmul.f32 1.442695, %v7452_v22  ;;  %v6146_v29 = vpop.f32.mrb[8].mxu0  ;;  %vm894_vm9 = vcmp.gt.f32.partialorder %v7452_v22, 0.0 }
 0x186   : > { %6591 = vpow2.f32 %v918_v24  ;;  %v7459_v30 = vadd.f32 %v6146_v29, %v7413_v57  ;;  %v849_v31 = vpop.f32.mrb[9].mxu0  ;;  %v5683_v32 = vadd.f32 -1.0, %v6580_v26 }
 0x187   : > { %6593 = vpow2.f32 %v916_v28  ;;  %v7464_v34 = vadd.f32 %v7413_v57, %v849_v31  ;;  %v7471_v40 = vsel %vm889_vm3, %v815_v59, %v5684_v27  ;;  %v7492_v52 = vpop.f32.mrb[8].mxu1 }
 0x188   : > { %v6582_v35 = vpop.eup %6581  ;;  %v922_v36 = vmul.f32 1.442695, %v7459_v30  ;;  %v7467_v37 = vsel %vm888_vm2, %v810_v61, %v5683_v32  ;;  %9337 = vst [vmem:[#allocation18_spill] sm:$0xff] %v7471_v40  ;;  %v1133_v0 = vpop.f32.mrb[9].mxu1  ;;  %vm897_vm11 = vcmp.gt.f32.partialorder %v7459_v30, 0.0 }
 0x189   : > { %9336 = vst [vmem:[#allocation17_spill] sm:$0xff] %v7467_v37  ;;  %v6584_v39 = vpop.eup %6583  ;;  %v920_v41 = vmul.f32 1.442695, %v7464_v34  ;;  %v6149_v42 = vpop.f32.mrb[10].mxu0  ;;  %6204 = vmatprep.mubr.msk.f32.mxu1 %vm9223_vm1, %v7467_v37  ;;  %v5686_v43 = vadd.f32 -1.0, %v6582_v35  ;;  %vm896_vm12 = vcmp.gt.f32.partialorder %v7464_v34, 0.0 }
 0x18a   : > { %6595 = vpow2.f32 %v922_v36  ;;  %v7479_v45 = vadd.f32 %v6149_v42, %v7413_v57  ;;  %v859_v46 = vpop.f32.mrb[11].mxu0  ;;  %6205 = vmatmul.mubr.msk.f32.vlgmr.msra.gmra.mrb[16].mxu1 %vm9223_vm1, %v7471_v40  ;;  %v5685_v47 = vadd.f32 -1.0, %v6584_v39 }
 0x18b   : > { %6597 = vpow2.f32 %v920_v41  ;;  %v7485_v48 = vadd.f32 %v7413_v57, %v859_v46  ;;  %v7498_v58 = vsel %vm891_vm5, %v7418_v1, %v5686_v43  ;;  %v7515_v8 = vpop.f32.mrb[10].mxu1  ;;  %v1134_v41 = vadd.f32 %v7426_v4, %v1133_v0 }
 0x18c   : > { %v6586_v49 = vpop.eup %6585  ;;  %v926_v50 = vmul.f32 1.442695, %v7479_v45  ;;  %v7490_v51 = vsel %vm890_vm4, %v7421_v3, %v5685_v47  ;;  %9339 = vst [vmem:[#allocation20_spill] sm:$0xff] %v7498_v58  ;;  %vm899_vm13 = vcmp.gt.f32.partialorder %v7479_v45, 0.0  ;;  %vm7000_vm5 = vmmov 0  }
 0x18d   : > { %9338 = vst [vmem:[#allocation19_spill] sm:$0xff] %v7490_v51  ;;  %v6588_v53 = vpop.eup %6587  ;;  %v924_v54 = vmul.f32 1.442695, %v7485_v48  ;;  %v6152_v55 = vpop.f32.mrb[12].mxu0  ;;  %6207 = vmatprep.mubr.msk.f32.mxu1 %vm9223_vm1, %v7490_v51  ;;  %v5688_v59 = vadd.f32 -1.0, %v6586_v49  ;;  %vm898_vm14 = vcmp.gt.f32.partialorder %v7485_v48, 0.0  ;;  %6270 = vmatprep.mubr.msk.f32.mxu0 %vm7000_vm5, %v9217_v56 }
 0x18e   : > { %v6590_v60 = vpop.eup %6589  ;;  %6599 = vpow2.f32 %v926_v50  ;;  %v7501_v61 = vadd.f32 %v6152_v55, %v7413_v57  ;;  %v869_v62 = vpop.f32.mrb[13].mxu0  ;;  %6208 = vmatmul.mubr.msk.f32.gmra.mrb[18].mxu1 %vm9223_vm1, %v7498_v58  ;;  %v5687_v63 = vadd.f32 -1.0, %v6588_v53  ;;  %v1204_v49 = vmul.f32 1.442695, %v1134_v41 }
 0x18f   : > { %6601 = vpow2.f32 %v924_v54  ;;  %v7508_v1 = vadd.f32 %v7413_v57, %v869_v62  ;;  %v5716_v2 = vadd.f32 -1.0, %v6590_v60  ;;  %v7521_v15 = vsel %vm893_vm8, %v7433_v10, %v5688_v59 }
 0x190   : > { %v6592_v3 = vpop.eup %6591  ;;  %v930_v5 = vmul.f32 1.442695, %v7501_v61  ;;  %v7513_v7 = vsel %vm892_vm7, %v7439_v13, %v5687_v63  ;;  %9341 = vst [vmem:[#allocation22_spill] sm:$0xff] %v7521_v15  ;;  %v7528_v13 = vpop.f32.mrb[11].mxu1  ;;  %vm901_vm15 = vcmp.gt.f32.partialorder %v7501_v61, 0.0  ;;  %vm1180_vm4 = vcmp.gt.f32.partialorder %v1134_v41, 0.0 }
 0x191   : > { %9340 = vst [vmem:[#allocation21_spill] sm:$0xff] %v7513_v7  ;;  %v6594_v9 = vpop.eup %6593  ;;  %v928_v11 = vmul.f32 1.442695, %v7508_v1  ;;  %v6155_v14 = vpop.f32.mrb[14].mxu0  ;;  %6210 = vmatprep.mubr.msk.f32.mxu1 %vm9223_vm1, %v7513_v7  ;;  %v5690_v16 = vadd.f32 -1.0, %v6592_v3  ;;  %v7526_v17 = vsel %vm1172_vm6, %v7436_v12, %v5716_v2  ;;  %vm900_vm0 = vcmp.gt.f32.partialorder %v7508_v1, 0.0 }
 0x192   : > { %6603 = vpow2.f32 %v930_v5  ;;  %v885_v20 = vadd.f32 %v6155_v14, %v7413_v57  ;;  %v879_v23 = vpop.f32.mrb[15].mxu0  ;;  %6211 = vmatmul.mubr.msk.f32.gmra.mrb[20].mxu1 %vm9223_vm1, %v7521_v15  ;;  %v5689_v24 = vadd.f32 -1.0, %v6594_v9  ;;  %v7542_v28 = vpop.f32.mrb[12].mxu1  ;;  %v1099_v9 = vadd.f32 %v7429_v6, %v7426_v4 }
 0x193   : > { %6605 = vpow2.f32 %v928_v11  ;;  %v880_v10 = vadd.f32 %v7413_v57, %v879_v23  ;;  %6229 = vmatpush3.xpose.msk.msra.mxu1 %vm9223_vm1, %v7526_v17  ;;  %v7549_v31 = vsel %vm895_vm10, %v7447_v19, %v5690_v16  ;;  %v7551_v35 = vpop.f32.mrb[13].mxu1  ;;  %v1104_v14 = vadd.f32 %v7426_v4, %v7449_v21 }
 0x194   : > { %v6596_v12 = vpop.eup %6595  ;;  %v934_v26 = vmul.f32 1.442695, %v885_v20  ;;  %v7540_v27 = vsel %vm894_vm9, %v7452_v22, %v5689_v24  ;;  %6233 = vmatprep.subr.mxu1 %v9217_v56  ;;  %9343 = vst [vmem:[#allocation24_spill] sm:$0xff] %v7549_v31  ;;  %vm903_vm2 = vcmp.gt.f32.partialorder %v885_v20, 0.0  ;;  %v7605_v3 = vpop.f32.mrb[14].mxu1  ;;  %v1109_v16 = vadd.f32 %v7444_v18, %v7426_v4 }
 0x195   : > { %9342 = vst [vmem:[#allocation23_spill] sm:$0xff] %v7540_v27  ;;  %v6598_v29 = vpop.eup %6597  ;;  %v932_v57 = vmul.f32 1.442695, %v880_v10  ;;  %6213 = vmatprep.mubr.msk.f32.mxu1 %vm9223_vm1, %v7540_v27  ;;  %v5692_v32 = vadd.f32 -1.0, %v6596_v12  ;;  %vm902_vm3 = vcmp.gt.f32.partialorder %v880_v10, 0.0  ;;  %v1163_v5 = vpop.f32.mrb[15].mxu1  ;;  %v7619_v24 = vadd.f32 %v7426_v4, %v7461_v33 }
 0x196   : > { %6607 = vpow2.f32 %v934_v26  ;;  %6214 = vmatmul.mubr.msk.f32.gmra.mrb[22].mxu1 %vm9223_vm1, %v7549_v31  ;;  %v5691_v22 = vadd.f32 -1.0, %v6598_v29  ;;  %v1190_v11 = vmul.f32 1.442695, %v1099_v9  ;;  %v1194_v23 = vmul.f32 1.442695, %v1109_v16 }
 0x197   : > { %6609 = vpow2.f32 %v932_v57  ;;  %v7558_v36 = vsel %vm897_vm11, %v7459_v30, %v5692_v32  ;;  %v1196_v6 = vmul.f32 1.442695, %v7619_v24  ;;  %v7628_v21 = vadd.f32 %v7426_v4, %v7528_v13 }
 0x198   : > { %9344 = vst [vmem:[#allocation25_spill] sm:$0xff] %v7558_v36  ;;  %v6600_v39 = vpop.eup %6599  ;;  %v7562_v19 = vsel %vm896_vm12, %v7464_v34, %v5691_v22  ;;  %6611 = vpow2.f32 %v1204_v49  ;;  %v7633_v26 = vadd.f32 %v7426_v4, %v7476_v44  ;;  %vm1173_vm6 = vcmp.gt.f32.partialorder %v1099_v9, 0.0 }
 0x199   : > { %9345 = vst [vmem:[#allocation26_spill] sm:$0xff] %v7562_v19  ;;  %v6602_v42 = vpop.eup %6601  ;;  %6216 = vmatprep.mubr.msk.f32.mxu1 %vm9223_vm1, %v7562_v19  ;;  %v5694_v43 = vadd.f32 -1.0, %v6600_v39  ;;  %6613 = vpow2.f32 %v1190_v11  ;;  %v1208_v33 = vmul.f32 1.442695, %v7628_v21  ;;  %v7642_v13 = vadd.f32 %v7469_v38, %v7426_v4 }
 0x19a   : > { %6217 = vmatmul.mubr.msk.f32.gmra.mrb[24].mxu1 %vm9223_vm1, %v7558_v36  ;;  %v5693_v30 = vadd.f32 -1.0, %v6602_v42  ;;  %v1200_v32 = vmul.f32 1.442695, %v7633_v26  ;;  %v7647_v39 = vadd.f32 %v7426_v4, %v1163_v5  ;;  %vm1174_vm7 = vcmp.gt.f32.partialorder %v1104_v14, 0.0 }
 0x19b   : > { %v7571_v46 = vsel %vm899_vm13, %v7479_v45, %v5694_v43  ;;  %v1202_v38 = vmul.f32 1.442695, %v7642_v13  ;;  %vm1175_vm8 = vcmp.gt.f32.partialorder %v1109_v16, 0.0  ;;  %vm1176_vm9 = vcmp.gt.f32.partialorder %v7619_v24, 0.0 }
 0x19c   : > { %9346 = vst [vmem:[#allocation27_spill] sm:$0xff] %v7571_v46  ;;  %v6604_v47 = vpop.eup %6603  ;;  %v7575_v34 = vsel %vm898_vm14, %v7485_v48, %v5693_v30  ;;  %v1216_v49 = vmul.f32 1.442695, %v7647_v39  ;;  %vm1182_vm11 = vcmp.gt.f32.partialorder %v7628_v21, 0.0  ;;  %vm1178_vm12 = vcmp.gt.f32.partialorder %v7633_v26, 0.0 }
 0x19d   : > { %9347 = vst [vmem:[#allocation28_spill] sm:$0xff] %v7575_v34  ;;  %v6606_v50 = vpop.eup %6605  ;;  %6219 = vmatprep.mubr.msk.f32.mxu1 %vm9223_vm1, %v7575_v34  ;;  %v5696_v53 = vadd.f32 -1.0, %v6604_v47  ;;  %v7660_v47 = vadd.f32 %v7492_v52, %v7426_v4  ;;  %vm1179_vm14 = vcmp.gt.f32.partialorder %v7642_v13, 0.0 }
 0x19e   : > { %6220 = vmatmul.mubr.msk.f32.gmra.mrb[26].mxu1 %vm9223_vm1, %v7571_v46  ;;  %v5695_v54 = vadd.f32 -1.0, %v6606_v50 }
 0x19f   : > { %v7583_v45 = vsel %vm901_vm15, %v7501_v61, %v5696_v53  ;;  %vm1186_vm15 = vcmp.gt.f32.partialorder %v7647_v39, 0.0 }
 0x1a0   : > { %9348 = vst [vmem:[#allocation29_spill] sm:$0xff] %v7583_v45  ;;  %v6608_v55 = vpop.eup %6607  ;;  %v7586_v48 = vsel %vm900_vm0, %v7508_v1, %v5695_v54  ;;  %vm1181_vm0 = vcmp.gt.f32.partialorder %v7660_v47, 0.0 }
 0x1a1   : > { %9349 = vst [vmem:[#allocation30_spill] sm:$0xff] %v7586_v48  ;;  %v6610_v59 = vpop.eup %6609  ;;  %6222 = vmatprep.mubr.msk.f32.mxu1 %vm9223_vm1, %v7586_v48  ;;  %v5698_v60 = vadd.f32 -1.0, %v6608_v55 }
 0x1a2   : > { %6223 = vmatmul.mubr.msk.f32.gmra.mrb[28].mxu1 %vm9223_vm1, %v7583_v45  ;;  %v5697_v62 = vadd.f32 -1.0, %v6610_v59  ;;  %v6612_v61 = vpop.eup %6611  ;;  %v1206_v59 = vmul.f32 1.442695, %v7660_v47 }
 0x1a3   : > { %v7592_v63 = vsel %vm903_vm2, %v885_v20, %v5698_v60  ;;  %v5724_v1 = vadd.f32 -1.0, %v6612_v61  ;;  %v1192_v20 = vmul.f32 1.442695, %v1104_v14  ;;  %v6614_v12 = vpop.eup %6613  ;;  %v7674_v60 = vadd.f32 %v7515_v8, %v7426_v4 }
 0x1a4   : > { %9350 = vst [vmem:[#allocation31_spill] sm:$0xff] %v7592_v63  ;;  %v7594_v0 = vsel %vm902_vm3, %v880_v10, %v5697_v62  ;;  %v7623_v10 = vadd.f32 %v7455_v25, %v7426_v4  ;;  %v7638_v25 = vadd.f32 %v7426_v4, %v7551_v35  ;;  %v5717_v29 = vadd.f32 -1.0, %v6614_v12 }
 0x1a5   : > { %9351 = vst [vmem:[#allocation32_spill] sm:$0xff] %v7594_v0  ;;  %6225 = vmatprep.mubr.msk.f32.mxu1 %vm9223_vm1, %v7594_v0  ;;  %v7600_v2 = vsel %vm1180_vm4, %v1134_v41, %v5724_v1  ;;  %6615 = vpow2.f32 %v1192_v20  ;;  %v1210_v8 = vmul.f32 1.442695, %v7674_v60  ;;  %vm1183_vm2 = vcmp.gt.f32.partialorder %v7674_v60, 0.0 }
 0x1a6   : > { %6226 = vmatmul.mubr.msk.f32.gmra.mrb[30].mxu1 %vm9223_vm1, %v7592_v63  ;;  %9352 = vst [vmem:[#allocation33_spill] sm:$0xff] %v7600_v2  ;;  %6269 = vmatpush3.xpose.msk.msra.mxu0 %vm9223_vm1, %v7600_v2  ;;  %6617 = vpow2.f32 %v1194_v23  ;;  %v1198_v18 = vmul.f32 1.442695, %v7623_v10  ;;  %v1212_v44 = vmul.f32 1.442695, %v7638_v25  ;;  %v7649_v35 = vsel %vm1173_vm6, %v1099_v9, %v5717_v29 }
 0x1a7   : > { %6278 = vmatprep.subr.mxu0 %v9217_v56  ;;  %6230 = vmatprep.mubr.msk.f32.mxu1 %vm7000_vm5, %v9217_v56  ;;  %6619 = vpow2.f32 %v1196_v6  ;;  %vm1177_vm10 = vcmp.gt.f32.partialorder %v7623_v10, 0.0  ;;  %vm1184_vm13 = vcmp.gt.f32.partialorder %v7638_v25, 0.0 }
 0x1a8   : > { %6621 = vpow2.f32 %v1198_v18 }
 0x1a9   : > { %6623 = vpow2.f32 %v1208_v33  ;;  %v7708_v33 = vadd.f32 %v7605_v3, %v7426_v4 }
 0x1aa   : > { %6625 = vpow2.f32 %v1200_v32 }
 0x1ab   : > { %6627 = vpow2.f32 %v1212_v44  ;;  %v1218_v3 = vmul.f32 1.442695, %v7708_v33  ;;  %vm1187_vm4 = vcmp.gt.f32.partialorder %v7708_v33, 0.0 }
 0x1ac   : > { %6629 = vpow2.f32 %v1202_v38 }
 0x1ad   : > { %6631 = vpow2.f32 %v1216_v49 }
 0x1ae   : > { %6633 = vpow2.f32 %v1206_v59 }
 0x1af   : > { %v6616_v57 = vpop.eup %6615  ;;  %6635 = vpow2.f32 %v1210_v8  ;;  %v5869_v8 = vld [vmem:[%s7821_s18] sm:$0xff]  }
 0x1b0   : > { %v5718_v42 = vadd.f32 -1.0, %v6616_v57  ;;  %v6618_v43 = vpop.eup %6617 }
 0x1b1   : > { %v5719_v53 = vadd.f32 -1.0, %v6618_v43  ;;  %v6620_v55 = vpop.eup %6619 }
 0x1b2   : > { %v7663_v54 = vsel %vm1174_vm7, %v1104_v14, %v5718_v42  ;;  %v6622_v61 = vpop.eup %6621  ;;  %v5720_v5 = vadd.f32 -1.0, %v6620_v55  ;;  %v7690_v14 = vadd.f32 %v7542_v28, %v7426_v4 }
 0x1b3   : > { %9353 = vst [vmem:[#allocation34_spill] sm:$0xff] %v7663_v54  ;;  %v7676_v1 = vsel %vm1175_vm8, %v1109_v16, %v5719_v53  ;;  %v6624_v9 = vpop.eup %6623  ;;  %v5721_v23 = vadd.f32 -1.0, %v6622_v61 }
 0x1b4   : > { %9354 = vst [vmem:[#allocation35_spill] sm:$0xff] %v7676_v1  ;;  %v6626_v20 = vpop.eup %6625  ;;  %v7693_v6 = vsel %vm1176_vm9, %v7619_v24, %v5720_v5  ;;  %v5726_v12 = vadd.f32 -1.0, %v6624_v9  ;;  %v1214_v24 = vmul.f32 1.442695, %v7690_v14  ;;  %vm1185_vm3 = vcmp.gt.f32.partialorder %v7690_v14, 0.0 }
 0x1b5   : > { %9355 = vst [vmem:[#allocation36_spill] sm:$0xff] %v7693_v6  ;;  %v6628_v18 = vpop.eup %6627  ;;  %v7711_v32 = vsel %vm1177_vm10, %v7623_v10, %v5721_v23 }
 0x1b6   : > { %v6630_v57 = vpop.eup %6629  ;;  %9356 = vst [vmem:[#allocation37_spill] sm:$0xff] %v7711_v32  ;;  %v7714_v44 = vsel %vm1182_vm11, %v7628_v21, %v5726_v12  ;;  %6637 = vpow2.f32 %v1214_v24  ;;  %v5874_v24 = vunpack.c.2.s8 %v5869_v8 }
 0x1b7   : > { %9357 = vst [vmem:[#allocation38_spill] sm:$0xff] %v7714_v44  ;;  %v6632_v42 = vpop.eup %6631  ;;  %v5723_v21 = vadd.f32 -1.0, %v6630_v57  ;;  %6639 = vpow2.f32 %v1218_v3 }
 0x1b8   : > { %v6634_v49 = vpop.eup %6633  ;;  %vm7844_vm8 = vcmp.gt.s32.totalorder %v5874_v24, 0 }
 0x1b9   : > { %v5725_v53 = vadd.f32 -1.0, %v6634_v49  ;;  %v9379_v49 = vmov 0 }
 0x1bb   : > { %v7771_v59 = vsel %vm1181_vm0, %v7660_v47, %v5725_v53 }
 0x1bc   : > { %9362 = vst [vmem:[#allocation43_spill] sm:$0xff] %v7771_v59 }
 0x25d   : > { %v6206_v22 = vpop.f32.mrb[16].mxu1 }
 0x25e   : > { %v1375_v41 = vpop.f32.mrb[17].mxu1 }
 0x25f   : > { %6231 = vmatmul.mubr.msk.f32.vlgmr.msra.gmra.mrb[32].mxu1 %vm9223_vm1, %v1375_v41  ;;  %v5728_v41 = vadd.f32 -1.0, %v6628_v18 }
 0x260   : > { %6234 = vmatpush3.xpose.msk.msra.mxu1 %vm9223_vm1, %v7649_v35  ;;  %6235 = vmatprep.mubr.msk.f32.mxu1 %vm7000_vm5, %v9217_v56 }
 0x261   : > { %v6209_v30 = vpop.f32.mrb[18].mxu1  ;;  %6238 = vmatprep.subr.mxu1 %v9217_v56  ;;  %v7735_v38 = vsel %vm1184_vm13, %v7638_v25, %v5728_v41  ;;  %v9375_v41 = vmov 0 }
 0x262   : > { %v1385_v50 = vpop.f32.mrb[19].mxu1  ;;  %9359 = vst [vmem:[#allocation40_spill] sm:$0xff] %v7735_v38  ;;  %v9376_v41 = vsel %vm7844_vm8, 4294967295, %v9375_v41 }
 0x263   : > { %6236 = vmatmul.mubr.msk.f32.vlgmr.msra.gmra.mrb[34].mxu1 %vm9223_vm1, %v6206_v22  ;;  %v5722_v22 = vadd.f32 -1.0, %v6626_v20  ;;  %v5871_v20 = vunpack.c.1.s8 %v5869_v8  ;;  %9377 = vst [vmem:[#allocation51_spill] sm:$0xff] %v9376_v41 }
 0x264   : > { %6239 = vmatpush3.xpose.msk.msra.mxu1 %vm9223_vm1, %v7663_v54  ;;  %6240 = vmatprep.mubr.msk.f32.mxu1 %vm7000_vm5, %v9217_v56 }
 0x265   : > { %v6212_v52 = vpop.f32.mrb[20].mxu1  ;;  %6243 = vmatprep.subr.mxu1 %v9217_v56  ;;  %v7732_v43 = vsel %vm1178_vm12, %v7633_v26, %v5722_v22  ;;  %vm7834_vm7 = vcmp.gt.s32.totalorder %v5871_v20, 0 }
 0x266   : > { %v1395_v62 = vpop.f32.mrb[21].mxu1  ;;  %9358 = vst [vmem:[#allocation39_spill] sm:$0xff] %v7732_v43 }
 0x267   : > { %6241 = vmatmul.mubr.msk.f32.vlgmr.msra.gmra.mrb[36].mxu1 %vm9223_vm1, %v1385_v50  ;;  %v7752_v50 = vsel %vm1179_vm14, %v7642_v13, %v5723_v21 }
 0x268   : > { %6244 = vmatpush3.xpose.msk.msra.mxu1 %vm9223_vm1, %v7676_v1  ;;  %6245 = vmatprep.mubr.msk.f32.mxu1 %vm7000_vm5, %v9217_v56  ;;  %9360 = vst [vmem:[#allocation41_spill] sm:$0xff] %v7752_v50 }
 0x269   : > { %v7684_v11 = vpop.f32.mrb[22].mxu1  ;;  %6248 = vmatprep.subr.mxu1 %v9217_v56 }
 0x26a   : > { %v1405_v16 = vpop.f32.mrb[23].mxu1 }
 0x26b   : > { %6246 = vmatmul.mubr.msk.f32.vlgmr.msra.gmra.mrb[38].mxu1 %vm9223_vm1, %v6209_v30  ;;  %v5730_v30 = vadd.f32 -1.0, %v6632_v42  ;;  %v5875_v42 = vunpack.c.3.s8 %v5869_v8 }
 0x26c   : > { %6249 = vmatpush3.xpose.msk.msra.mxu1 %vm9223_vm1, %v7693_v6  ;;  %6250 = vmatprep.mubr.msk.f32.mxu1 %vm7000_vm5, %v9217_v56 }
 0x26d   : > { %v7702_v28 = vpop.f32.mrb[24].mxu1  ;;  %6253 = vmatprep.subr.mxu1 %v9217_v56  ;;  %v7755_v55 = vsel %vm1186_vm15, %v7647_v39, %v5730_v30  ;;  %vm7855_vm9 = vcmp.gt.s32.totalorder %v5875_v42, 0 }
 0x26e   : > { %v1415_v29 = vpop.f32.mrb[25].mxu1  ;;  %9361 = vst [vmem:[#allocation42_spill] sm:$0xff] %v7755_v55  ;;  %v9380_v49 = vsel %vm7855_vm9, 4294967295, %v9379_v49 }
 0x26f   : > { %6251 = vmatmul.mubr.msk.f32.vlgmr.msra.gmra.mrb[40].mxu1 %vm9223_vm1, %v1395_v62  ;;  %6271 = vmatmul.mubr.msk.f32.vlgmr.msra.gmra.mrb[16].mxu0 %vm9223_vm1, %v1415_v29  ;;  %9381 = vst [vmem:[#allocation53_spill] sm:$0xff] %v9380_v49 }
 0x270   : > { %6254 = vmatpush3.xpose.msk.msra.mxu1 %vm9223_vm1, %v7711_v32  ;;  %6279 = vmatpush3.xpose.msk.msra.mxu0 %vm9223_vm1, %v7714_v44 }
 0x271   : > { %v6221_v4 = vpop.f32.mrb[26].mxu1  ;;  %6255 = vmatprep.mubr.msk.f32.mxu1 %vm7000_vm5, %v9217_v56  ;;  %6258 = vmatprep.subr.mxu1 %v9217_v56 }
 0x272   : > { %v1425_v10 = vpop.f32.mrb[27].mxu1  ;;  %6280 = vmatprep.mubr.msk.f32.mxu0 %vm7000_vm5, %v9217_v56  ;;  %6288 = vmatprep.subr.mxu0 %v9217_v56 }
 0x273   : > { %6256 = vmatmul.mubr.msk.f32.vlgmr.msra.gmra.mrb[42].mxu1 %vm9223_vm1, %v6212_v52  ;;  %6281 = vmatmul.mubr.msk.f32.vlgmr.msra.gmra.mrb[18].mxu0 %vm9223_vm1, %v1425_v10  ;;  %v6636_v52 = vpop.eup %6635 }
 0x274   : > { %6259 = vmatpush3.xpose.msk.msra.mxu1 %vm9223_vm1, %v7732_v43  ;;  %6289 = vmatpush3.xpose.msk.msra.mxu0 %vm9223_vm1, %v7735_v38  ;;  %v5727_v62 = vadd.f32 -1.0, %v6636_v52  ;;  %v6638_v61 = vpop.eup %6637 }
 0x275   : > { %v6224_v26 = vpop.f32.mrb[28].mxu1  ;;  %6260 = vmatprep.mubr.msk.f32.mxu1 %vm7000_vm5, %v9217_v56  ;;  %6263 = vmatprep.subr.mxu1 %v9217_v56  ;;  %v5729_v5 = vadd.f32 -1.0, %v6638_v61  ;;  %v6640_v9 = vpop.eup %6639 }
 0x276   : > { %v1435_v25 = vpop.f32.mrb[29].mxu1  ;;  %6290 = vmatprep.mubr.msk.f32.mxu0 %vm7000_vm5, %v9217_v56  ;;  %6298 = vmatprep.subr.mxu0 %v9217_v56  ;;  %v7785_v47 = vsel %vm1183_vm2, %v7674_v60, %v5727_v62  ;;  %v5731_v60 = vadd.f32 -1.0, %v6640_v9 }
 0x277   : > { %6261 = vmatmul.mubr.msk.f32.vlgmr.msra.gmra.mrb[44].mxu1 %vm9223_vm1, %v1405_v16  ;;  %6291 = vmatmul.mubr.msk.f32.vlgmr.msra.gmra.mrb[20].mxu0 %vm9223_vm1, %v1435_v25  ;;  %9363 = vst [vmem:[#allocation44_spill] sm:$0xff] %v7785_v47  ;;  %v9367_v16 = vmov 0 }
 0x278   : > { %6264 = vmatpush3.xpose.msk.msra.mxu1 %vm9223_vm1, %v7752_v50  ;;  %6299 = vmatpush3.xpose.msk.msra.mxu0 %vm9223_vm1, %v7755_v55 }
 0x279   : > { %6308 = vmatprep.subr.mxu0 %v7526_v17  ;;  %v6227_v13 = vpop.f32.mrb[30].mxu1  ;;  %6265 = vmatprep.mubr.msk.f32.mxu1 %vm7000_vm5, %v9217_v56 }
 0x27a   : > { %v1445_v39 = vpop.f32.mrb[31].mxu1  ;;  %6273 = vmatprep.subr.mxu1 %v9217_v56  ;;  %6300 = vmatprep.mubr.msk.f32.mxu0 %vm7000_vm5, %v9217_v56 }
 0x27b   : > { %6266 = vmatmul.mubr.msk.f32.vlgmr.msra.gmra.mrb[46].mxu1 %vm9223_vm1, %v7684_v11  ;;  %6301 = vmatmul.mubr.msk.f32.vlgmr.msra.gmra.mrb[22].mxu0 %vm9223_vm1, %v1445_v39  ;;  %v7806_v11 = vsel %vm1187_vm4, %v7708_v33, %v5731_v60  ;;  %v9383_v39 = vmov 0  ;;  %v6487_v60 = vld [vmem:[%s7821_s18 + $0x10] sm:$0xff]  }
 0x27c   : > { %6274 = vmatpush3.xpose.msk.msra.mxu1 %vm9223_vm1, %v7771_v59  ;;  %6309 = vmatpush3.msra.mxu0 %v7526_v17  ;;  %v7796_v17 = vsel %vm1185_vm3, %v7690_v14, %v5729_v5  ;;  %9365 = vst [vmem:[#allocation46_spill] sm:$0xff] %v7806_v11  ;;  %v5870_v14 = vunpack.c.0.s8 %v5869_v8 }
 0x27d   : > { %6318 = vmatprep.subr.mxu0 %v7663_v54  ;;  %6275 = vmatprep.mubr.msk.f32.mxu1 %vm7000_vm5, %v9217_v56  ;;  %9364 = vst [vmem:[#allocation45_spill] sm:$0xff] %v7796_v17 }
 0x27e   : > { %6283 = vmatprep.subr.mxu1 %v9217_v56  ;;  %vm7824_vm6 = vcmp.gt.s32.totalorder %v5870_v14, 0 }
 0x27f   : > { %6276 = vmatmul.mubr.msk.f32.vlgmr.msra.gmra.mrb[48].mxu1 %vm9223_vm1, %v7702_v28  ;;  %v9368_v16 = vsel %vm7824_vm6, 4294967295, %v9367_v16  ;;  %v9371_v28 = vmov 0 }
 0x280   : > { %6284 = vmatpush3.xpose.msk.msra.mxu1 %vm9223_vm1, %v7785_v47  ;;  %6285 = vmatprep.mubr.msk.f32.mxu1 %vm7000_vm5, %v9217_v56  ;;  %9369 = vst [vmem:[#allocation47_spill] sm:$0xff] %v9368_v16  ;;  %v9372_v28 = vsel %vm7834_vm7, 4294967295, %v9371_v28 }
 0x281   : > { %6293 = vmatprep.subr.mxu1 %v9217_v56  ;;  %9373 = vst [vmem:[#allocation49_spill] sm:$0xff] %v9372_v28 }
 0x283   : > { %6286 = vmatmul.mubr.msk.f32.vlgmr.msra.gmra.mrb[50].mxu1 %vm9223_vm1, %v6221_v4  ;;  %v6485_v4 = vld [vmem:[%s7821_s18 + $0x8] sm:$0xff]  }
 0x284   : > { %6294 = vmatpush3.xpose.msk.msra.mxu1 %vm9223_vm1, %v7796_v17  ;;  %6295 = vmatprep.mubr.msk.f32.mxu1 %vm7000_vm5, %v9217_v56  ;;  %v5879_v62 = vunpack.c.1.s8 %v6485_v4 }
 0x285   : > { %6303 = vmatprep.subr.mxu1 %v9217_v56 }
 0x286   : > { %vm7876_vm11 = vcmp.gt.s32.totalorder %v5879_v62, 0 }
 0x287   : > { %6296 = vmatmul.mubr.msk.f32.vlgmr.msra.gmra.mrb[52].mxu1 %vm9223_vm1, %v6224_v26  ;;  %v5878_v26 = vunpack.c.0.s8 %v6485_v4 }
 0x288   : > { %6304 = vmatpush3.xpose.msk.msra.mxu1 %vm9223_vm1, %v7806_v11  ;;  %6305 = vmatprep.mubr.msk.f32.mxu1 %vm7000_vm5, %v9217_v56  ;;  %vm2688_vm5 = vcmask 64512  }
 0x289   : > { %6313 = vmatprep.subr.mxu1 %v7649_v35  ;;  %vm7865_vm10 = vcmp.gt.s32.totalorder %v5878_v26, 0  ;;  %v9392_v26 = vmov 0 }
 0x28a   : > { %v9384_v39 = vsel %vm7865_vm10, 4294967295, %v9383_v39 }
 0x28b   : > { %6306 = vmatmul.mubr.msk.f32.vlgmr.msra.gmra.mrb[54].mxu1 %vm9223_vm1, %v6227_v13  ;;  %9385 = vst [vmem:[#allocation55_spill] sm:$0xff] %v9384_v39 }
 0x28c   : > { %6314 = vmatpush3.msra.mxu1 %v7649_v35 }
 0x28d   : > { %6323 = vmatprep.subr.mxu1 %v7676_v1 }
 0x332   : > { %v1526_v23 = vpop.f32.mrb[32].mxu1 }
 0x333   : > { %v7830_v35 = vsel %vm7824_vm6, %v1526_v23, -1e+08  ;;  %v6232_v12 = vpop.f32.mrb[33].mxu1  ;;  %v9386_v23 = vmov 0 }
 0x334   : > { %9370 = vst [vmem:[#allocation48_spill] sm:$0xff] %v7830_v35  ;;  %v2689_v18 = vsel %vm2688_vm5, %v7830_v35, -inf  ;;  %v9387_v23 = vsel %vm7876_vm11, 4294967295, %v9386_v23  ;;  %v5882_v12 = vunpack.c.2.s8 %v6485_v4 }
 0x335   : > { %2690 = vmax.xlane.f32.xlu0 %v2689_v18  ;;  %9388 = vst [vmem:[#allocation56_spill] sm:$0xff] %v9387_v23  ;;  %v5886_v18 = vunpack.c.0.s8 %v6487_v60 }
 0x336   : > { %v1602_v33 = vpop.f32.mrb[34].mxu1  ;;  %vm7886_vm12 = vcmp.gt.s32.totalorder %v5882_v12, 0  ;;  %v5887_v12 = vunpack.c.1.s8 %v6487_v60 }
 0x337   : > { %v7840_v29 = vsel %vm7834_vm7, %v1602_v33, -1e+08  ;;  %v6237_v57 = vpop.f32.mrb[35].mxu1  ;;  %vm7890_vm13 = vcmp.gt.s32.totalorder %v5886_v18, 0 }
 0x338   : > { %9374 = vst [vmem:[#allocation50_spill] sm:$0xff] %v7840_v29  ;;  %v2692_v22 = vsel %vm2688_vm5, %v7840_v29, -inf  ;;  %v9393_v26 = vsel %vm7890_vm13, 4294967295, %v9392_v26  ;;  %vm7921_vm0 = vcmp.gt.s32.totalorder %v5887_v12, 0 }
 0x339   : > { %2693 = vmax.xlane.f32.xlu0 %v2692_v22  ;;  %9394 = vst [vmem:[#allocation58_spill] sm:$0xff] %v9393_v26 }
 0x33a   : > { %v1678_v3 = vpop.f32.mrb[36].mxu1 }
 0x33b   : > { %v7851_v10 = vsel %vm7844_vm8, %v1678_v3, -1e+08  ;;  %v6242_v21 = vpop.f32.mrb[37].mxu1 }
 0x33c   : > { %9378 = vst [vmem:[#allocation52_spill] sm:$0xff] %v7851_v10  ;;  %v2695_v30 = vsel %vm2688_vm5, %v7851_v10, -inf  ;;  %v9389_v21 = vmov 0 }
 0x33d   : > { %2696 = vmax.xlane.f32.xlu1 %v2695_v30  ;;  %v9390_v21 = vsel %vm7886_vm12, 4294967295, %v9389_v21  ;;  %v5883_v30 = vunpack.c.3.s8 %v6485_v4  ;;  %v9395_v4 = vmov 0 }
 0x33e   : > { %v1754_v25 = vpop.f32.mrb[38].mxu1  ;;  %9391 = vst [vmem:[#allocation57_spill] sm:$0xff] %v9390_v21 }
 0x33f   : > { %v7861_v53 = vsel %vm7855_vm9, %v1754_v25, -1e+08  ;;  %v6247_v52 = vpop.f32.mrb[39].mxu1  ;;  %v5890_v25 = vunpack.c.2.s8 %v6487_v60  ;;  %vm7901_vm14 = vcmp.gt.s32.totalorder %v5883_v30, 0 }
 0x340   : > { %9382 = vst [vmem:[#allocation54_spill] sm:$0xff] %v7861_v53  ;;  %v2698_v13 = vsel %vm2688_vm5, %v7861_v53, -inf  ;;  %v9396_v4 = vsel %vm7901_vm14, 4294967295, %v9395_v4 }
 0x341   : > { %2699 = vmax.xlane.f32.xlu1 %v2698_v13  ;;  %9397 = vst [vmem:[#allocation59_spill] sm:$0xff] %v9396_v4  ;;  %vm7909_vm15 = vcmp.gt.s32.totalorder %v5890_v25, 0  ;;  %v9401_v25 = vmov 0 }
 0x342   : > { %v1830_v61 = vpop.f32.mrb[40].mxu1  ;;  %v2134_v5 = vpop.f32.mrb[16].mxu0  ;;  %v9402_v25 = vsel %vm7921_vm0, 4294967295, %v9401_v25 }
 0x343   : > { %v7871_v9 = vsel %vm7865_vm10, %v1830_v61, -1e+08  ;;  %v6252_v8 = vpop.f32.mrb[41].mxu1  ;;  %v6272_v14 = vpop.f32.mrb[17].mxu0  ;;  %v7907_v18 = vsel %vm7890_vm13, %v2134_v5, -1e+08 }
 0x344   : > { %v2701_v20 = vsel %vm2688_vm5, %v7871_v9, -inf  ;;  %v6489_v8 = vld [vmem:[%s7821_s18 + $0x18] sm:$0xff]   ;;  %9403 = vst [vmem:[#allocation61_spill] sm:$0xff] %v9402_v25  ;;  %s5867_s18 = sshll.u32 %s7101_s17, 11  ;;  %s6921_s17 = scalar_lea.vmem %s6920_s13, 4096 }
 0x345   : > { %2702 = vmax.xlane.f32.xlu0 %v2701_v20  ;;  %p6923_p2 = scmp.lt.s32.totalorder %s6921_s17, %s6915_s27 }
 0x346   : > { %v1906_v24 = vpop.f32.mrb[42].mxu1  ;;  %v2286_v33 = vpop.f32.mrb[18].mxu0 }
 0x347   : > { %v7882_v57 = vsel %vm7876_vm11, %v1906_v24, -1e+08  ;;  %v6257_v22 = vpop.f32.mrb[43].mxu1  ;;  %v6282_v42 = vpop.f32.mrb[19].mxu0  ;;  %v9398_v24 = vmov 0  ;;  %p6924_p4 = por %p6923_p2, %p6922_p1 }
 0x348   : > { %v2704_v3 = vsel %vm2688_vm5, %v7882_v57, -inf  ;;  %v9399_v24 = vsel %vm7909_vm15, 4294967295, %v9398_v24  ;;  %v5894_v42 = vunpack.c.0.s8 %v6489_v8  ;;  %v7927_v56 = vsel %vm7909_vm15, %v2286_v33, -1e+08 }
 0x349   : > { %2705 = vmax.xlane.f32.xlu1 %v2704_v3  ;;  %9400 = vst [vmem:[#allocation60_spill] sm:$0xff] %v9399_v24  ;;  %p6925_p9 = pnand %p6924_p4, %p6918_p12 }
 0x34a   : > { %v1982_v52 = vpop.f32.mrb[44].mxu1  ;;  %v2438_v13 = vpop.f32.mrb[20].mxu0  ;;  %vm7929_vm2 = vcmp.gt.s32.totalorder %v5894_v42, 0  ;;  %v5895_v42 = vunpack.c.1.s8 %v6489_v8 }
 0x34b   : > { %v7896_v62 = vsel %vm7886_vm12, %v1982_v52, -1e+08  ;;  %v6262_v61 = vpop.f32.mrb[45].mxu1  ;;  %v6292_v14 = vpop.f32.mrb[21].mxu0 }
 0x34c   : > { %v2707_v20 = vsel %vm2688_vm5, %v7896_v62, -inf  ;;  %v2713_v14 = vsel %vm2688_vm5, %v7907_v18, -inf  ;;  %vm7961_vm1 = vcmp.gt.s32.totalorder %v5895_v42, 0 }
 0x34d   : > { %2708 = vmax.xlane.f32.xlu0 %v2707_v20  ;;  %v5891_v20 = vunpack.c.3.s8 %v6487_v60  ;;  %v2719_v60 = vsel %vm2688_vm5, %v7927_v56, -inf }
 0x34e   : > { %v2058_v22 = vpop.f32.mrb[46].mxu1  ;;  %v2590_v3 = vpop.f32.mrb[22].mxu0 }
 0x34f   : > { %v7915_v52 = vsel %vm7901_vm14, %v2058_v22, -1e+08  ;;  %v6267_v30 = vpop.f32.mrb[47].mxu1  ;;  %v6302_v61 = vpop.f32.mrb[23].mxu0  ;;  %v9404_v22 = vmov 0  ;;  %vm7941_vm3 = vcmp.gt.s32.totalorder %v5891_v20, 0 }
 0x350   : > { %v2710_v5 = vsel %vm2688_vm5, %v7915_v52, -inf  ;;  %v9405_v22 = vsel %vm7929_vm2, 4294967295, %v9404_v22  ;;  %v5898_v61 = vunpack.c.2.s8 %v6489_v8 }
 0x351   : > { %2714 = vmax.xlane.f32.xlu0 %v2713_v14  ;;  %2711 = vmax.xlane.f32.xlu1 %v2710_v5  ;;  %9406 = vst [vmem:[#allocation62_spill] sm:$0xff] %v9405_v22  ;;  %v9407_v14 = vmov 0  ;;  %v7947_v5 = vsel %vm7929_vm2, %v2438_v13, -1e+08  ;;  %v9413_v13 = vmov 0 }
 0x352   : > { %v2210_v30 = vpop.f32.mrb[48].mxu1  ;;  %v9408_v14 = vsel %vm7941_vm3, 4294967295, %v9407_v14  ;;  %vm7949_vm4 = vcmp.gt.s32.totalorder %v5898_v61, 0  ;;  %v2725_v45 = vsel %vm2688_vm5, %v7947_v5, -inf  ;;  %v9414_v13 = vsel %vm7961_vm1, 4294967295, %v9413_v13 }
 0x353   : > { %v7935_v63 = vsel %vm7921_vm0, %v2210_v30, -1e+08  ;;  %v6277_v12 = vpop.f32.mrb[49].mxu1  ;;  %9409 = vst [vmem:[#allocation63_spill] sm:$0xff] %v9408_v14  ;;  %9415 = vst [vmem:[#allocation65_spill] sm:$0xff] %v9414_v13 }
 0x354   : > { %v2716_v33 = vsel %vm2688_vm5, %v7935_v63, -inf  ;;  %v9410_v12 = vmov 0  ;;  %v7967_v61 = vsel %vm7949_vm4, %v2590_v3, -1e+08 }
 0x355   : > { %2720 = vmax.xlane.f32.xlu0 %v2719_v60  ;;  %2717 = vmax.xlane.f32.xlu1 %v2716_v33  ;;  %v9411_v12 = vsel %vm7949_vm4, 4294967295, %v9410_v12  ;;  %v5899_v60 = vunpack.c.3.s8 %v6489_v8  ;;  %v2731_v46 = vsel %vm2688_vm5, %v7967_v61, -inf  ;;  %v9416_v8 = vmov 0 }
 0x356   : > { %v2362_v30 = vpop.f32.mrb[50].mxu1  ;;  %9412 = vst [vmem:[#allocation64_spill] sm:$0xff] %v9411_v12 }
 0x357   : > { %v7955_v0 = vsel %vm7941_vm3, %v2362_v30, -1e+08  ;;  %v6287_v20 = vpop.f32.mrb[51].mxu1  ;;  %vm7977_vm2 = vcmp.gt.s32.totalorder %v5899_v60, 0 }
 0x358   : > { %v2722_v48 = vsel %vm2688_vm5, %v7955_v0, -inf  ;;  %v9417_v8 = vsel %vm7977_vm2, 4294967295, %v9416_v8 }
 0x359   : > { %2726 = vmax.xlane.f32.xlu0 %v2725_v45  ;;  %2723 = vmax.xlane.f32.xlu1 %v2722_v48  ;;  %9418 = vst [vmem:[#allocation66_spill] sm:$0xff] %v9417_v8 }
 0x35a   : > { %v2514_v33 = vpop.f32.mrb[52].mxu1 }
 0x35b   : > { %v7971_v30 = vsel %vm7961_vm1, %v2514_v33, -1e+08  ;;  %v6297_v20 = vpop.f32.mrb[53].mxu1 }
 0x35c   : > { %v2728_v42 = vsel %vm2688_vm5, %v7971_v30, -inf  ;;  %v2686_v20 = vlaneseq }
 0x35d   : > { %2732 = vmax.xlane.f32.xlu0 %v2731_v46  ;;  %2729 = vmax.xlane.f32.xlu1 %v2728_v42 }
 0x35e   : > { %v2666_v45 = vpop.f32.mrb[54].mxu1  ;;  %v7987_v34 = vand.u32 127, %v2686_v20 }
 0x35f   : > { %v7983_v48 = vsel %vm7977_vm2, %v2666_v45, -1e+08  ;;  %v6307_v3 = vpop.f32.mrb[55].mxu1 }
 0x360   : > { %v2734_v33 = vsel %vm2688_vm5, %v7983_v48, -inf  ;;  %9419 = vst [vmem:[#allocation67_spill] sm:$0xff] %v7987_v34 }
 0x361   : > { %2735 = vmax.xlane.f32.xlu1 %v2734_v33 }
 0x3c2   : > { %v7989_v36 = vpop.xlane.xlu0 %2690 }
 0x3c3   : > { %9420 = vst [vmem:[#allocation68_spill] sm:$0xff] %v7989_v36  ;;  %vm2737_vm4 = vcmp.eq.f32.partialorder %v7830_v35, %v7989_v36 }
 0x3c4   : > { %v2753_v46 = vsel %vm2737_vm4, %v7987_v34, 8 }
 0x3c5   : > { %v7995_v60 = vsel %vm2688_vm5, %v2753_v46, 2147483647 }
 0x3c6   : > { %v7997_v42 = vpop.xlane.xlu0 %2693  ;;  %v2771_v45 = vshra.s32 %v7995_v60, 16 }
 0x3c7   : > { %9421 = vst [vmem:[#allocation69_spill] sm:$0xff] %v7997_v42  ;;  %vm2738_vm2 = vcmp.eq.f32.partialorder %v7840_v29, %v7997_v42  ;;  %v3058_v25 = vsub.f32 %v7840_v29, %v7997_v42 }
 0x3c8   : > { %v8002_v3 = vcvt.s32.f32 %v2771_v45  ;;  %v2754_v33 = vsel %vm2738_vm2, %v7987_v34, 8 }
 0x3c9   : > { %v8006_v20 = vsel %vm2688_vm5, %v2754_v33, 2147483647  ;;  %v3075_v39 = vmul.f32 1.442695, %v3058_v25 }
 0x3ca   : > { %v8008_v19 = vpop.xlane.xlu1 %2696  ;;  %2774 = vmin.xlane.f32.xlu0 %v8002_v3  ;;  %v2786_v46 = vshra.s32 %v8006_v20, 16 }
 0x3cb   : > { %9422 = vst [vmem:[#allocation70_spill] sm:$0xff] %v8008_v19  ;;  %vm2739_vm4 = vcmp.eq.f32.partialorder %v7851_v10, %v8008_v19  ;;  %v3059_v25 = vsub.f32 %v7851_v10, %v8008_v19 }
 0x3cc   : > { %v8014_v31 = vcvt.s32.f32 %v2786_v46  ;;  %v2755_v27 = vsel %vm2739_vm4, %v7987_v34, 8 }
 0x3cd   : > { %v8018_v45 = vsel %vm2688_vm5, %v2755_v27, 2147483647 }
 0x3ce   : > { %v8020_v15 = vpop.xlane.xlu1 %2699  ;;  %2789 = vmin.xlane.f32.xlu1 %v8014_v31  ;;  %v2801_v33 = vshra.s32 %v8018_v45, 16 }
 0x3cf   : > { %9423 = vst [vmem:[#allocation71_spill] sm:$0xff] %v8020_v15  ;;  %vm2740_vm2 = vcmp.eq.f32.partialorder %v7861_v53, %v8020_v15 }
 0x3d0   : > { %v8026_v7 = vcvt.s32.f32 %v2801_v33  ;;  %v2756_v58 = vsel %vm2740_vm2, %v7987_v34, 8 }
 0x3d1   : > { %v8030_v46 = vsel %vm2688_vm5, %v2756_v58, 2147483647 }
 0x3d2   : > { %v8032_v51 = vpop.xlane.xlu0 %2702  ;;  %2804 = vmin.xlane.f32.xlu0 %v8026_v7  ;;  %v2816_v27 = vshra.s32 %v8030_v46, 16 }
 0x3d3   : > { %vm2741_vm4 = vcmp.eq.f32.partialorder %v7871_v9, %v8032_v51 }
 0x3d4   : > { %v8038_v40 = vcvt.s32.f32 %v2816_v27  ;;  %v2757_v37 = vsel %vm2741_vm4, %v7987_v34, 8 }
 0x3d5   : > { %v8042_v33 = vsel %vm2688_vm5, %v2757_v37, 2147483647 }
 0x3d6   : > { %v8044_v11 = vpop.xlane.xlu1 %2705  ;;  %2819 = vmin.xlane.f32.xlu1 %v8038_v40  ;;  %v2831_v58 = vshra.s32 %v8042_v33, 16 }
 0x3d7   : > { %9424 = vst [vmem:[#allocation72_spill] sm:$0xff] %v8044_v11  ;;  %vm2742_vm2 = vcmp.eq.f32.partialorder %v7882_v57, %v8044_v11 }
 0x3d8   : > { %v8050_v55 = vcvt.s32.f32 %v2831_v58  ;;  %v2758_v17 = vsel %vm2742_vm2, %v7987_v34, 8 }
 0x3d9   : > { %v8054_v27 = vsel %vm2688_vm5, %v2758_v17, 2147483647 }
 0x3da   : > { %2834 = vmin.xlane.f32.xlu0 %v8050_v55  ;;  %v8057_v37 = vpop.xlane.xlu0 %2708  ;;  %v2846_v38 = vshra.s32 %v8054_v27, 16 }
 0x3db   : > { %vm2743_vm4 = vcmp.eq.f32.partialorder %v7896_v62, %v8057_v37 }
 0x3dc   : > { %v8062_v47 = vcvt.s32.f32 %v2846_v38  ;;  %v2759_v44 = vsel %vm2743_vm4, %v7987_v34, 8 }
 0x3dd   : > { %v8066_v58 = vsel %vm2688_vm5, %v2759_v44, 2147483647 }
 0x3de   : > { %v8068_v59 = vpop.xlane.xlu0 %2714  ;;  %v8070_v17 = vpop.xlane.xlu1 %2711  ;;  %2849 = vmin.xlane.f32.xlu1 %v8062_v47  ;;  %v2861_v2 = vshra.s32 %v8066_v58, 16 }
 0x3df   : > { %vm2745_vm2 = vcmp.eq.f32.partialorder %v7907_v18, %v8068_v59  ;;  %vm2744_vm1 = vcmp.eq.f32.partialorder %v7915_v52, %v8070_v17 }
 0x3e0   : > { %v8078_v38 = vcvt.s32.f32 %v2861_v2  ;;  %v2761_v50 = vsel %vm2745_vm2, %v7987_v34, 8  ;;  %v2760_v44 = vsel %vm2744_vm1, %v7987_v34, 8  ;;  %v3057_v2 = vsub.f32 %v7830_v35, %v7989_v36 }
 0x3e1   : > { %v8088_v1 = vsel %vm2688_vm5, %v2761_v50, 2147483647  ;;  %v8091_v6 = vsel %vm2688_vm5, %v2760_v44, 2147483647 }
 0x3e2   : > { %2864 = vmin.xlane.f32.xlu0 %v8078_v38  ;;  %v8083_v43 = vpop.xlane.xlu0 %2720  ;;  %v8085_v32 = vpop.xlane.xlu1 %2717  ;;  %v2891_v54 = vshra.s32 %v8088_v1, 16  ;;  %v2876_v8 = vshra.s32 %v8091_v6, 16  ;;  %v3073_v24 = vmul.f32 1.442695, %v3057_v2 }
 0x3e3   : > { %vm2747_vm4 = vcmp.eq.f32.partialorder %v7927_v56, %v8083_v43  ;;  %vm2746_vm1 = vcmp.eq.f32.partialorder %v7935_v63, %v8085_v32 }
 0x3e4   : > { %v2763_v12 = vsel %vm2747_vm4, %v7987_v34, 8  ;;  %v8109_v22 = vcvt.s32.f32 %v2891_v54  ;;  %v2762_v14 = vsel %vm2746_vm1, %v7987_v34, 8  ;;  %v8119_v26 = vcvt.s32.f32 %v2876_v8 }
 0x3e5   : > { %v8107_v44 = vsel %vm2688_vm5, %v2763_v12, 2147483647  ;;  %v8127_v21 = vsel %vm2688_vm5, %v2762_v14, 2147483647  ;;  %6641 = vpow2.f32 %v3073_v24 }
 0x3e6   : > { %v8102_v50 = vpop.xlane.xlu0 %2726  ;;  %v8104_v13 = vpop.xlane.xlu1 %2723  ;;  %2894 = vmin.xlane.f32.xlu0 %v8109_v22  ;;  %v2921_v12 = vshra.s32 %v8107_v44, 16  ;;  %2879 = vmin.xlane.f32.xlu1 %v8119_v26  ;;  %v2906_v49 = vshra.s32 %v8127_v21, 16  ;;  %6643 = vpow2.f32 %v3075_v39 }
 0x3e7   : > { %vm2749_vm2 = vcmp.eq.f32.partialorder %v7947_v5, %v8102_v50  ;;  %vm2748_vm3 = vcmp.eq.f32.partialorder %v7955_v0, %v8104_v13 }
 0x3e8   : > { %v2765_v2 = vsel %vm2749_vm2, %v7987_v34, 8  ;;  %v8131_v23 = vcvt.s32.f32 %v2921_v12  ;;  %v2764_v8 = vsel %vm2748_vm3, %v7987_v34, 8  ;;  %v8152_v29 = vcvt.s32.f32 %v2906_v49 }
 0x3e9   : > { %v8139_v14 = vsel %vm2688_vm5, %v2765_v2, 2147483647  ;;  %v8145_v42 = vsel %vm2688_vm5, %v2764_v8, 2147483647 }
 0x3ea   : > { %v8122_v54 = vpop.xlane.xlu0 %2732  ;;  %v8124_v4 = vpop.xlane.xlu1 %2729  ;;  %2924 = vmin.xlane.f32.xlu0 %v8131_v23  ;;  %9425 = vst [vmem:[#allocation73_spill] sm:$0xff] %v8139_v14  ;;  %v2951_v12 = vshra.s32 %v8139_v14, 16  ;;  %v2936_v2 = vshra.s32 %v8145_v42, 16  ;;  %2909 = vmin.xlane.f32.xlu1 %v8152_v29 }
 0x3eb   : > { %vm2751_vm4 = vcmp.eq.f32.partialorder %v7967_v61, %v8122_v54  ;;  %vm2750_vm1 = vcmp.eq.f32.partialorder %v7971_v30, %v8124_v4 }
 0x3ec   : > { %v2767_v24 = vsel %vm2751_vm4, %v7987_v34, 8  ;;  %v8157_v28 = vcvt.s32.f32 %v2951_v12  ;;  %v8160_v8 = vcvt.s32.f32 %v2936_v2  ;;  %v2766_v35 = vsel %vm2750_vm1, %v7987_v34, 8 }
 0x3ed   : > { %v8163_v36 = vsel %vm2688_vm5, %v2767_v24, 2147483647  ;;  %v8170_v10 = vsel %vm2688_vm5, %v2766_v35, 2147483647  ;;  %v3077_v12 = vmul.f32 1.442695, %v3059_v25  ;;  %v3060_v2 = vsub.f32 %v7861_v53, %v8020_v15 }
 0x3ee   : > { %v8147_v41 = vpop.xlane.xlu1 %2735  ;;  %9426 = vst [vmem:[#allocation74_spill] sm:$0xff] %v8163_v36  ;;  %2954 = vmin.xlane.f32.xlu0 %v8157_v28  ;;  %v2981_v49 = vshra.s32 %v8163_v36, 16  ;;  %v2966_v16 = vshra.s32 %v8170_v10, 16  ;;  %2939 = vmin.xlane.f32.xlu1 %v8160_v8  ;;  %v3061_v25 = vsub.f32 %v7871_v9, %v8032_v51  ;;  %v3062_v15 = vsub.f32 %v7882_v57, %v8044_v11 }
 0x3ef   : > { %vm2752_vm3 = vcmp.eq.f32.partialorder %v7983_v48, %v8147_v41  ;;  %v8184_v36 = vpop.eup %6641  ;;  %6645 = vpow2.f32 %v3077_v12  ;;  %v3079_v35 = vmul.f32 1.442695, %v3060_v2  ;;  %v3063_v2 = vsub.f32 %v7896_v62, %v8057_v37 }
 0x3f0   : > { %v2768_v19 = vsel %vm2752_vm3, %v7987_v34, 8  ;;  %v8178_v14 = vcvt.s32.f32 %v2981_v49  ;;  %v8181_v39 = vcvt.s32.f32 %v2966_v16  ;;  %9427 = vst [vmem:[#allocation75_spill] sm:$0xff] %v8184_v36  ;;  %v3081_v16 = vmul.f32 1.442695, %v3061_v25  ;;  %v8196_v53 = vpop.eup %6643 }
 0x3f1   : > { %v8176_v24 = vsel %vm2688_vm5, %v2768_v19, 2147483647  ;;  %v3105_v19 = vsel %vm2688_vm5, %v8184_v36, 0.0  ;;  %6647 = vpow2.f32 %v3079_v35  ;;  %9428 = vst [vmem:[#allocation76_spill] sm:$0xff] %v8196_v53  ;;  %v3083_v12 = vmul.f32 1.442695, %v3062_v15 }
 0x3f2   : > { %v2996_v34 = vshra.s32 %v8176_v24, 16  ;;  %2984 = vmin.xlane.f32.xlu0 %v8178_v14  ;;  %2969 = vmin.xlane.f32.xlu1 %v8181_v39  ;;  %6649 = vpow2.f32 %v3081_v16  ;;  %v3108_v36 = vsel %vm2688_vm5, %v8196_v53, 0.0  ;;  %v3085_v35 = vmul.f32 1.442695, %v3063_v2 }
 0x3f3   : > { %6651 = vpow2.f32 %v3083_v12  ;;  %v3064_v25 = vsub.f32 %v7915_v52, %v8070_v17  ;;  %v3065_v15 = vsub.f32 %v7907_v18, %v8068_v59  ;;  %v3066_v2 = vsub.f32 %v7935_v63, %v8085_v32 }
 0x3f4   : > { %v8192_v49 = vcvt.s32.f32 %v2996_v34  ;;  %6653 = vpow2.f32 %v3085_v35  ;;  %v3067_v35 = vsub.f32 %v7927_v56, %v8083_v43 }
 0x3f5   : > { %v3087_v16 = vmul.f32 1.442695, %v3064_v25  ;;  %v3089_v12 = vmul.f32 1.442695, %v3065_v15  ;;  %v3091_v25 = vmul.f32 1.442695, %v3066_v2 }
 0x3f6   : > { %3106 = vadd.xlane.f32.xlu0 %v3105_v19  ;;  %2999 = vmin.xlane.f32.xlu1 %v8192_v49  ;;  %v3093_v15 = vmul.f32 1.442695, %v3067_v35 }
 0x3f7   : > { %6655 = vpow2.f32 %v3087_v16  ;;  %v3068_v16 = vsub.f32 %v7955_v0, %v8104_v13 }
 0x3f8   : > { %6657 = vpow2.f32 %v3089_v12  ;;  %v3069_v12 = vsub.f32 %v7947_v5, %v8102_v50 }
 0x3f9   : > { %v8203_v34 = vpop.eup %6645  ;;  %6659 = vpow2.f32 %v3091_v25  ;;  %v3095_v2 = vmul.f32 1.442695, %v3068_v16  ;;  %v3070_v25 = vsub.f32 %v7971_v30, %v8124_v4 }
 0x3fa   : > { %9429 = vst [vmem:[#allocation77_spill] sm:$0xff] %v8203_v34  ;;  %3109 = vadd.xlane.f32.xlu1 %v3108_v36  ;;  %v3111_v19 = vsel %vm2688_vm5, %v8203_v34, 0.0  ;;  %6661 = vpow2.f32 %v3093_v15  ;;  %v3097_v35 = vmul.f32 1.442695, %v3069_v12  ;;  %v3071_v15 = vsub.f32 %v7967_v61, %v8122_v54 }
 0x3fb   : > { %v8209_v11 = vpop.eup %6647  ;;  %6663 = vpow2.f32 %v3095_v2  ;;  %v3099_v16 = vmul.f32 1.442695, %v3070_v25  ;;  %v3072_v2 = vsub.f32 %v7983_v48, %v8147_v41 }
 0x3fc   : > { %9430 = vst [vmem:[#allocation78_spill] sm:$0xff] %v8209_v11  ;;  %v3114_v53 = vsel %vm2688_vm5, %v8209_v11, 0.0  ;;  %v8215_v36 = vpop.eup %6649  ;;  %6665 = vpow2.f32 %v3097_v35  ;;  %v3101_v12 = vmul.f32 1.442695, %v3071_v15 }
 0x3fd   : > { %9431 = vst [vmem:[#allocation79_spill] sm:$0xff] %v8215_v36  ;;  %v3117_v34 = vsel %vm2688_vm5, %v8215_v36, 0.0  ;;  %6667 = vpow2.f32 %v3099_v16  ;;  %v3103_v35 = vmul.f32 1.442695, %v3072_v2 }
 0x3fe   : > { %3112 = vadd.xlane.f32.xlu1 %v3111_v19  ;;  %v8221_v19 = vpop.eup %6651  ;;  %6669 = vpow2.f32 %v3101_v12 }
 0x3ff   : > { %9432 = vst [vmem:[#allocation80_spill] sm:$0xff] %v8221_v19  ;;  %v3120_v11 = vsel %vm2688_vm5, %v8221_v19, 0.0  ;;  %6671 = vpow2.f32 %v3103_v35  ;;  %v2770_v35 = vand.u32 65535, %v7995_v60 }
 0x402   : > { %3115 = vadd.xlane.f32.xlu1 %v3114_v53  ;;  %v8227_v53 = vpop.eup %6653 }
 0x403   : > { %9433 = vst [vmem:[#allocation81_spill] sm:$0xff] %v8227_v53  ;;  %v3123_v36 = vsel %vm2688_vm5, %v8227_v53, 0.0 }
 0x406   : > { %3118 = vadd.xlane.f32.xlu1 %v3117_v34  ;;  %v8233_v34 = vpop.eup %6655 }
 0x407   : > { %9434 = vst [vmem:[#allocation82_spill] sm:$0xff] %v8233_v34  ;;  %v3126_v19 = vsel %vm2688_vm5, %v8233_v34, 0.0 }
 0x40a   : > { %3121 = vadd.xlane.f32.xlu1 %v3120_v11  ;;  %v8239_v11 = vpop.eup %6657 }
 0x40b   : > { %9435 = vst [vmem:[#allocation83_spill] sm:$0xff] %v8239_v11  ;;  %v3129_v53 = vsel %vm2688_vm5, %v8239_v11, 0.0 }
 0x40e   : > { %3124 = vadd.xlane.f32.xlu1 %v3123_v36  ;;  %v8245_v36 = vpop.eup %6659 }
 0x40f   : > { %9436 = vst [vmem:[#allocation84_spill] sm:$0xff] %v8245_v36  ;;  %v3132_v34 = vsel %vm2688_vm5, %v8245_v36, 0.0 }
 0x412   : > { %3127 = vadd.xlane.f32.xlu1 %v3126_v19  ;;  %v8251_v19 = vpop.eup %6661 }
 0x413   : > { %9437 = vst [vmem:[#allocation85_spill] sm:$0xff] %v8251_v19  ;;  %v3135_v11 = vsel %vm2688_vm5, %v8251_v19, 0.0 }
 0x416   : > { %3130 = vadd.xlane.f32.xlu1 %v3129_v53  ;;  %v8257_v53 = vpop.eup %6663 }
 0x417   : > { %v3138_v25 = vsel %vm2688_vm5, %v8257_v53, 0.0  ;;  %v8261_v36 = vpop.eup %6665 }
 0x418   : > { %9438 = vst [vmem:[#allocation86_spill] sm:$0xff] %v8261_v36  ;;  %v8265_v15 = vpop.eup %6667 }
 0x419   : > { %9439 = vst [vmem:[#allocation87_spill] sm:$0xff] %v8265_v15  ;;  %v3144_v16 = vsel %vm2688_vm5, %v8265_v15, 0.0  ;;  %v8269_v19 = vpop.eup %6669  ;;  %v2785_v15 = vand.u32 65535, %v8006_v20  ;;  %v2815_v20 = vand.u32 65535, %v8030_v46  ;;  %v2845_v46 = vand.u32 65535, %v8054_v27 }
 0x41a   : > { %3133 = vadd.xlane.f32.xlu1 %v3132_v34  ;;  %v3141_v34 = vsel %vm2688_vm5, %v8261_v36, 0.0  ;;  %9440 = vst [vmem:[#allocation88_spill] sm:$0xff] %v8269_v19  ;;  %v8273_v12 = vpop.eup %6671 }
 0x41b   : > { %v3150_v2 = vsel %vm2688_vm5, %v8273_v12, 0.0  ;;  %v2787_v36 = vcvt.s32.f32 %v2785_v15  ;;  %v2817_v15 = vcvt.s32.f32 %v2815_v20 }
 0x41e   : > { %3136 = vadd.xlane.f32.xlu1 %v3135_v11  ;;  %v3147_v11 = vsel %vm2688_vm5, %v8269_v19, 0.0 }
 0x422   : > { %3139 = vadd.xlane.f32.xlu1 %v3138_v25 }
 0x426   : > { %3142 = vadd.xlane.f32.xlu1 %v3141_v34  ;;  %v2772_v34 = vcvt.s32.f32 %v2770_v35 }
 0x42a   : > { %3145 = vadd.xlane.f32.xlu1 %v3144_v16 }
 0x42e   : > { %3148 = vadd.xlane.f32.xlu1 %v3147_v11  ;;  %v2800_v11 = vand.u32 65535, %v8018_v45  ;;  %v2830_v45 = vand.u32 65535, %v8042_v33  ;;  %v2860_v33 = vand.u32 65535, %v8066_v58 }
 0x430   : > { %v2802_v35 = vcvt.s32.f32 %v2800_v11  ;;  %v2862_v20 = vcvt.s32.f32 %v2860_v33 }
 0x432   : > { %3151 = vadd.xlane.f32.xlu1 %v3150_v2 }
 0x457   : > { %v8278_v25 = vpop.xlane.xlu0 %2774 }
 0x458   : > { %vm2776_vm2 = vcmp.eq.f32.partialorder %v8002_v3, %v8278_v25 }
 0x459   : > { %v2777_v16 = vsel %vm2776_vm2, %v2772_v34, inf }
 0x45a   : > { %2778 = vmin.xlane.f32.xlu0 %v2777_v16  ;;  %v2832_v16 = vcvt.s32.f32 %v2830_v45  ;;  %v2890_v45 = vand.u32 65535, %v8088_v1 }
 0x45b   : > { %v8283_v19 = vpop.xlane.xlu1 %2789 }
 0x45c   : > { %vm2791_vm4 = vcmp.eq.f32.partialorder %v8014_v31, %v8283_v19 }
 0x45d   : > { %v2792_v2 = vsel %vm2791_vm4, %v2787_v36, inf }
 0x45e   : > { %2793 = vmin.xlane.f32.xlu0 %v2792_v2  ;;  %v2847_v2 = vcvt.s32.f32 %v2845_v46 }
 0x45f   : > { %v8288_v60 = vpop.xlane.xlu0 %2804 }
 0x460   : > { %vm2806_vm1 = vcmp.eq.f32.partialorder %v8026_v7, %v8288_v60 }
 0x461   : > { %v2807_v3 = vsel %vm2806_vm1, %v2802_v35, inf }
 0x462   : > { %2808 = vmin.xlane.f32.xlu0 %v2807_v3 }
 0x463   : > { %v8293_v34 = vpop.xlane.xlu1 %2819 }
 0x464   : > { %vm2821_vm3 = vcmp.eq.f32.partialorder %v8038_v40, %v8293_v34 }
 0x465   : > { %v2822_v31 = vsel %vm2821_vm3, %v2817_v15, inf }
 0x466   : > { %2823 = vmin.xlane.f32.xlu0 %v2822_v31 }
 0x467   : > { %v8298_v36 = vpop.xlane.xlu0 %2834 }
 0x468   : > { %vm2836_vm2 = vcmp.eq.f32.partialorder %v8050_v55, %v8298_v36  ;;  %v2875_v55 = vand.u32 65535, %v8091_v6  ;;  %v2905_v6 = vand.u32 65535, %v8127_v21 }
 0x469   : > { %v2837_v7 = vsel %vm2836_vm2, %v2832_v16, inf }
 0x46a   : > { %2838 = vmin.xlane.f32.xlu0 %v2837_v7  ;;  %v2877_v58 = vcvt.s32.f32 %v2875_v55  ;;  %v2907_v1 = vcvt.s32.f32 %v2905_v6 }
 0x46b   : > { %v8303_v11 = vpop.xlane.xlu1 %2849 }
 0x46c   : > { %vm2851_vm4 = vcmp.eq.f32.partialorder %v8062_v47, %v8303_v11 }
 0x46d   : > { %v2852_v40 = vsel %vm2851_vm4, %v2847_v2, inf }
 0x46e   : > { %2853 = vmin.xlane.f32.xlu0 %v2852_v40  ;;  %v2935_v40 = vand.u32 65535, %v8145_v42 }
 0x46f   : > { %v8308_v35 = vpop.xlane.xlu0 %2864 }
 0x470   : > { %vm2866_vm1 = vcmp.eq.f32.partialorder %v8078_v38, %v8308_v35  ;;  %v2892_v38 = vcvt.s32.f32 %v2890_v45 }
 0x471   : > { %v2867_v27 = vsel %vm2866_vm1, %v2862_v20, inf }
 0x472   : > { %2868 = vmin.xlane.f32.xlu0 %v2867_v27 }
 0x473   : > { %v8313_v3 = vpop.xlane.xlu0 %2894  ;;  %v8315_v15 = vpop.xlane.xlu1 %2879 }
 0x474   : > { %vm2881_vm3 = vcmp.eq.f32.partialorder %v8119_v26, %v8315_v15  ;;  %vm2896_vm2 = vcmp.eq.f32.partialorder %v8109_v22, %v8313_v3  ;;  %v2920_v26 = vand.u32 65535, %v8107_v44  ;;  %v2937_v44 = vcvt.s32.f32 %v2935_v40 }
 0x475   : > { %v2882_v47 = vsel %vm2881_vm3, %v2877_v58, inf  ;;  %v2897_v46 = vsel %vm2896_vm2, %v2892_v38, inf  ;;  %v9441_v58 = vld [vmem:[#allocation73_spill] sm:$0xff] }
 0x476   : > { %2883 = vmin.xlane.f32.xlu0 %v2882_v47  ;;  %v2922_v21 = vcvt.s32.f32 %v2920_v26  ;;  %v2950_v45 = vand.u32 65535, %v9441_v58  ;;  %v9445_v58 = vld [vmem:[#allocation68_spill] sm:$0xff] }
 0x477   : > { %v8320_v31 = vpop.xlane.xlu0 %2924  ;;  %v8325_v16 = vpop.xlane.xlu1 %2909 }
 0x478   : > { %vm2911_vm4 = vcmp.eq.f32.partialorder %v8152_v29, %v8325_v16  ;;  %vm2926_vm1 = vcmp.eq.f32.partialorder %v8131_v23, %v8320_v31  ;;  %v2995_v29 = vand.u32 65535, %v8176_v24  ;;  %v2952_v38 = vcvt.s32.f32 %v2950_v45 }
 0x479   : > { %v2912_v33 = vsel %vm2911_vm4, %v2907_v1, inf  ;;  %v2927_v27 = vsel %vm2926_vm1, %v2922_v21, inf  ;;  %v7001_v1 = vmov -103.616325  }
 0x47a   : > { %2898 = vmin.xlane.f32.xlu0 %v2897_v46  ;;  %v2997_v42 = vcvt.s32.f32 %v2995_v29 }
 0x47b   : > { %v8327_v7 = vpop.xlane.xlu0 %2954  ;;  %v8332_v2 = vpop.xlane.xlu1 %2939 }
 0x47c   : > { %vm2941_vm3 = vcmp.eq.f32.partialorder %v8160_v8, %v8332_v2  ;;  %vm2956_vm4 = vcmp.eq.f32.partialorder %v8157_v28, %v8327_v7  ;;  %v2965_v8 = vand.u32 65535, %v8170_v10  ;;  %v9444_v10 = vld [vmem:[#allocation48_spill] sm:$0xff] }
 0x47d   : > { %v2942_v47 = vsel %vm2941_vm3, %v2937_v44, inf  ;;  %v2957_v46 = vsel %vm2956_vm4, %v2952_v38, inf }
 0x47e   : > { %2913 = vmin.xlane.f32.xlu0 %v2912_v33  ;;  %v5323_v33 = vsel %vm7824_vm6, 0.0, %v7001_v1  ;;  %v2967_v28 = vcvt.s32.f32 %v2965_v8 }
 0x47f   : > { %v8334_v22 = vpop.xlane.xlu0 %2984  ;;  %v8339_v20 = vpop.xlane.xlu1 %2969  ;;  %v5339_v40 = vadd.f32 %v5323_v33, %v9444_v10  ;;  %v9450_v10 = vld [vmem:[#allocation69_spill] sm:$0xff] }
 0x480   : > { %vm2971_vm1 = vcmp.eq.f32.partialorder %v8181_v39, %v8339_v20  ;;  %vm2986_vm6 = vcmp.eq.f32.partialorder %v8178_v14, %v8334_v22 }
 0x481   : > { %v2972_v29 = vsel %vm2971_vm1, %v2967_v28, inf  ;;  %v5355_v45 = vsub.f32 %v5339_v40, %v9445_v58 }
 0x482   : > { %2928 = vmin.xlane.f32.xlu0 %v2927_v27 }
 0x483   : > { %v8342_v55 = vpop.xlane.xlu0 %3106  ;;  %v8348_v23 = vpop.xlane.xlu1 %2999 }
 0x484   : > { %6673 = vlog2.f32 %v8342_v55  ;;  %vm3001_vm2 = vcmp.eq.f32.partialorder %v8192_v49, %v8348_v23  ;;  %v9443_v49 = vld [vmem:[#allocation74_spill] sm:$0xff] }
 0x485   : > { %v3002_v24 = vsel %vm3001_vm2, %v2997_v42, inf  ;;  %v2980_v21 = vand.u32 65535, %v9443_v49  ;;  %v5325_v49 = vsel %vm7844_vm8, 0.0, %v7001_v1  ;;  %v5326_v42 = vsel %vm7855_vm9, 0.0, %v7001_v1 }
 0x486   : > { %2943 = vmin.xlane.f32.xlu0 %v2942_v47  ;;  %3003 = vmin.xlane.f32.xlu1 %v3002_v24  ;;  %v5324_v24 = vsel %vm7834_vm7, 0.0, %v7001_v1 }
 0x487   : > { %v8355_v6 = vpop.xlane.xlu1 %3109  ;;  %v2982_v39 = vcvt.s32.f32 %v2980_v21 }
 0x488   : > { %6675 = vlog2.f32 %v8355_v6 }
 0x489   : > { %v2987_v14 = vsel %vm2986_vm6, %v2982_v39, inf }
 0x48a   : > { %2958 = vmin.xlane.f32.xlu0 %v2957_v46  ;;  %v9448_v46 = vld [vmem:[#allocation50_spill] sm:$0xff] }
 0x48b   : > { %v8365_v27 = vpop.xlane.xlu1 %3112  ;;  %v5340_v26 = vadd.f32 %v5324_v24, %v9448_v46 }
 0x48c   : > { %6677 = vlog2.f32 %v8365_v27 }
 0x48d   : > { %v5356_v40 = vsub.f32 %v5340_v26, %v9450_v10  ;;  %v9454_v26 = vld [vmem:[#allocation54_spill] sm:$0xff]  ;;  %v5331_v10 = vsel %vm7890_vm13, 0.0, %v7001_v1 }
 0x48e   : > { %v6674_v44 = vpop.eup %6673  ;;  %2973 = vmin.xlane.f32.xlu0 %v2972_v29 }
 0x48f   : > { %v5372_v47 = vmul.f32 0.6931472, %v6674_v44  ;;  %v8380_v8 = vpop.xlane.xlu1 %3115  ;;  %v9451_v44 = vld [vmem:[#allocation52_spill] sm:$0xff] }
 0x490   : > { %6679 = vlog2.f32 %v8380_v8  ;;  %v5341_v58 = vadd.f32 %v5325_v49, %v9451_v44  ;;  %v9456_v44 = vld [vmem:[#allocation71_spill] sm:$0xff] }
 0x491   : > { %v5403_v38 = vsub.f32 %v5355_v45, %v5372_v47 }
 0x492   : > { %2988 = vmin.xlane.f32.xlu0 %v2987_v14  ;;  %v6676_v33 = vpop.eup %6675 }
 0x493   : > { %5419 = vst.msk [vmem:[%s8375_s25] sm:$0xff] %vm2688_vm5, %v5403_v38  ;;  %v8389_v21 = vpop.xlane.xlu1 %3118  ;;  %v5374_v29 = vmul.f32 0.6931472, %v6676_v33  ;;  %v9453_v38 = vld [vmem:[#allocation70_spill] sm:$0xff]  ;;  %v5342_v33 = vadd.f32 %v5326_v42, %v9454_v26 }
 0x494   : > { %6681 = vlog2.f32 %v8389_v21  ;;  %v5357_v14 = vsub.f32 %v5341_v58, %v9453_v38  ;;  %v5330_v38 = vsel %vm7901_vm14, 0.0, %v7001_v1 }
 0x495   : > { %v5404_v45 = vsub.f32 %v5356_v40, %v5374_v29  ;;  %v5327_v40 = vsel %vm7865_vm10, 0.0, %v7001_v1  ;;  %v5358_v39 = vsub.f32 %v5342_v33, %v9456_v44 }
 0x496   : > { %v6678_v47 = vpop.eup %6677 }
 0x497   : > { %v8397_v24 = vpop.xlane.xlu1 %3121  ;;  %5420 = vst.msk [vmem:[%s8375_s25 + $0x8] sm:$0xff] %vm2688_vm5, %v5404_v45  ;;  %v5376_v46 = vmul.f32 0.6931472, %v6678_v47  ;;  %v5343_v45 = vadd.f32 %v5327_v40, %v7871_v9  ;;  %v5329_v40 = vsel %vm7886_vm12, 0.0, %v7001_v1 }
 0x498   : > { %6683 = vlog2.f32 %v8397_v24 }
 0x499   : > { %v5405_v28 = vsub.f32 %v5357_v14, %v5376_v46  ;;  %v5328_v14 = vsel %vm7876_vm11, 0.0, %v7001_v1  ;;  %v5359_v26 = vsub.f32 %v5343_v45, %v8032_v51  ;;  %v5345_v45 = vadd.f32 %v5329_v40, %v7896_v62 }
 0x49a   : > { %v6680_v49 = vpop.eup %6679 }
 0x49b   : > { %v8407_v29 = vpop.xlane.xlu1 %3124  ;;  %5421 = vst.msk [vmem:[%s8375_s25 + $0x10] sm:$0xff] %vm2688_vm5, %v5405_v28  ;;  %v5378_v58 = vmul.f32 0.6931472, %v6680_v49  ;;  %v5344_v28 = vadd.f32 %v5328_v14, %v7882_v57 }
 0x49c   : > { %6685 = vlog2.f32 %v8407_v29 }
 0x49d   : > { %v5406_v47 = vsub.f32 %v5358_v39, %v5378_v58  ;;  %v9459_v39 = vld [vmem:[#allocation72_spill] sm:$0xff] }
 0x49e   : > { %v6682_v42 = vpop.eup %6681  ;;  %v5360_v58 = vsub.f32 %v5344_v28, %v9459_v39  ;;  %v5346_v28 = vadd.f32 %v5330_v38, %v7915_v52 }
 0x49f   : > { %v8417_v46 = vpop.xlane.xlu1 %3127  ;;  %5422 = vst.msk [vmem:[%s8375_s25 + $0x18] sm:$0xff] %vm2688_vm5, %v5406_v47  ;;  %v5380_v33 = vmul.f32 0.6931472, %v6682_v42 }
 0x4a0   : > { %6687 = vlog2.f32 %v8417_v46  ;;  %v5362_v39 = vsub.f32 %v5346_v28, %v8070_v17  ;;  %v5333_v28 = vsel %vm7909_vm15, 0.0, %v7001_v1 }
 0x4a1   : > { %v5407_v49 = vsub.f32 %v5359_v26, %v5380_v33  ;;  %v5361_v26 = vsub.f32 %v5345_v45, %v8057_v37 }
 0x4a2   : > { %v6684_v9 = vpop.eup %6683 }
 0x4a3   : > { %v8427_v44 = vpop.xlane.xlu1 %3130  ;;  %5423 = vst.msk [vmem:[%s8375_s25 + $0x20] sm:$0xff] %vm2688_vm5, %v5407_v49  ;;  %v5382_v51 = vmul.f32 0.6931472, %v6684_v9  ;;  %v5349_v9 = vadd.f32 %v5333_v28, %v7927_v56 }
 0x4a4   : > { %6689 = vlog2.f32 %v8427_v44 }
 0x4a5   : > { %v5408_v47 = vsub.f32 %v5360_v58, %v5382_v51  ;;  %v5347_v58 = vadd.f32 %v5331_v10, %v7907_v18 }
 0x4a6   : > { %v6686_v57 = vpop.eup %6685 }
 0x4a7   : > { %v8437_v14 = vpop.xlane.xlu1 %3133  ;;  %5424 = vst.msk [vmem:[%s8375_s25 + $0x28] sm:$0xff] %vm2688_vm5, %v5408_v47  ;;  %v5384_v33 = vmul.f32 0.6931472, %v6686_v57  ;;  %v5332_v47 = vsel %vm7921_vm0, 0.0, %v7001_v1  ;;  %v5363_v42 = vsub.f32 %v5347_v58, %v8068_v59 }
 0x4a8   : > { %6691 = vlog2.f32 %v8437_v14  ;;  %v5348_v38 = vadd.f32 %v5332_v47, %v7935_v63  ;;  %v9466_v47 = vld [vmem:[#allocation62_spill] sm:$0xff] }
 0x4a9   : > { %v5409_v49 = vsub.f32 %v5361_v26, %v5384_v33  ;;  %vm9467_vm8 = vnez %v9466_v47  ;;  %v9468_v33 = vld [vmem:[#allocation65_spill] sm:$0xff] }
 0x4aa   : > { %v6688_v62 = vpop.eup %6687  ;;  %vm9469_vm9 = vnez %v9468_v33 }
 0x4ab   : > { %v8447_v40 = vpop.xlane.xlu1 %3136  ;;  %5425 = vst.msk [vmem:[%s8375_s25 + $0x30] sm:$0xff] %vm2688_vm5, %v5409_v49  ;;  %v5386_v37 = vmul.f32 0.6931472, %v6688_v62  ;;  %v5364_v62 = vsub.f32 %v5348_v38, %v8085_v32  ;;  %v5336_v28 = vsel %vm9469_vm9, 0.0, %v7001_v1 }
 0x4ac   : > { %6693 = vlog2.f32 %v8447_v40 }
 0x4ad   : > { %v5410_v51 = vsub.f32 %v5362_v39, %v5386_v37  ;;  %v9464_v39 = vld [vmem:[#allocation63_spill] sm:$0xff] }
 0x4ae   : > { %v6690_v52 = vpop.eup %6689  ;;  %vm9465_vm7 = vnez %v9464_v39 }
 0x4af   : > { %v8457_v57 = vpop.xlane.xlu1 %3139  ;;  %5426 = vst.msk [vmem:[%s8375_s25 + $0x38] sm:$0xff] %vm2688_vm5, %v5410_v51  ;;  %v5388_v17 = vmul.f32 0.6931472, %v6690_v52  ;;  %v5334_v37 = vsel %vm9465_vm7, 0.0, %v7001_v1  ;;  %v5365_v51 = vsub.f32 %v5349_v9, %v8083_v43  ;;  %v5352_v9 = vadd.f32 %v5336_v28, %v7971_v30 }
 0x4b0   : > { %6695 = vlog2.f32 %v8457_v57  ;;  %v5350_v52 = vadd.f32 %v5334_v37, %v7955_v0  ;;  %v2811_v28 = vcvt.f32.s32 %v8288_v60  ;;  %v2826_v60 = vcvt.f32.s32 %v8293_v34 }
 0x4b1   : > { %v5411_v26 = vsub.f32 %v5363_v42, %v5388_v17  ;;  %v5335_v42 = vsel %vm9467_vm8, 0.0, %v7001_v1  ;;  %v5368_v37 = vsub.f32 %v5352_v9, %v8124_v4  ;;  %v9474_v9 = vld [vmem:[#allocation67_spill] sm:$0xff] }
 0x4b2   : > { %v6692_v18 = vpop.eup %6691  ;;  %v5366_v38 = vsub.f32 %v5350_v52, %v8104_v13 }
 0x4b3   : > { %v8467_v49 = vpop.xlane.xlu1 %3142  ;;  %5427 = vst.msk [vmem:[%s8375_s25 + $0x40] sm:$0xff] %vm2688_vm5, %v5411_v26  ;;  %v5390_v59 = vmul.f32 0.6931472, %v6692_v18  ;;  %v5351_v26 = vadd.f32 %v5335_v42, %v7947_v5 }
 0x4b4   : > { %6697 = vlog2.f32 %v8467_v49 }
 0x4b5   : > { %v5412_v10 = vsub.f32 %v5364_v62, %v5390_v59  ;;  %v5367_v59 = vsub.f32 %v5351_v26, %v8102_v50 }
 0x4b6   : > { %v6694_v63 = vpop.eup %6693 }
 0x4b7   : > { %v8477_v58 = vpop.xlane.xlu1 %3145  ;;  %5428 = vst.msk [vmem:[%s8375_s25 + $0x48] sm:$0xff] %vm2688_vm5, %v5412_v10  ;;  %v5392_v32 = vmul.f32 0.6931472, %v6694_v63  ;;  %v9470_v63 = vld [vmem:[#allocation64_spill] sm:$0xff] }
 0x4b8   : > { %6699 = vlog2.f32 %v8477_v58  ;;  %vm9471_vm10 = vnez %v9470_v63 }
 0x4b9   : > { %v5413_v45 = vsub.f32 %v5365_v51, %v5392_v32  ;;  %v5337_v39 = vsel %vm9471_vm10, 0.0, %v7001_v1 }
 0x4ba   : > { %v6696_v56 = vpop.eup %6695  ;;  %v5353_v51 = vadd.f32 %v5337_v39, %v7967_v61 }
 0x4bb   : > { %v8487_v17 = vpop.xlane.xlu1 %3148  ;;  %5429 = vst.msk [vmem:[%s8375_s25 + $0x50] sm:$0xff] %vm2688_vm5, %v5413_v45  ;;  %v5394_v43 = vmul.f32 0.6931472, %v6696_v56  ;;  %v9472_v45 = vld [vmem:[#allocation66_spill] sm:$0xff] }
 0x4bc   : > { %6701 = vlog2.f32 %v8487_v17  ;;  %vm9473_vm11 = vnez %v9472_v45  ;;  %v5369_v56 = vsub.f32 %v5353_v51, %v8122_v54 }
 0x4bd   : > { %v5414_v18 = vsub.f32 %v5366_v38, %v5394_v43  ;;  %v5338_v30 = vsel %vm9473_vm11, 0.0, %v7001_v1  ;;  %v2781_v1 = vcvt.f32.s32 %v8278_v25  ;;  %v9475_v25 = vmov 0.0  }
 0x4be   : > { %v6698_v0 = vpop.eup %6697  ;;  %v5354_v42 = vadd.f32 %v5338_v30, %v7983_v48  ;;  %v2796_v48 = vcvt.f32.s32 %v8283_v19 }
 0x4bf   : > { %v8497_v62 = vpop.xlane.xlu1 %3151  ;;  %5430 = vst.msk [vmem:[%s8375_s25 + $0x58] sm:$0xff] %vm2688_vm5, %v5414_v18  ;;  %v5396_v13 = vmul.f32 0.6931472, %v6698_v0  ;;  %v2782_v18 = vshll.u32 %v2781_v1, 16 }
 0x4c0   : > { %6703 = vlog2.f32 %v8497_v62  ;;  %v5370_v43 = vsub.f32 %v5354_v42, %v8147_v41  ;;  %v9480_v42 = vld [vmem:[#allocation35_spill] sm:$0xff] }
 0x4c1   : > { %v5415_v10 = vsub.f32 %v5367_v59, %v5396_v13  ;;  %6705 = vrcp.f32 %v8342_v55  ;;  %v2797_v13 = vshll.u32 %v2796_v48, 16  ;;  %v9483_v48 = vld [vmem:[#allocation39_spill] sm:$0xff] }
 0x4c2   : > { %v6700_v5 = vpop.eup %6699  ;;  %6707 = vrcp.f32 %v8355_v6 }
 0x4c3   : > { %5431 = vst.msk [vmem:[%s8375_s25 + $0x60] sm:$0xff] %vm2688_vm5, %v5415_v10  ;;  %v5398_v50 = vmul.f32 0.6931472, %v6700_v5  ;;  %6709 = vrcp.f32 %v8365_v27  ;;  %v9476_v10 = vld [vmem:[#allocation75_spill] sm:$0xff]  ;;  %v2812_v27 = vshll.u32 %v2811_v28, 16 }
 0x4c4   : > { %6711 = vrcp.f32 %v8380_v8  ;;  %v9477_v8 = vld [vmem:[#allocation34_spill] sm:$0xff] }
 0x4c5   : > { %v5416_v32 = vsub.f32 %v5368_v37, %v5398_v50  ;;  %6713 = vrcp.f32 %v8389_v21  ;;  %v9478_v50 = vld [vmem:[#allocation36_spill] sm:$0xff]  ;;  %v2827_v21 = vshll.u32 %v2826_v60, 16 }
 0x4c6   : > { %v6702_v52 = vpop.eup %6701  ;;  %6715 = vrcp.f32 %v8397_v24  ;;  %v2856_v24 = vcvt.f32.s32 %v8303_v11 }
 0x4c7   : > { %5432 = vst.msk [vmem:[%s8375_s25 + $0x68] sm:$0xff] %vm2688_vm5, %v5416_v32  ;;  %v5400_v47 = vmul.f32 0.6931472, %v6702_v52  ;;  %v9479_v32 = vld [vmem:[#allocation76_spill] sm:$0xff]  ;;  %6717 = vrcp.f32 %v8407_v29  ;;  %v2871_v29 = vcvt.f32.s32 %v8308_v35 }
 0x4c8   : > { %v2857_v11 = vshll.u32 %v2856_v24, 16  ;;  %6719 = vrcp.f32 %v8417_v46  ;;  %v9489_v46 = vld [vmem:[#allocation43_spill] sm:$0xff] }
 0x4c9   : > { %v5417_v4 = vsub.f32 %v5369_v56, %v5400_v47  ;;  %v2841_v56 = vcvt.f32.s32 %v8298_v36  ;;  %v2872_v60 = vshll.u32 %v2871_v29, 16  ;;  %6721 = vrcp.f32 %v8427_v44  ;;  %v9491_v44 = vld [vmem:[#allocation38_spill] sm:$0xff] }
 0x4ca   : > { %v6704_v38 = vpop.eup %6703  ;;  %6723 = vrcp.f32 %v8437_v14 }
 0x4cb   : > { %5433 = vst.msk [vmem:[%s8375_s25 + $0x70] sm:$0xff] %vm2688_vm5, %v5417_v4  ;;  %v5402_v61 = vmul.f32 0.6931472, %v6704_v38  ;;  %v6706_v41 = vpop.eup %6705  ;;  %v9481_v4 = vld [vmem:[#allocation37_spill] sm:$0xff]  ;;  %v2842_v36 = vshll.u32 %v2841_v56, 16  ;;  %6725 = vrcp.f32 %v8447_v40  ;;  %v9493_v40 = vld [vmem:[#allocation44_spill] sm:$0xff] }
 0x4cc   : > { %v3169_v5 = vmul.f32 %v6706_v41, %v9476_v10  ;;  %v6708_v63 = vpop.eup %6707  ;;  %v9484_v41 = vld [vmem:[#allocation78_spill] sm:$0xff]  ;;  %v9490_v56 = vld [vmem:[#allocation81_spill] sm:$0xff]  ;;  %6727 = vrcp.f32 %v8457_v57  ;;  %v2946_v57 = vcvt.f32.s32 %v8332_v2 }
 0x4cd   : > { %v5418_v26 = vsub.f32 %v5370_v43, %v5402_v61  ;;  %v3170_v52 = vmul.f32 %v6708_v63, %v9479_v32  ;;  %v6710_v45 = vpop.eup %6709  ;;  %v9482_v43 = vld [vmem:[#allocation77_spill] sm:$0xff]  ;;  %6729 = vrcp.f32 %v8467_v49 }
 0x4ce   : > { %v3171_v61 = vmul.f32 %v6710_v45, %v9482_v43  ;;  %v2886_v45 = vcvt.f32.s32 %v8315_v15  ;;  %v2947_v49 = vshll.u32 %v2946_v57, 16  ;;  %6731 = vrcp.f32 %v8477_v58  ;;  %v4674_v57 = vld [vmem:[#allocation8] sm:$0xff] }
 0x4cf   : > { %5434 = vst.msk [vmem:[%s8375_s25 + $0x78] sm:$0xff] %vm2688_vm5, %v5418_v26  ;;  %v6712_v26 = vpop.eup %6711  ;;  %v2976_v58 = vcvt.f32.s32 %v8339_v20  ;;  %6733 = vrcp.f32 %v8487_v17  ;;  %s9092_s25 = scalar_lea.hbm %s9568_s12, %s5867_s18 }
 0x4d0   : > { %v6714_v28 = vpop.eup %6713  ;;  %6735 = vrcp.f32 %v8497_v62  ;;  %v2991_v62 = vcvt.f32.s32 %v8334_v22  ;;  %v4675_v22 = vld [vmem:[#allocation8 + $0x8] sm:$0xff] }
 0x4e7   : > { %v2779_v54 = vpop.xlane.xlu0 %2778 }
 0x4e8   : > { %v2780_v0 = vcvt.f32.s32 %v2779_v54 }
 0x4ea   : > { %v2783_v33 = vadd.s32 %v2782_v18, %v2780_v0 }
 0x4eb   : > { %v2794_v59 = vpop.xlane.xlu0 %2793 }
 0x4ec   : > { %v2795_v55 = vcvt.f32.s32 %v2794_v59  ;;  %vm3009_vm12 = vcmp.eq.s32.totalorder %v9474_v9, %v2783_v33  ;;  %v3172_v33 = vmul.f32 %v6712_v26, %v9484_v41  ;;  %v2916_v26 = vcvt.f32.s32 %v8325_v16 }
 0x4ed   : > { %v5780_v6 = vsel %vm3009_vm12, 1.0, %v9475_v25 }
 0x4ee   : > { %v2798_v19 = vadd.s32 %v2797_v13, %v2795_v55  ;;  %6310 = vmatprep.mubr.msk.f32.mxu0 %vm2688_vm5, %v5780_v6  ;;  %v9485_v6 = vld [vmem:[#allocation41_spill] sm:$0xff] }
 0x4ef   : > { %6311 = vmatmul.mubr.msk.f32.vlgmr.msra.gmra.mrb[24].mxu0 %vm2688_vm5, %v3169_v5  ;;  %v2809_v39 = vpop.xlane.xlu0 %2808  ;;  %v9486_v5 = vld [vmem:[#allocation79_spill] sm:$0xff] }
 0x4f0   : > { %6319 = vmatpush3.msra.mxu0 %v9477_v8  ;;  %v2810_v37 = vcvt.f32.s32 %v2809_v39  ;;  %vm3010_vm13 = vcmp.eq.s32.totalorder %v9474_v9, %v2798_v19  ;;  %v3173_v63 = vmul.f32 %v6714_v28, %v9486_v5  ;;  %v6716_v19 = vpop.eup %6715  ;;  %v9487_v8 = vld [vmem:[#allocation33_spill] sm:$0xff] }
 0x4f1   : > { %6328 = vmatprep.subr.mxu0 %v9478_v50  ;;  %v5781_v51 = vsel %vm3010_vm13, 1.0, %v9475_v25  ;;  %v6718_v32 = vpop.eup %6717  ;;  %vm9505_vm13 = vcmask 523264  }
 0x4f2   : > { %v2813_v30 = vadd.s32 %v2812_v27, %v2810_v37  ;;  %6315 = vmatprep.mubr.msk.f32.mxu1 %vm2688_vm5, %v5781_v51 }
 0x4f3   : > { %v2824_v34 = vpop.xlane.xlu0 %2823  ;;  %6316 = vmatmul.mubr.msk.f32.vlgmr.msra.gmra.mrb[56].mxu1 %vm2688_vm5, %v3170_v52 }
 0x4f4   : > { %v2825_v47 = vcvt.f32.s32 %v2824_v34  ;;  %6324 = vmatpush3.msra.mxu1 %v9480_v42  ;;  %vm3011_vm14 = vcmp.eq.s32.totalorder %v9474_v9, %v2813_v30  ;;  %v3175_v34 = vmul.f32 %v6718_v32, %v9490_v56  ;;  %v2887_v42 = vshll.u32 %v2886_v45, 16 }
 0x4f5   : > { %6333 = vmatprep.subr.mxu1 %v9481_v4  ;;  %v5782_v38 = vsel %vm3011_vm14, 1.0, %v9475_v25  ;;  %vm9507_vm14 = vmmov %vm9505_vm13 }
 0x4f6   : > { %v2828_v1 = vadd.s32 %v2827_v21, %v2825_v47  ;;  %6320 = vmatprep.mubr.msk.f32.mxu0 %vm2688_vm5, %v5782_v38  ;;  %v2901_v21 = vcvt.f32.s32 %v8313_v3 }
 0x4f7   : > { %v2839_v54 = vpop.xlane.xlu0 %2838  ;;  %6321 = vmatmul.mubr.msk.f32.vlgmr.msra.gmra.mrb[26].mxu0 %vm2688_vm5, %v3171_v61 }
 0x4f8   : > { %v2840_v18 = vcvt.f32.s32 %v2839_v54  ;;  %6329 = vmatpush3.msra.mxu0 %v9478_v50  ;;  %vm3012_vm15 = vcmp.eq.s32.totalorder %v9474_v9, %v2828_v1  ;;  %v9488_v50 = vld [vmem:[#allocation80_spill] sm:$0xff]  ;;  %v2902_v43 = vshll.u32 %v2901_v21, 16 }
 0x4f9   : > { %6338 = vmatprep.subr.mxu0 %v9483_v48  ;;  %v5783_v0 = vsel %vm3012_vm15, 1.0, %v9475_v25  ;;  %v3174_v51 = vmul.f32 %v6716_v19, %v9488_v50  ;;  %vm9509_vm15 = vmmov %vm9505_vm13 }
 0x4fa   : > { %v2843_v59 = vadd.s32 %v2842_v36, %v2840_v18  ;;  %6325 = vmatprep.mubr.msk.f32.mxu1 %vm2688_vm5, %v5783_v0  ;;  %v9492_v36 = vld [vmem:[#allocation82_spill] sm:$0xff]  ;;  %v2931_v18 = vcvt.f32.s32 %v8320_v31  ;;  %v2917_v0 = vshll.u32 %v2916_v26, 16 }
 0x4fb   : > { %v2854_v13 = vpop.xlane.xlu0 %2853  ;;  %6326 = vmatmul.mubr.msk.f32.vlgmr.msra.gmra.mrb[58].mxu1 %vm2688_vm5, %v3172_v33  ;;  %v9494_v33 = vld [vmem:[#allocation83_spill] sm:$0xff] }
 0x4fc   : > { %v2855_v55 = vcvt.f32.s32 %v2854_v13  ;;  %6334 = vmatpush3.msra.mxu1 %v9481_v4  ;;  %vm3013_vm0 = vcmp.eq.s32.totalorder %v9474_v9, %v2843_v59  ;;  %v6720_v4 = vpop.eup %6719  ;;  %v2932_v31 = vshll.u32 %v2931_v18, 16 }
 0x4fd   : > { %6343 = vmatprep.subr.mxu1 %v9485_v6  ;;  %v5784_v10 = vsel %vm3013_vm0, 1.0, %v9475_v25  ;;  %v3176_v54 = vmul.f32 %v6720_v4, %v9492_v36  ;;  %v6722_v24 = vpop.eup %6721  ;;  %vm9511_vm0 = vmmov %vm9505_vm13 }
 0x4fe   : > { %v2858_v27 = vadd.s32 %v2857_v11, %v2855_v55  ;;  %6330 = vmatprep.mubr.msk.f32.mxu0 %vm2688_vm5, %v5784_v10  ;;  %v3177_v28 = vmul.f32 %v6722_v24, %v9494_v33  ;;  %v6724_v59 = vpop.eup %6723  ;;  %v9495_v55 = vld [vmem:[#allocation40_spill] sm:$0xff]  ;;  %v4499_v33 = vld [vmem:[#allocation7 + $0x10] sm:$0xff] }
 0x4ff   : > { %v2869_v39 = vpop.xlane.xlu0 %2868  ;;  %6331 = vmatmul.mubr.msk.f32.vlgmr.msra.gmra.mrb[28].mxu0 %vm2688_vm5, %v3173_v63  ;;  %v9496_v10 = vld [vmem:[#allocation84_spill] sm:$0xff]  ;;  %v6726_v63 = vpop.eup %6725 }
 0x500   : > { %v2870_v35 = vcvt.f32.s32 %v2869_v39  ;;  %6339 = vmatpush3.msra.mxu0 %v9483_v48  ;;  %vm3014_vm3 = vcmp.eq.s32.totalorder %v9474_v9, %v2858_v27  ;;  %v3178_v5 = vmul.f32 %v6724_v59, %v9496_v10  ;;  %v2961_v27 = vcvt.f32.s32 %v8327_v7  ;;  %v4504_v59 = vld [vmem:[#allocation7 + $0x38] sm:$0xff] }
 0x501   : > { %6348 = vmatprep.subr.mxu0 %v9487_v8  ;;  %v5785_v37 = vsel %vm3014_vm3, 1.0, %v9475_v25  ;;  %v3006_v7 = vcvt.f32.s32 %v8348_v23  ;;  %v9499_v23 = vld [vmem:[#allocation42_spill] sm:$0xff]  ;;  %v4681_v10 = vld [vmem:[#allocation8 + $0x38] sm:$0xff]  ;;  %vm9513_vm3 = vmmov %vm9511_vm0 }
 0x502   : > { %v2873_v52 = vadd.s32 %v2872_v60, %v2870_v35  ;;  %6335 = vmatprep.mubr.msk.f32.mxu1 %vm2688_vm5, %v5785_v37  ;;  %v9497_v35 = vld [vmem:[#allocation45_spill] sm:$0xff] }
 0x503   : > { %6336 = vmatmul.mubr.msk.f32.vlgmr.msra.gmra.mrb[60].mxu1 %vm2688_vm5, %v3174_v51  ;;  %v2884_v47 = vpop.xlane.xlu0 %2883  ;;  %v9498_v37 = vld [vmem:[#allocation85_spill] sm:$0xff]  ;;  %v6728_v51 = vpop.eup %6727  ;;  %v3007_v21 = vshll.u32 %v3006_v7, 16  ;;  %v4680_v7 = vld [vmem:[#allocation8 + $0x30] sm:$0xff] }
 0x504   : > { %6344 = vmatpush3.msra.mxu1 %v9485_v6  ;;  %vm3015_vm2 = vcmp.eq.s32.totalorder %v9474_v9, %v2873_v52  ;;  %v2885_v15 = vcvt.f32.s32 %v2884_v47  ;;  %v3179_v50 = vmul.f32 %v6726_v63, %v9498_v37  ;;  %v2962_v52 = vshll.u32 %v2961_v27, 16  ;;  %v6730_v20 = vpop.eup %6729  ;;  %v4498_v47 = vld [vmem:[#allocation7 + $0x8] sm:$0xff]  ;;  %v9503_v27 = vld [vmem:[#allocation88_spill] sm:$0xff] }
 0x505   : > { %6353 = vmatprep.subr.mxu1 %v9489_v46  ;;  %v5786_v30 = vsel %vm3015_vm2, 1.0, %v9475_v25  ;;  %v4508_v37 = vld [vmem:[#allocation7 + $0x58] sm:$0xff]  ;;  %vm9515_vm2 = vmmov %vm9511_vm0 }
 0x506   : > { %6340 = vmatprep.mubr.msk.f32.mxu0 %vm2688_vm5, %v5786_v30  ;;  %v2888_v38 = vadd.s32 %v2887_v42, %v2885_v15  ;;  %v4500_v42 = vld [vmem:[#allocation7 + $0x18] sm:$0xff] }
 0x507   : > { %6341 = vmatmul.mubr.msk.f32.vlgmr.msra.gmra.mrb[30].mxu0 %vm2688_vm5, %v3175_v34  ;;  %v2899_v61 = vpop.xlane.xlu0 %2898  ;;  %v3180_v34 = vmul.f32 %v6728_v51, %v8257_v53  ;;  %v9500_v53 = vld [vmem:[#allocation46_spill] sm:$0xff]  ;;  %v4678_v51 = vld [vmem:[#allocation8 + $0x20] sm:$0xff] }
 0x508   : > { %6349 = vmatpush3.msra.mxu0 %v9487_v8  ;;  %v2900_v1 = vcvt.f32.s32 %v2899_v61  ;;  %vm3016_vm4 = vcmp.eq.s32.totalorder %v9474_v9, %v2888_v38  ;;  %v9501_v61 = vld [vmem:[#allocation86_spill] sm:$0xff] }
 0x509   : > { %6358 = vmatprep.subr.mxu0 %v9491_v44  ;;  %v5787_v3 = vsel %vm3016_vm4, 1.0, %v9475_v25  ;;  %v3181_v26 = vmul.f32 %v6730_v20, %v9501_v61  ;;  %v4684_v20 = vld [vmem:[#allocation8 + $0x50] sm:$0xff]  ;;  %vm9517_vm4 = vmmov %vm9511_vm0 }
 0x50a   : > { %v2903_v14 = vadd.s32 %v2902_v43, %v2900_v1  ;;  %6345 = vmatprep.mubr.msk.f32.mxu1 %vm2688_vm5, %v5787_v3  ;;  %v6420_v1 = vpack.c.bf16 %v4500_v42, %v4498_v47  ;;  %v6732_v3 = vpop.eup %6731 }
 0x50b   : > { %v2914_v48 = vpop.xlane.xlu0 %2913  ;;  %6346 = vmatmul.mubr.msk.f32.vlgmr.msra.gmra.mrb[62].mxu1 %vm2688_vm5, %v3176_v54  ;;  %v4677_v54 = vld [vmem:[#allocation8 + $0x18] sm:$0xff] }
 0x50c   : > { %v2915_v16 = vcvt.f32.s32 %v2914_v48  ;;  %6354 = vmatpush3.msra.mxu1 %v9489_v46  ;;  %vm3017_vm1 = vcmp.eq.s32.totalorder %v9474_v9, %v2903_v14  ;;  %v2992_v14 = vshll.u32 %v2991_v62, 16  ;;  %v4497_v48 = vld [vmem:[#allocation7] sm:$0xff] }
 0x50d   : > { %6363 = vmatprep.subr.mxu1 %v9493_v40  ;;  %v5788_v41 = vsel %vm3017_vm1, 1.0, %v9475_v25  ;;  %v4509_v62 = vld [vmem:[#allocation7 + $0x60] sm:$0xff]  ;;  %vm9519_vm1 = vmmov %vm9511_vm0 }
 0x50e   : > { %v2918_v13 = vadd.s32 %v2917_v0, %v2915_v16  ;;  %6350 = vmatprep.mubr.msk.f32.mxu0 %vm2688_vm5, %v5788_v41  ;;  %v6734_v0 = vpop.eup %6733 }
 0x50f   : > { %v2929_v11 = vpop.xlane.xlu0 %2928  ;;  %6351 = vmatmul.mubr.msk.f32.vlgmr.msra.gmra.mrb[32].mxu0 %vm2688_vm5, %v3177_v28  ;;  %v4502_v28 = vld [vmem:[#allocation7 + $0x28] sm:$0xff] }
 0x510   : > { %v2930_v29 = vcvt.f32.s32 %v2929_v11  ;;  %6359 = vmatpush3.msra.mxu0 %v9491_v44  ;;  %vm3018_vm6 = vcmp.eq.s32.totalorder %v9474_v9, %v2918_v13  ;;  %v2977_v44 = vshll.u32 %v2976_v58, 16  ;;  %v6436_v13 = vpack.c.bf16 %v4677_v54, %v4675_v22  ;;  %v4505_v58 = vld [vmem:[#allocation7 + $0x40] sm:$0xff]  ;;  %v9514_v54 = vld [vmem:[#allocation22_spill] sm:$0xff] }
 0x511   : > { %6368 = vmatprep.subr.mxu0 %v9495_v55  ;;  %v5789_v6 = vsel %vm3018_vm6, 1.0, %v9475_v25  ;;  %v6424_v63 = vpack.c.bf16 %v4504_v59, %v4502_v28  ;;  %v9512_v22 = vld [vmem:[#allocation21_spill] sm:$0xff]  ;;  %vm9521_vm6 = vmmov %vm9511_vm0  ;;  %v9534_v28 = vld [vmem:[#allocation31_spill] sm:$0xff] }
 0x512   : > { %v2933_v19 = vadd.s32 %v2932_v31, %v2930_v29  ;;  %6355 = vmatprep.mubr.msk.f32.mxu1 %vm2688_vm5, %v5789_v6  ;;  %v6736_v31 = vpop.eup %6735  ;;  %v4676_v29 = vld [vmem:[#allocation8 + $0x10] sm:$0xff]  ;;  %v4679_v6 = vld [vmem:[#allocation8 + $0x28] sm:$0xff] }
 0x513   : > { %v2944_v2 = vpop.xlane.xlu0 %2943  ;;  %6356 = vmatmul.mubr.msk.f32.vlgmr.msra.gmra.mrb[64].mxu1 %vm2688_vm5, %v3178_v5  ;;  %v3004_v60 = vpop.xlane.xlu1 %3003  ;;  %v6422_v5 = vpack.c.bf16 %v4499_v33, %v4497_v48  ;;  %v9522_v48 = vld [vmem:[#allocation25_spill] sm:$0xff]  ;;  %v9532_v33 = vld [vmem:[#allocation32_spill] sm:$0xff] }
 0x514   : > { %v2945_v39 = vcvt.f32.s32 %v2944_v2  ;;  %6364 = vmatpush3.msra.mxu1 %v9493_v40  ;;  %vm3019_vm7 = vcmp.eq.s32.totalorder %v9474_v9, %v2933_v19  ;;  %v3005_v46 = vcvt.f32.s32 %v3004_v60  ;;  %v9502_v40 = vld [vmem:[#allocation87_spill] sm:$0xff]  ;;  %v3183_v2 = vmul.f32 %v6734_v0, %v9503_v27  ;;  %v9524_v0 = vld [vmem:[#allocation28_spill] sm:$0xff] }
 0x515   : > { %6373 = vmatprep.subr.mxu1 %v9497_v35  ;;  %v5790_v8 = vsel %vm3019_vm7, 1.0, %v9475_v25  ;;  %v3182_v41 = vmul.f32 %v6732_v3, %v9502_v40  ;;  %v4503_v60 = vld [vmem:[#allocation7 + $0x30] sm:$0xff]  ;;  %vm9523_vm7 = vmmov %vm9511_vm0  ;;  %v9528_v40 = vld [vmem:[#allocation30_spill] sm:$0xff] }
 0x516   : > { %v2948_v32 = vadd.s32 %v2947_v49, %v2945_v39  ;;  %6360 = vmatprep.mubr.msk.f32.mxu0 %vm2688_vm5, %v5790_v8  ;;  %v3008_v4 = vadd.s32 %v3007_v21, %v3005_v46  ;;  %v3184_v49 = vmul.f32 %v6736_v31, %v8273_v12  ;;  %v4501_v39 = vld [vmem:[#allocation7 + $0x20] sm:$0xff]  ;;  %v6438_v8 = vpack.c.bf16 %v4676_v29, %v4674_v57  ;;  %v4510_v46 = vld [vmem:[#allocation7 + $0x68] sm:$0xff]  ;;  %v9508_v3 = vld [vmem:[#allocation19_spill] sm:$0xff] }
 0x517   : > { %v2959_v45 = vpop.xlane.xlu0 %2958  ;;  %6361 = vmatmul.mubr.msk.f32.vlgmr.msra.gmra.mrb[34].mxu0 %vm2688_vm5, %v3179_v50  ;;  %v6440_v50 = vpack.c.bf16 %v4681_v10, %v4679_v6  ;;  %v4687_v21 = vld [vmem:[#allocation8 + $0x68] sm:$0xff]  ;;  %v4931_v10 = vld [vmem:[%s9541_s10] sm:$0xff]  ;;  %v4950_v27 = vld [vmem:[%s9541_s10 + $0x98] sm:$0xff] }
 0x518   : > { %v2960_v30 = vcvt.f32.s32 %v2959_v45  ;;  %6369 = vmatpush3.msra.mxu0 %v9495_v55  ;;  %vm3020_vm8 = vcmp.eq.s32.totalorder %v9474_v9, %v2948_v32  ;;  %vm3024_vm11 = vcmp.eq.s32.totalorder %v9474_v9, %v3008_v4  ;;  %v4685_v32 = vld [vmem:[#allocation8 + $0x58] sm:$0xff]  ;;  %v4507_v45 = vld [vmem:[#allocation7 + $0x50] sm:$0xff]  ;;  %v4948_v6 = vld [vmem:[%s9541_s10 + $0x88] sm:$0xff] }
 0x519   : > { %6378 = vmatprep.subr.mxu0 %v9499_v23  ;;  %v5791_v56 = vsel %vm3020_vm8, 1.0, %v9475_v25  ;;  %v5795_v55 = vsel %vm3024_vm11, 1.0, %v9475_v25  ;;  %v6430_v47 = vpack.c.bf16 %v4507_v45, %v4505_v58  ;;  %vm9525_vm8 = vmmov %vm9511_vm0  ;;  %v4954_v58 = vld [vmem:[%s9541_s10 + $0xb8] sm:$0xff] }
 0x51a   : > { %v2963_v17 = vadd.s32 %v2962_v52, %v2960_v30  ;;  %6365 = vmatprep.mubr.msk.f32.mxu1 %vm2688_vm5, %v5791_v56  ;;  %v6426_v52 = vpack.c.bf16 %v4503_v60, %v4501_v39  ;;  %v6442_v30 = vpack.c.bf16 %v4680_v7, %v4678_v51  ;;  %vm9531_vm11 = vmmov %vm9511_vm0  ;;  %v4933_v60 = vld [vmem:[%s9541_s10 + $0x10] sm:$0xff] }
 0x51b   : > { %v2974_v15 = vpop.xlane.xlu0 %2973  ;;  %6366 = vmatmul.mubr.msk.f32.vlgmr.msra.gmra.mrb[66].mxu1 %vm2688_vm5, %v3180_v34  ;;  %v4682_v34 = vld [vmem:[#allocation8 + $0x40] sm:$0xff] }
 0x51c   : > { %v2975_v38 = vcvt.f32.s32 %v2974_v15  ;;  %6374 = vmatpush3.msra.mxu1 %v9497_v35  ;;  %vm3021_vm9 = vcmp.eq.s32.totalorder %v9474_v9, %v2963_v17  ;;  %v4506_v35 = vld [vmem:[#allocation7 + $0x48] sm:$0xff]  ;;  %v4689_v17 = vld [vmem:[#allocation8 + $0x78] sm:$0xff]  ;;  %v4511_v15 = vld [vmem:[#allocation7 + $0x70] sm:$0xff] }
 0x51d   : > { %6383 = vmatprep.subr.mxu1 %v9500_v53  ;;  %v5792_v43 = vsel %vm3021_vm9, 1.0, %v9475_v25  ;;  %v6428_v12 = vpack.c.bf16 %v4508_v37, %v4506_v35  ;;  %v6448_v4 = vpack.c.bf16 %v4689_v17, %v4687_v21  ;;  %vm9527_vm9 = vmmov %vm9511_vm0  ;;  %v4934_v35 = vld [vmem:[%s9541_s10 + $0x18] sm:$0xff]  ;;  %v4956_v21 = vld [vmem:[%s9541_s10 + $0xc8] sm:$0xff] }
 0x51e   : > { %v2978_v36 = vadd.s32 %v2977_v44, %v2975_v38  ;;  %6370 = vmatprep.mubr.msk.f32.mxu0 %vm2688_vm5, %v5792_v43  ;;  %v6446_v44 = vpack.c.bf16 %v4684_v20, %v4682_v34  ;;  %v4686_v38 = vld [vmem:[#allocation8 + $0x60] sm:$0xff]  ;;  %v6434_v43 = vpack.c.bf16 %v4511_v15, %v4509_v62  ;;  %v6458_v51 = vpack.c.bf16 %v4934_v35, %v4933_v60  ;;  %v4940_v15 = vld [vmem:[%s9541_s10 + $0x48] sm:$0xff] }
 0x51f   : > { %v2989_v24 = vpop.xlane.xlu0 %2988  ;;  %6371 = vmatmul.mubr.msk.f32.vlgmr.msra.gmra.mrb[36].mxu0 %vm2688_vm5, %v3181_v26  ;;  %v9504_v26 = vld [vmem:[#allocation17_spill] sm:$0xff] }
 0x520   : > { %v2990_v18 = vcvt.f32.s32 %v2989_v24  ;;  %6379 = vmatpush3.msra.mxu0 %v9499_v23  ;;  %vm3022_vm10 = vcmp.eq.s32.totalorder %v9474_v9, %v2978_v36  ;;  %v4512_v23 = vld [vmem:[#allocation7 + $0x78] sm:$0xff]  ;;  %v9516_v24 = vld [vmem:[#allocation23_spill] sm:$0xff]  ;;  %v4955_v20 = vld [vmem:[%s9541_s10 + $0xc0] sm:$0xff] }
 0x521   : > { %v5793_v16 = vsel %vm3022_vm10, 1.0, %v9475_v25  ;;  %6421 = vmatprep.subr.bf16.mxu0 %v6420_v1  ;;  %v6432_v42 = vpack.c.bf16 %v4512_v23, %v4510_v46  ;;  %v9506_v1 = vld [vmem:[#allocation18_spill] sm:$0xff]  ;;  %v9510_v36 = vld [vmem:[#allocation20_spill] sm:$0xff]  ;;  %vm9529_vm10 = vmmov %vm9511_vm0 }
 0x522   : > { %v2993_v11 = vadd.s32 %v2992_v14, %v2990_v18  ;;  %6375 = vmatprep.mubr.msk.f32.mxu1 %vm2688_vm5, %v5793_v16  ;;  %v9518_v14 = vld [vmem:[#allocation24_spill] sm:$0xff]  ;;  %v9520_v18 = vld [vmem:[#allocation26_spill] sm:$0xff]  ;;  %v9526_v16 = vld [vmem:[#allocation27_spill] sm:$0xff] }
 0x523   : > { %6376 = vmatmul.mubr.msk.f32.vlgmr.msra.gmra.mrb[68].mxu1 %vm2688_vm5, %v3182_v41  ;;  %v9530_v41 = vld [vmem:[#allocation29_spill] sm:$0xff]  ;;  %v4937_v23 = vld [vmem:[%s9541_s10 + $0x30] sm:$0xff] }
 0x524   : > { %6384 = vmatpush3.msra.mxu1 %v9500_v53  ;;  %6385 = vmatprep.mubr.msk.f32.mxu1 %vm2688_vm5, %v5795_v55  ;;  %vm3023_vm12 = vcmp.eq.s32.totalorder %v9474_v9, %v2993_v11  ;;  %v4683_v9 = vld [vmem:[#allocation8 + $0x48] sm:$0xff]  ;;  %v4688_v53 = vld [vmem:[#allocation8 + $0x70] sm:$0xff]  ;;  %v4947_v55 = vld [vmem:[%s9541_s10 + $0x80] sm:$0xff] }
 0x525   : > { %v5794_v19 = vsel %vm3023_vm12, 1.0, %v9475_v25  ;;  %6437 = vmatprep.subr.bf16.mxu1 %v6436_v13  ;;  %v6444_v56 = vpack.c.bf16 %v4685_v32, %v4683_v9  ;;  %v6450_v61 = vpack.c.bf16 %v4688_v53, %v4686_v38  ;;  %vm9533_vm12 = vmmov %vm9511_vm0  ;;  %v4935_v9 = vld [vmem:[%s9541_s10 + $0x20] sm:$0xff]  ;;  %v4936_v32 = vld [vmem:[%s9541_s10 + $0x28] sm:$0xff] }
 0x526   : > { %6380 = vmatprep.mubr.msk.f32.mxu0 %vm2688_vm5, %v5794_v19  ;;  %v4949_v19 = vld [vmem:[%s9541_s10 + $0x90] sm:$0xff]  ;;  %v6462_v46 = vpack.c.bf16 %v4936_v32, %v4935_v9  ;;  %v4939_v62 = vld [vmem:[%s9541_s10 + $0x40] sm:$0xff]  ;;  %v4958_v38 = vld [vmem:[%s9541_s10 + $0xd8] sm:$0xff] }
 0x527   : > { %6381 = vmatmul.mubr.msk.f32.vlgmr.msra.gmra.mrb[38].mxu0 %vm2688_vm5, %v3183_v2  ;;  %6386 = vmatmul.mubr.msk.f32.vlgmr.msra.gmra.mrb[70].mxu1 %vm2688_vm5, %v3184_v49  ;;  %v6456_v39 = vpack.c.bf16 %v4950_v27, %v4949_v19 }
 0x528   : > { %6423 = vmatpush1.bf16.msra.mxu0 %v6422_v5  ;;  %4577 = vmatprep.mubr.f32.mxu0 %v9475_v25  ;;  %v6452_v5 = vpack.c.bf16 %v4948_v6, %v4947_v55 }
 0x529   : > { %6425 = vmatprep.subr.bf16.mxu0 %v6424_v63  ;;  %6439 = vmatpush1.bf16.msra.mxu1 %v6438_v8  ;;  %v4932_v63 = vld [vmem:[%s9541_s10 + $0x8] sm:$0xff]  ;;  %v4951_v8 = vld [vmem:[%s9541_s10 + $0xa0] sm:$0xff] }
 0x52a   : > { %6441 = vmatprep.subr.bf16.mxu1 %v6440_v50  ;;  %4802 = vmatprep.mubr.f32.mxu1 %v9475_v25  ;;  %v6454_v49 = vpack.c.bf16 %v4932_v63, %v4931_v10  ;;  %v4952_v50 = vld [vmem:[%s9541_s10 + $0xa8] sm:$0xff] }
 0x52b   : > { %v6460_v7 = vpack.c.bf16 %v4952_v50, %v4951_v8 }
 0x52c   : > { %6427 = vmatpush1.bf16.msra.mxu0 %v6426_v52 }
 0x52d   : > { %6429 = vmatprep.subr.bf16.mxu0 %v6428_v12  ;;  %6443 = vmatpush1.bf16.msra.mxu1 %v6442_v30  ;;  %v4953_v12 = vld [vmem:[%s9541_s10 + $0xb0] sm:$0xff] }
 0x52e   : > { %6445 = vmatprep.subr.bf16.mxu1 %v6444_v56  ;;  %v6464_v30 = vpack.c.bf16 %v4954_v58, %v4953_v12  ;;  %v4938_v56 = vld [vmem:[%s9541_s10 + $0x38] sm:$0xff] }
 0x530   : > { %6431 = vmatpush1.bf16.msra.mxu0 %v6430_v47  ;;  %v6466_v47 = vpack.c.bf16 %v4938_v56, %v4937_v23 }
 0x531   : > { %6433 = vmatprep.subr.bf16.mxu0 %v6432_v42  ;;  %6447 = vmatpush1.bf16.msra.mxu1 %v6446_v44  ;;  %v6468_v42 = vpack.c.bf16 %v4956_v21, %v4955_v20 }
 0x532   : > { %6449 = vmatprep.subr.bf16.mxu1 %v6448_v4  ;;  %v4957_v4 = vld [vmem:[%s9541_s10 + $0xd0] sm:$0xff] }
 0x534   : > { %6435 = vmatpush1.bf16.msra.mxu0 %v6434_v43  ;;  %v6470_v43 = vpack.c.bf16 %v4940_v15, %v4939_v62 }
 0x535   : > { %6451 = vmatpush1.bf16.msra.mxu1 %v6450_v61  ;;  %6453 = vmatprep.subr.bf16.mxu0 %v6452_v5  ;;  %v6472_v61 = vpack.c.bf16 %v4958_v38, %v4957_v4 }
 0x537   : > { %5828 = vmatmul.mubr.msk.f32.vlgmr.msra.gmra.mrb[40].mxu0 %vm9505_vm13, %v9504_v26  ;;  %vm9535_vm13 = vmmov %vm9511_vm0  ;;  %v4941_v26 = vld [vmem:[%s9541_s10 + $0x50] sm:$0xff] }
 0x538   : > { %4583 = vmatprep.mubr.f32.mxu0 %v9475_v25  ;;  %6455 = vmatpush3.bf16.msra.mxu0 %v6454_v49 }
 0x539   : > { %6457 = vmatprep.subr.bf16.mxu0 %v6456_v39 }
 0x53b   : > { %5829 = vmatmul.mubr.msk.f32.gmra.mrb[42].mxu0 %vm9507_vm14, %v9506_v1  ;;  %vm9536_vm14 = vmmov %vm9511_vm0  ;;  %v4942_v1 = vld [vmem:[%s9541_s10 + $0x58] sm:$0xff] }
 0x53c   : > { %4589 = vmatprep.mubr.f32.mxu0 %v9475_v25  ;;  %6459 = vmatpush3.bf16.msra.mxu0 %v6458_v51 }
 0x53d   : > { %6461 = vmatprep.subr.bf16.mxu0 %v6460_v7 }
 0x53f   : > { %5830 = vmatmul.mubr.msk.f32.gmra.mrb[44].mxu0 %vm9509_vm15, %v9508_v3  ;;  %vm9537_vm15 = vmmov %vm9511_vm0  ;;  %v4959_v3 = vld [vmem:[%s9541_s10 + $0xe0] sm:$0xff] }
 0x540   : > { %4595 = vmatprep.mubr.f32.mxu0 %v9475_v25  ;;  %6463 = vmatpush3.bf16.msra.mxu0 %v6462_v46 }
 0x541   : > { %6465 = vmatprep.subr.bf16.mxu0 %v6464_v30 }
 0x543   : > { %5831 = vmatmul.mubr.msk.f32.gmra.mrb[46].mxu0 %vm9511_vm0, %v9510_v36  ;;  %v4960_v36 = vld [vmem:[%s9541_s10 + $0xe8] sm:$0xff] }
 0x544   : > { %4601 = vmatprep.mubr.f32.mxu0 %v9475_v25  ;;  %6467 = vmatpush3.bf16.msra.mxu0 %v6466_v47 }
 0x545   : > { %6469 = vmatprep.subr.bf16.mxu0 %v6468_v42 }
 0x547   : > { %5832 = vmatmul.mubr.msk.f32.gmra.mrb[48].mxu0 %vm9513_vm3, %v9512_v22  ;;  %vm9538_vm3 = vmmov %vm9511_vm0  ;;  %v6474_v22 = vpack.c.bf16 %v4942_v1, %v4941_v26 }
 0x548   : > { %4607 = vmatprep.mubr.f32.mxu0 %v9475_v25  ;;  %6471 = vmatpush3.bf16.msra.mxu0 %v6470_v43 }
 0x549   : > { %6473 = vmatprep.subr.bf16.mxu0 %v6472_v61 }
 0x54b   : > { %5833 = vmatmul.mubr.msk.f32.gmra.mrb[50].mxu0 %vm9515_vm2, %v9514_v54  ;;  %vm9539_vm2 = vmmov %vm9511_vm0  ;;  %v6476_v54 = vpack.c.bf16 %v4960_v36, %v4959_v3 }
 0x54c   : > { %4613 = vmatprep.mubr.f32.mxu0 %v9475_v25  ;;  %6475 = vmatpush3.bf16.msra.mxu0 %v6474_v22 }
 0x54d   : > { %6477 = vmatprep.subr.bf16.mxu0 %v6476_v54 }
 0x54f   : > { %5834 = vmatmul.mubr.msk.f32.gmra.mrb[52].mxu0 %vm9517_vm4, %v9516_v24  ;;  %vm9540_vm4 = vmmov %vm9511_vm0  ;;  %v4943_v24 = vld [vmem:[%s9541_s10 + $0x60] sm:$0xff] }
 0x550   : > { %4619 = vmatprep.mubr.f32.mxu0 %v9475_v25 }
 0x553   : > { %5835 = vmatmul.mubr.msk.f32.gmra.mrb[54].mxu0 %vm9519_vm1, %v9518_v14  ;;  %vm9542_vm1 = vmmov %vm9511_vm0  ;;  %v4944_v14 = vld [vmem:[%s9541_s10 + $0x68] sm:$0xff] }
 0x554   : > { %4625 = vmatprep.mubr.f32.mxu0 %v9475_v25 }
 0x557   : > { %5836 = vmatmul.mubr.msk.f32.gmra.mrb[56].mxu0 %vm9521_vm6, %v9520_v18  ;;  %vm9543_vm6 = vmmov %vm9511_vm0  ;;  %v4961_v18 = vld [vmem:[%s9541_s10 + $0xf0] sm:$0xff] }
 0x558   : > { %4631 = vmatprep.mubr.f32.mxu0 %v9475_v25 }
 0x55b   : > { %5837 = vmatmul.mubr.msk.f32.gmra.mrb[58].mxu0 %vm9523_vm7, %v9522_v48  ;;  %vm9544_vm7 = vmmov %vm9511_vm0  ;;  %v4962_v48 = vld [vmem:[%s9541_s10 + $0xf8] sm:$0xff] }
 0x55c   : > { %4637 = vmatprep.mubr.f32.mxu0 %v9475_v25 }
 0x55f   : > { %5838 = vmatmul.mubr.msk.f32.gmra.mrb[60].mxu0 %vm9525_vm8, %v9524_v0  ;;  %vm9545_vm8 = vmmov %vm9511_vm0 }
 0x560   : > { %4643 = vmatprep.mubr.f32.mxu0 %v9475_v25 }
 0x563   : > { %5839 = vmatmul.mubr.msk.f32.gmra.mrb[62].mxu0 %vm9527_vm9, %v9526_v16  ;;  %vm9546_vm9 = vmmov %vm9511_vm0 }
 0x564   : > { %4649 = vmatprep.mubr.f32.mxu0 %v9475_v25 }
 0x567   : > { %5840 = vmatmul.mubr.msk.f32.gmra.mrb[64].mxu0 %vm9529_vm10, %v9528_v40  ;;  %vm9547_vm10 = vmmov %vm9511_vm0  ;;  %v6478_v40 = vpack.c.bf16 %v4944_v14, %v4943_v24 }
 0x568   : > { %4655 = vmatprep.mubr.f32.mxu0 %v9475_v25 }
 0x569   : > { %6479 = vmatpush3.bf16.msra.mxu0 %v6478_v40 }
 0x56b   : > { %5841 = vmatmul.mubr.msk.f32.gmra.mrb[66].mxu0 %vm9531_vm11, %v9530_v41  ;;  %vm9548_vm11 = vmmov %vm9511_vm0  ;;  %v6480_v41 = vpack.c.bf16 %v4962_v48, %v4961_v18 }
 0x56c   : > { %4661 = vmatprep.mubr.f32.mxu0 %v9475_v25 }
 0x56d   : > { %6481 = vmatprep.subr.bf16.mxu0 %v6480_v41 }
 0x56f   : > { %5842 = vmatmul.mubr.msk.f32.gmra.mrb[68].mxu0 %vm9533_vm12, %v9532_v33  ;;  %vm9549_vm12 = vmmov %vm9511_vm0  ;;  %v4945_v33 = vld [vmem:[%s9541_s10 + $0x70] sm:$0xff] }
 0x570   : > { %4667 = vmatprep.mubr.f32.mxu0 %v9475_v25 }
 0x573   : > { %5843 = vmatmul.mubr.msk.f32.gmra.mrb[70].mxu0 %vm9535_vm13, %v9534_v28  ;;  %vm9550_vm13 = vmmov %vm9511_vm0  ;;  %v4946_v28 = vld [vmem:[%s9541_s10 + $0x78] sm:$0xff] }
 0x5c2   : > { %v6312_v59 = vpop.f32.mrb[24].mxu0 }
 0x5c3   : > { %4481 = vst.msk [vmem:[%s8714_s23] sm:$0xff] %vm9536_vm14, %v6312_v59  ;;  %v3257_v13 = vpop.f32.mrb[25].mxu0  ;;  %vm9551_vm14 = vmmov %vm9511_vm0 }
 0x5c4   : > { %5844 = vmatmul.mubr.msk.f32.vlgmr.msra.gmra.mrb[72].mxu1 %vm9537_vm15, %v3257_v13  ;;  %vm9552_vm15 = vmmov %vm9511_vm0 }
 0x5c5   : > { %4808 = vmatprep.mubr.f32.mxu1 %v9475_v25 }
 0x5c6   : > { %v6317_v31 = vpop.f32.mrb[56].mxu1 }
 0x5c7   : > { %4482 = vst.msk [vmem:[%s8714_s23 + $0x8] sm:$0xff] %vm9511_vm0, %v6317_v31  ;;  %v3338_v11 = vpop.f32.mrb[57].mxu1  ;;  %v6482_v31 = vpack.c.bf16 %v4946_v28, %v4945_v33 }
 0x5c8   : > { %5845 = vmatmul.mubr.msk.f32.gmra.mrb[74].mxu1 %vm9538_vm3, %v3338_v11  ;;  %vm9553_vm3 = vmmov %vm9511_vm0 }
 0x5c9   : > { %4814 = vmatprep.mubr.f32.mxu1 %v9475_v25  ;;  %6483 = vmatpush3.bf16.msra.mxu0 %v6482_v31 }
 0x5ca   : > { %v6322_v57 = vpop.f32.mrb[26].mxu0 }
 0x5cb   : > { %4483 = vst.msk [vmem:[%s8714_s23 + $0x10] sm:$0xff] %vm9539_vm2, %v6322_v57  ;;  %v3419_v29 = vpop.f32.mrb[27].mxu0  ;;  %vm9554_vm2 = vmmov %vm9511_vm0 }
 0x5cc   : > { %5846 = vmatmul.mubr.msk.f32.gmra.mrb[76].mxu1 %vm9540_vm4, %v3419_v29  ;;  %vm9555_vm4 = vmmov %vm9511_vm0 }
 0x5cd   : > { %4820 = vmatprep.mubr.f32.mxu1 %v9475_v25 }
 0x5ce   : > { %v6327_v2 = vpop.f32.mrb[58].mxu1 }
 0x5cf   : > { %4484 = vst.msk [vmem:[%s8714_s23 + $0x18] sm:$0xff] %vm9542_vm1, %v6327_v2  ;;  %v3500_v37 = vpop.f32.mrb[59].mxu1  ;;  %vm9556_vm1 = vmmov %vm9511_vm0 }
 0x5d0   : > { %5847 = vmatmul.mubr.msk.f32.gmra.mrb[78].mxu1 %vm9543_vm6, %v3500_v37  ;;  %vm9557_vm6 = vmmov %vm9511_vm0 }
 0x5d1   : > { %4826 = vmatprep.mubr.f32.mxu1 %v9475_v25 }
 0x5d2   : > { %v6332_v52 = vpop.f32.mrb[28].mxu0 }
 0x5d3   : > { %4485 = vst.msk [vmem:[%s8714_s23 + $0x20] sm:$0xff] %vm9544_vm7, %v6332_v52  ;;  %v3581_v45 = vpop.f32.mrb[29].mxu0  ;;  %vm9558_vm7 = vmmov %vm9511_vm0 }
 0x5d4   : > { %5848 = vmatmul.mubr.msk.f32.gmra.mrb[80].mxu1 %vm9545_vm8, %v3581_v45  ;;  %vm9559_vm8 = vmmov %vm9511_vm0 }
 0x5d5   : > { %4832 = vmatprep.mubr.f32.mxu1 %v9475_v25 }
 0x5d6   : > { %v6337_v34 = vpop.f32.mrb[60].mxu1 }
 0x5d7   : > { %4486 = vst.msk [vmem:[%s8714_s23 + $0x28] sm:$0xff] %vm9546_vm9, %v6337_v34  ;;  %v3662_v17 = vpop.f32.mrb[61].mxu1  ;;  %vm9560_vm9 = vmmov %vm9511_vm0 }
 0x5d8   : > { %5849 = vmatmul.mubr.msk.f32.gmra.mrb[82].mxu1 %vm9547_vm10, %v3662_v17  ;;  %vm9561_vm10 = vmmov %vm9511_vm0 }
 0x5d9   : > { %4838 = vmatprep.mubr.f32.mxu1 %v9475_v25 }
 0x5da   : > { %v6342_v44 = vpop.f32.mrb[30].mxu0 }
 0x5db   : > { %4487 = vst.msk [vmem:[%s8714_s23 + $0x30] sm:$0xff] %vm9548_vm11, %v6342_v44  ;;  %v3743_v53 = vpop.f32.mrb[31].mxu0  ;;  %vm9562_vm11 = vmmov %vm9511_vm0 }
 0x5dc   : > { %5850 = vmatmul.mubr.msk.f32.gmra.mrb[84].mxu1 %vm9549_vm12, %v3743_v53  ;;  %vm9563_vm12 = vmmov %vm9511_vm0 }
 0x5dd   : > { %4844 = vmatprep.mubr.f32.mxu1 %v9475_v25 }
 0x5de   : > { %v6347_v0 = vpop.f32.mrb[62].mxu1 }
 0x5df   : > { %4488 = vst.msk [vmem:[%s8714_s23 + $0x38] sm:$0xff] %vm9550_vm13, %v6347_v0  ;;  %v3824_v16 = vpop.f32.mrb[63].mxu1  ;;  %vm9564_vm13 = vmmov %vm9511_vm0 }
 0x5e0   : > { %5851 = vmatmul.mubr.msk.f32.gmra.mrb[86].mxu1 %vm9551_vm14, %v3824_v16  ;;  %vm9565_vm14 = vmmov %vm9511_vm0 }
 0x5e1   : > { %4850 = vmatprep.mubr.f32.mxu1 %v9475_v25 }
 0x5e2   : > { %v6352_v59 = vpop.f32.mrb[32].mxu0 }
 0x5e3   : > { %4489 = vst.msk [vmem:[%s8714_s23 + $0x40] sm:$0xff] %vm9552_vm15, %v6352_v59  ;;  %v3905_v13 = vpop.f32.mrb[33].mxu0  ;;  %vm9566_vm15 = vmmov %vm9511_vm0 }
 0x5e4   : > { %5852 = vmatmul.mubr.msk.f32.gmra.mrb[88].mxu1 %vm9511_vm0, %v3905_v13 }
 0x5e5   : > { %4856 = vmatprep.mubr.f32.mxu1 %v9475_v25 }
 0x5e6   : > { %v6357_v11 = vpop.f32.mrb[64].mxu1 }
 0x5e7   : > { %4490 = vst.msk [vmem:[%s8714_s23 + $0x48] sm:$0xff] %vm9553_vm3, %v6357_v11  ;;  %v3986_v57 = vpop.f32.mrb[65].mxu1 }
 0x5e8   : > { %5853 = vmatmul.mubr.msk.f32.gmra.mrb[90].mxu1 %vm9554_vm2, %v3986_v57 }
 0x5e9   : > { %4862 = vmatprep.mubr.f32.mxu1 %v9475_v25 }
 0x5ea   : > { %v6362_v29 = vpop.f32.mrb[34].mxu0 }
 0x5eb   : > { %4491 = vst.msk [vmem:[%s8714_s23 + $0x50] sm:$0xff] %vm9555_vm4, %v6362_v29  ;;  %v4067_v55 = vpop.f32.mrb[35].mxu0 }
 0x5ec   : > { %5854 = vmatmul.mubr.msk.f32.gmra.mrb[92].mxu1 %vm9556_vm1, %v4067_v55 }
 0x5ed   : > { %4868 = vmatprep.mubr.f32.mxu1 %v9475_v25 }
 0x5ee   : > { %v6367_v6 = vpop.f32.mrb[66].mxu1 }
 0x5ef   : > { %4492 = vst.msk [vmem:[%s8714_s23 + $0x58] sm:$0xff] %vm9557_vm6, %v6367_v6  ;;  %v4148_v10 = vpop.f32.mrb[67].mxu1 }
 0x5f0   : > { %5855 = vmatmul.mubr.msk.f32.gmra.mrb[94].mxu1 %vm9558_vm7, %v4148_v10 }
 0x5f1   : > { %4874 = vmatprep.mubr.f32.mxu1 %v9475_v25 }
 0x5f2   : > { %v6372_v5 = vpop.f32.mrb[36].mxu0 }
 0x5f3   : > { %4493 = vst.msk [vmem:[%s8714_s23 + $0x60] sm:$0xff] %vm9559_vm8, %v6372_v5  ;;  %v4229_v63 = vpop.f32.mrb[37].mxu0 }
 0x5f4   : > { %5856 = vmatmul.mubr.msk.f32.gmra.mrb[96].mxu1 %vm9560_vm9, %v4229_v63 }
 0x5f5   : > { %4880 = vmatprep.mubr.f32.mxu1 %v9475_v25 }
 0x5f6   : > { %v6377_v19 = vpop.f32.mrb[68].mxu1 }
 0x5f7   : > { %4494 = vst.msk [vmem:[%s8714_s23 + $0x68] sm:$0xff] %vm9561_vm10, %v6377_v19  ;;  %v4310_v27 = vpop.f32.mrb[69].mxu1 }
 0x5f8   : > { %5857 = vmatmul.mubr.msk.f32.gmra.mrb[98].mxu1 %vm9562_vm11, %v4310_v27 }
 0x5f9   : > { %4886 = vmatprep.mubr.f32.mxu1 %v9475_v25 }
 0x5fa   : > { %v6382_v2 = vpop.f32.mrb[38].mxu0  ;;  %v6387_v49 = vpop.f32.mrb[70].mxu1 }
 0x5fb   : > { %4495 = vst.msk [vmem:[%s8714_s23 + $0x70] sm:$0xff] %vm9563_vm12, %v6382_v2  ;;  %v4391_v39 = vpop.f32.mrb[39].mxu0  ;;  %v4472_v60 = vpop.f32.mrb[71].mxu1 }
 0x5fc   : > { %4496 = vst.msk [vmem:[%s8714_s23 + $0x78] sm:$0xff] %vm9564_vm13, %v6387_v49  ;;  %5858 = vmatmul.mubr.msk.f32.gmra.mrb[100].mxu1 %vm9565_vm14, %v4391_v39 }
 0x5fd   : > { %4892 = vmatprep.mubr.f32.mxu1 %v9475_v25 }
 0x600   : > { %5859 = vmatmul.mubr.msk.f32.gmra.mrb[102].mxu1 %vm9566_vm15, %v4472_v60 }
 0x60a   : > { %v4579_v35 = vpop.f32.mrb[40].mxu0 }
 0x60b   : > { %v4581_v8 = vpop.f32.mrb[41].mxu0 }
 0x60e   : > { %v4585_v37 = vpop.f32.mrb[42].mxu0 }
 0x60f   : > { %v4587_v50 = vpop.f32.mrb[43].mxu0 }
 0x612   : > { %v4591_v51 = vpop.f32.mrb[44].mxu0 }
 0x613   : > { %v4593_v7 = vpop.f32.mrb[45].mxu0 }
 0x616   : > { %v4597_v9 = vpop.f32.mrb[46].mxu0 }
 0x617   : > { %v4599_v32 = vpop.f32.mrb[47].mxu0 }
 0x61a   : > { %v4603_v52 = vpop.f32.mrb[48].mxu0 }
 0x61b   : > { %v4605_v12 = vpop.f32.mrb[49].mxu0 }
 0x61e   : > { %v4609_v58 = vpop.f32.mrb[50].mxu0 }
 0x61f   : > { %v4611_v45 = vpop.f32.mrb[51].mxu0 }
 0x622   : > { %v4615_v46 = vpop.f32.mrb[52].mxu0 }
 0x623   : > { %v4617_v30 = vpop.f32.mrb[53].mxu0 }
 0x626   : > { %v4621_v23 = vpop.f32.mrb[54].mxu0 }
 0x627   : > { %v4623_v56 = vpop.f32.mrb[55].mxu0 }
 0x62a   : > { %v8875_v34 = vpop.f32.mrb[56].mxu0 }
 0x62b   : > { %v8877_v25 = vpop.f32.mrb[57].mxu0 }
 0x62e   : > { %v8879_v20 = vpop.f32.mrb[58].mxu0 }
 0x62f   : > { %v8881_v21 = vpop.f32.mrb[59].mxu0 }
 0x632   : > { %v8883_v17 = vpop.f32.mrb[60].mxu0 }
 0x633   : > { %v8885_v47 = vpop.f32.mrb[61].mxu0 }
 0x636   : > { %v8887_v42 = vpop.f32.mrb[62].mxu0 }
 0x637   : > { %v8889_v62 = vpop.f32.mrb[63].mxu0 }
 0x63a   : > { %v8891_v15 = vpop.f32.mrb[64].mxu0 }
 0x63b   : > { %v8893_v44 = vpop.f32.mrb[65].mxu0 }
 0x63e   : > { %v8895_v4 = vpop.f32.mrb[66].mxu0 }
 0x63f   : > { %v8897_v38 = vpop.f32.mrb[67].mxu0 }
 0x642   : > { %v8899_v53 = vpop.f32.mrb[68].mxu0 }
 0x643   : > { %v8901_v43 = vpop.f32.mrb[69].mxu0 }
 0x646   : > { %v8903_v61 = vpop.f32.mrb[70].mxu0 }
 0x647   : > { %v8905_v26 = vpop.f32.mrb[71].mxu0 }
 0x697   : > { %v4804_v1 = vpop.f32.mrb[72].mxu1 }
 0x698   : > { %v4899_v3 = vmul.f32 %v4804_v1, %v4579_v35  ;;  %v4806_v36 = vpop.f32.mrb[73].mxu1 }
 0x699   : > { %v4900_v22 = vmul.f32 %v4806_v36, %v4581_v8 }
 0x69b   : > { %v4810_v54 = vpop.f32.mrb[74].mxu1  ;;  %5034 = vmatprep.mubr.f32.mxu0 %v4900_v22 }
 0x69c   : > { %v4901_v24 = vmul.f32 %v4810_v54, %v4585_v37  ;;  %v4812_v14 = vpop.f32.mrb[75].mxu1  ;;  %5035 = vmatmul.mubr.f32.vlgmr.msra.gmra.mrb[72].mxu0 %v4899_v3 }
 0x69d   : > { %v4902_v18 = vmul.f32 %v4812_v14, %v4587_v50 }
 0x69f   : > { %v4816_v48 = vpop.f32.mrb[76].mxu1  ;;  %5039 = vmatprep.mubr.f32.mxu0 %v4902_v18 }
 0x6a0   : > { %v4903_v0 = vmul.f32 %v4816_v48, %v4591_v51  ;;  %v4818_v16 = vpop.f32.mrb[77].mxu1  ;;  %5040 = vmatmul.mubr.f32.gmra.mrb[74].mxu0 %v4901_v24 }
 0x6a1   : > { %v4904_v40 = vmul.f32 %v4818_v16, %v4593_v7 }
 0x6a3   : > { %v4822_v41 = vpop.f32.mrb[78].mxu1  ;;  %5044 = vmatprep.mubr.f32.mxu0 %v4904_v40 }
 0x6a4   : > { %v4905_v33 = vmul.f32 %v4822_v41, %v4597_v9  ;;  %v4824_v28 = vpop.f32.mrb[79].mxu1  ;;  %5045 = vmatmul.mubr.f32.gmra.mrb[76].mxu0 %v4903_v0 }
 0x6a5   : > { %v4906_v59 = vmul.f32 %v4824_v28, %v4599_v32 }
 0x6a7   : > { %v4828_v13 = vpop.f32.mrb[80].mxu1  ;;  %5049 = vmatprep.mubr.f32.mxu0 %v4906_v59 }
 0x6a8   : > { %v4907_v31 = vmul.f32 %v4828_v13, %v4603_v52  ;;  %v4830_v11 = vpop.f32.mrb[81].mxu1  ;;  %5050 = vmatmul.mubr.f32.gmra.mrb[78].mxu0 %v4905_v33 }
 0x6a9   : > { %v4908_v57 = vmul.f32 %v4830_v11, %v4605_v12 }
 0x6ab   : > { %v4834_v29 = vpop.f32.mrb[82].mxu1  ;;  %5054 = vmatprep.mubr.f32.mxu0 %v4908_v57 }
 0x6ac   : > { %v4909_v55 = vmul.f32 %v4834_v29, %v4609_v58  ;;  %v4836_v6 = vpop.f32.mrb[83].mxu1  ;;  %5055 = vmatmul.mubr.f32.gmra.mrb[80].mxu0 %v4907_v31 }
 0x6ad   : > { %v4910_v10 = vmul.f32 %v4836_v6, %v4611_v45 }
 0x6af   : > { %v4840_v5 = vpop.f32.mrb[84].mxu1  ;;  %5059 = vmatprep.mubr.f32.mxu0 %v4910_v10 }
 0x6b0   : > { %v4911_v63 = vmul.f32 %v4840_v5, %v4615_v46  ;;  %v4842_v19 = vpop.f32.mrb[85].mxu1  ;;  %5060 = vmatmul.mubr.f32.gmra.mrb[82].mxu0 %v4909_v55 }
 0x6b1   : > { %v4912_v27 = vmul.f32 %v4842_v19, %v4617_v30 }
 0x6b3   : > { %5064 = vmatprep.mubr.f32.mxu0 %v4912_v27  ;;  %v4846_v2 = vpop.f32.mrb[86].mxu1 }
 0x6b4   : > { %5065 = vmatmul.mubr.f32.gmra.mrb[84].mxu0 %v4911_v63  ;;  %v4913_v49 = vmul.f32 %v4846_v2, %v4621_v23  ;;  %v4848_v39 = vpop.f32.mrb[87].mxu1 }
 0x6b5   : > { %v4914_v60 = vmul.f32 %v4848_v39, %v4623_v56 }
 0x6b7   : > { %v4852_v35 = vpop.f32.mrb[88].mxu1  ;;  %5069 = vmatprep.mubr.f32.mxu0 %v4914_v60 }
 0x6b8   : > { %v4915_v8 = vmul.f32 %v4852_v35, %v8875_v34  ;;  %v4854_v37 = vpop.f32.mrb[89].mxu1  ;;  %5070 = vmatmul.mubr.f32.gmra.mrb[86].mxu0 %v4913_v49 }
 0x6b9   : > { %v4916_v50 = vmul.f32 %v4854_v37, %v8877_v25 }
 0x6bb   : > { %v4858_v51 = vpop.f32.mrb[90].mxu1  ;;  %5074 = vmatprep.mubr.f32.mxu0 %v4916_v50 }
 0x6bc   : > { %v4917_v7 = vmul.f32 %v4858_v51, %v8879_v20  ;;  %v4860_v9 = vpop.f32.mrb[91].mxu1  ;;  %5075 = vmatmul.mubr.f32.gmra.mrb[88].mxu0 %v4915_v8 }
 0x6bd   : > { %v4918_v32 = vmul.f32 %v4860_v9, %v8881_v21 }
 0x6bf   : > { %v4864_v52 = vpop.f32.mrb[92].mxu1  ;;  %5079 = vmatprep.mubr.f32.mxu0 %v4918_v32 }
 0x6c0   : > { %v4919_v12 = vmul.f32 %v4864_v52, %v8883_v17  ;;  %v4866_v58 = vpop.f32.mrb[93].mxu1  ;;  %5080 = vmatmul.mubr.f32.gmra.mrb[90].mxu0 %v4917_v7 }
 0x6c1   : > { %v4920_v45 = vmul.f32 %v4866_v58, %v8885_v47 }
 0x6c3   : > { %v4870_v46 = vpop.f32.mrb[94].mxu1  ;;  %5084 = vmatprep.mubr.f32.mxu0 %v4920_v45 }
 0x6c4   : > { %v4921_v30 = vmul.f32 %v4870_v46, %v8887_v42  ;;  %v4872_v23 = vpop.f32.mrb[95].mxu1  ;;  %5085 = vmatmul.mubr.f32.gmra.mrb[92].mxu0 %v4919_v12 }
 0x6c5   : > { %v4922_v56 = vmul.f32 %v4872_v23, %v8889_v62 }
 0x6c7   : > { %v4876_v34 = vpop.f32.mrb[96].mxu1  ;;  %5089 = vmatprep.mubr.f32.mxu0 %v4922_v56 }
 0x6c8   : > { %v4923_v25 = vmul.f32 %v4876_v34, %v8891_v15  ;;  %v4878_v20 = vpop.f32.mrb[97].mxu1  ;;  %5090 = vmatmul.mubr.f32.gmra.mrb[94].mxu0 %v4921_v30 }
 0x6c9   : > { %v4924_v21 = vmul.f32 %v4878_v20, %v8893_v44 }
 0x6cb   : > { %v4882_v17 = vpop.f32.mrb[98].mxu1  ;;  %5094 = vmatprep.mubr.f32.mxu0 %v4924_v21 }
 0x6cc   : > { %v4925_v47 = vmul.f32 %v4882_v17, %v8895_v4  ;;  %v4884_v1 = vpop.f32.mrb[99].mxu1  ;;  %5095 = vmatmul.mubr.f32.gmra.mrb[96].mxu0 %v4923_v25 }
 0x6cd   : > { %v4926_v42 = vmul.f32 %v4884_v1, %v8897_v38 }
 0x6cf   : > { %v4888_v3 = vpop.f32.mrb[100].mxu1  ;;  %5099 = vmatprep.mubr.f32.mxu0 %v4926_v42 }
 0x6d0   : > { %v4927_v62 = vmul.f32 %v4888_v3, %v8899_v53  ;;  %v4890_v36 = vpop.f32.mrb[101].mxu1  ;;  %5100 = vmatmul.mubr.f32.gmra.mrb[98].mxu0 %v4925_v47  ;;  %v8926_v53 = vld [vmem:[%s9567_s11] ss:$0 sm:$0xff] }
 0x6d1   : > { %v4928_v15 = vmul.f32 %v4890_v36, %v8901_v43 }
 0x6d3   : > { %v4894_v22 = vpop.f32.mrb[102].mxu1  ;;  %5104 = vmatprep.mubr.f32.mxu0 %v4928_v15 }
 0x6d4   : > { %v4929_v44 = vmul.f32 %v4894_v22, %v8903_v61  ;;  %v4896_v54 = vpop.f32.mrb[103].mxu1  ;;  %5105 = vmatmul.mubr.f32.gmra.mrb[100].mxu0 %v4927_v62 }
 0x6d5   : > { %v4930_v4 = vmul.f32 %v4896_v54, %v8905_v26 }
 0x6d7   : > { %5109 = vmatprep.mubr.f32.mxu0 %v4930_v4 }
 0x6d8   : > { %5110 = vmatmul.mubr.f32.gmra.mrb[102].mxu0 %v4929_v44 }
 0x76f   : > { %v6076_v24 = vpop.f32.mrb[72].mxu0 }
 0x770   : > { %v6077_v38 = vpop.f32.mrb[73].mxu0 }
 0x771   : > { %v6078_v14 = vadd.f32 %v6077_v38, %v6076_v24 }
 0x773   : > { %v6079_v18 = vpop.f32.mrb[74].mxu0  ;;  %v8929_v43 = vadd.f32 %v6078_v14, %v8926_v53 }
 0x774   : > { %v6080_v48 = vpop.f32.mrb[75].mxu0 }
 0x775   : > { %v6081_v61 = vadd.f32 %v6080_v48, %v6079_v18  ;;  %v5115_v0 = vsel %vm2688_vm5, %v8929_v43, -inf }
 0x776   : > { %5116 = vmax.xlane.f32.xlu0 %v5115_v0 }
 0x777   : > { %v6082_v26 = vpop.f32.mrb[76].mxu0  ;;  %v8934_v16 = vadd.f32 %v6081_v61, %v8926_v53 }
 0x778   : > { %v6083_v40 = vpop.f32.mrb[77].mxu0 }
 0x779   : > { %v6084_v41 = vadd.f32 %v6083_v40, %v6082_v26  ;;  %v5118_v33 = vsel %vm2688_vm5, %v8934_v16, -inf }
 0x77a   : > { %5119 = vmax.xlane.f32.xlu1 %v5118_v33 }
 0x77b   : > { %v6085_v28 = vpop.f32.mrb[78].mxu0  ;;  %v8939_v59 = vadd.f32 %v6084_v41, %v8926_v53 }
 0x77c   : > { %v6086_v13 = vpop.f32.mrb[79].mxu0 }
 0x77d   : > { %v6087_v31 = vadd.f32 %v6086_v13, %v6085_v28  ;;  %v5121_v11 = vsel %vm2688_vm5, %v8939_v59, -inf }
 0x77e   : > { %5122 = vmax.xlane.f32.xlu0 %v5121_v11 }
 0x77f   : > { %v6088_v57 = vpop.f32.mrb[80].mxu0  ;;  %v8944_v29 = vadd.f32 %v6087_v31, %v8926_v53 }
 0x780   : > { %v6089_v55 = vpop.f32.mrb[81].mxu0 }
 0x781   : > { %v6090_v6 = vadd.f32 %v6089_v55, %v6088_v57  ;;  %v5124_v10 = vsel %vm2688_vm5, %v8944_v29, -inf }
 0x782   : > { %5125 = vmax.xlane.f32.xlu1 %v5124_v10 }
 0x783   : > { %v6091_v5 = vpop.f32.mrb[82].mxu0  ;;  %v8949_v63 = vadd.f32 %v6090_v6, %v8926_v53 }
 0x784   : > { %v6092_v19 = vpop.f32.mrb[83].mxu0 }
 0x785   : > { %v6093_v27 = vadd.f32 %v6092_v19, %v6091_v5  ;;  %v5127_v2 = vsel %vm2688_vm5, %v8949_v63, -inf }
 0x786   : > { %5128 = vmax.xlane.f32.xlu0 %v5127_v2 }
 0x787   : > { %v6094_v49 = vpop.f32.mrb[84].mxu0  ;;  %v8954_v39 = vadd.f32 %v6093_v27, %v8926_v53 }
 0x788   : > { %v6095_v60 = vpop.f32.mrb[85].mxu0 }
 0x789   : > { %v6096_v35 = vadd.f32 %v6095_v60, %v6094_v49  ;;  %v5130_v8 = vsel %vm2688_vm5, %v8954_v39, -inf }
 0x78a   : > { %5131 = vmax.xlane.f32.xlu1 %v5130_v8 }
 0x78b   : > { %v8959_v37 = vadd.f32 %v6096_v35, %v8926_v53  ;;  %v6097_v51 = vpop.f32.mrb[86].mxu0 }
 0x78c   : > { %v6098_v7 = vpop.f32.mrb[87].mxu0 }
 0x78d   : > { %v5133_v50 = vsel %vm2688_vm5, %v8959_v37, -inf  ;;  %v6099_v9 = vadd.f32 %v6098_v7, %v6097_v51 }
 0x78e   : > { %5134 = vmax.xlane.f32.xlu0 %v5133_v50 }
 0x78f   : > { %v6100_v32 = vpop.f32.mrb[88].mxu0  ;;  %v8964_v52 = vadd.f32 %v6099_v9, %v8926_v53 }
 0x790   : > { %v6101_v12 = vpop.f32.mrb[89].mxu0 }
 0x791   : > { %v6102_v58 = vadd.f32 %v6101_v12, %v6100_v32  ;;  %v5136_v45 = vsel %vm2688_vm5, %v8964_v52, -inf }
 0x792   : > { %5137 = vmax.xlane.f32.xlu1 %v5136_v45 }
 0x793   : > { %v6103_v46 = vpop.f32.mrb[90].mxu0  ;;  %v8969_v30 = vadd.f32 %v6102_v58, %v8926_v53 }
 0x794   : > { %v6104_v23 = vpop.f32.mrb[91].mxu0 }
 0x795   : > { %v6105_v56 = vadd.f32 %v6104_v23, %v6103_v46  ;;  %v5139_v34 = vsel %vm2688_vm5, %v8969_v30, -inf }
 0x796   : > { %5140 = vmax.xlane.f32.xlu0 %v5139_v34 }
 0x797   : > { %v6106_v25 = vpop.f32.mrb[92].mxu0  ;;  %v8974_v20 = vadd.f32 %v6105_v56, %v8926_v53 }
 0x798   : > { %v6107_v21 = vpop.f32.mrb[93].mxu0 }
 0x799   : > { %v6108_v17 = vadd.f32 %v6107_v21, %v6106_v25  ;;  %v5142_v47 = vsel %vm2688_vm5, %v8974_v20, -inf }
 0x79a   : > { %5143 = vmax.xlane.f32.xlu1 %v5142_v47 }
 0x79b   : > { %v6109_v1 = vpop.f32.mrb[94].mxu0  ;;  %v8979_v42 = vadd.f32 %v6108_v17, %v8926_v53 }
 0x79c   : > { %v6110_v3 = vpop.f32.mrb[95].mxu0 }
 0x79d   : > { %v6111_v62 = vadd.f32 %v6110_v3, %v6109_v1  ;;  %v5145_v36 = vsel %vm2688_vm5, %v8979_v42, -inf }
 0x79e   : > { %5146 = vmax.xlane.f32.xlu0 %v5145_v36 }
 0x79f   : > { %v6112_v15 = vpop.f32.mrb[96].mxu0  ;;  %v8984_v22 = vadd.f32 %v6111_v62, %v8926_v53 }
 0x7a0   : > { %v6113_v44 = vpop.f32.mrb[97].mxu0 }
 0x7a1   : > { %v6114_v54 = vadd.f32 %v6113_v44, %v6112_v15  ;;  %v5148_v4 = vsel %vm2688_vm5, %v8984_v22, -inf }
 0x7a2   : > { %5149 = vmax.xlane.f32.xlu1 %v5148_v4 }
 0x7a3   : > { %v6115_v24 = vpop.f32.mrb[98].mxu0  ;;  %v8989_v38 = vadd.f32 %v6114_v54, %v8926_v53 }
 0x7a4   : > { %v6116_v14 = vpop.f32.mrb[99].mxu0 }
 0x7a5   : > { %v6117_v18 = vadd.f32 %v6116_v14, %v6115_v24  ;;  %v5151_v48 = vsel %vm2688_vm5, %v8989_v38, -inf }
 0x7a6   : > { %5152 = vmax.xlane.f32.xlu0 %v5151_v48 }
 0x7a7   : > { %v6118_v61 = vpop.f32.mrb[100].mxu0  ;;  %v8994_v0 = vadd.f32 %v6117_v18, %v8926_v53 }
 0x7a8   : > { %v6119_v26 = vpop.f32.mrb[101].mxu0 }
 0x7a9   : > { %v6120_v40 = vadd.f32 %v6119_v26, %v6118_v61  ;;  %v5154_v41 = vsel %vm2688_vm5, %v8994_v0, -inf }
 0x7aa   : > { %5155 = vmax.xlane.f32.xlu1 %v5154_v41 }
 0x7ab   : > { %v6121_v33 = vpop.f32.mrb[102].mxu0  ;;  %v8999_v28 = vadd.f32 %v6120_v40, %v8926_v53 }
 0x7ac   : > { %v6122_v13 = vpop.f32.mrb[103].mxu0 }
 0x7ad   : > { %v6123_v31 = vadd.f32 %v6122_v13, %v6121_v33  ;;  %v5157_v11 = vsel %vm2688_vm5, %v8999_v28, -inf }
 0x7ae   : > { %5158 = vmax.xlane.f32.xlu0 %v5157_v11 }
 0x7af   : > { %v9004_v57 = vadd.f32 %v6123_v31, %v8926_v53 }
 0x7b1   : > { %v5160_v55 = vsel %vm2688_vm5, %v9004_v57, -inf }
 0x7b2   : > { %5161 = vmax.xlane.f32.xlu1 %v5160_v55 }
 0x803   : > { %v5117_v6 = vpop.xlane.xlu0 %5116 }
 0x804   : > { %v9009_v10 = vsub.f32 %v8929_v43, %v5117_v6 }
 0x806   : > { %v5179_v5 = vmul.f32 1.442695, %v9009_v10 }
 0x807   : > { %v5120_v19 = vpop.xlane.xlu1 %5119 }
 0x808   : > { %6737 = vpow2.f32 %v5179_v5  ;;  %v9013_v27 = vsub.f32 %v8934_v16, %v5120_v19 }
 0x80a   : > { %v5181_v2 = vmul.f32 1.442695, %v9013_v27 }
 0x80b   : > { %v5123_v49 = vpop.xlane.xlu0 %5122 }
 0x80c   : > { %6739 = vpow2.f32 %v5181_v2  ;;  %v9017_v53 = vsub.f32 %v8939_v59, %v5123_v49 }
 0x80e   : > { %v5183_v60 = vmul.f32 1.442695, %v9017_v53 }
 0x80f   : > { %v5126_v35 = vpop.xlane.xlu1 %5125 }
 0x810   : > { %6741 = vpow2.f32 %v5183_v60  ;;  %v9021_v43 = vsub.f32 %v8944_v29, %v5126_v35 }
 0x812   : > { %v6738_v8 = vpop.eup %6737  ;;  %v5185_v50 = vmul.f32 1.442695, %v9021_v43 }
 0x813   : > { %v5129_v51 = vpop.xlane.xlu0 %5128  ;;  %v5211_v16 = vsel %vm2688_vm5, %v6738_v8, 0.0 }
 0x814   : > { %6743 = vpow2.f32 %v5185_v50  ;;  %v9026_v7 = vsub.f32 %v8949_v63, %v5129_v51  ;;  %5212 = vadd.xlane.f32.xlu0 %v5211_v16 }
 0x816   : > { %v6740_v59 = vpop.eup %6739  ;;  %v5187_v9 = vmul.f32 1.442695, %v9026_v7 }
 0x817   : > { %v5132_v32 = vpop.xlane.xlu1 %5131  ;;  %v5214_v12 = vsel %vm2688_vm5, %v6740_v59, 0.0 }
 0x818   : > { %6745 = vpow2.f32 %v5187_v9  ;;  %v9031_v29 = vsub.f32 %v8954_v39, %v5132_v32  ;;  %5215 = vadd.xlane.f32.xlu1 %v5214_v12 }
 0x81a   : > { %v6742_v58 = vpop.eup %6741  ;;  %v5189_v45 = vmul.f32 1.442695, %v9031_v29 }
 0x81b   : > { %v5135_v46 = vpop.xlane.xlu0 %5134  ;;  %v5217_v23 = vsel %vm2688_vm5, %v6742_v58, 0.0 }
 0x81c   : > { %6747 = vpow2.f32 %v5189_v45  ;;  %v9036_v63 = vsub.f32 %v8959_v37, %v5135_v46  ;;  %5218 = vadd.xlane.f32.xlu0 %v5217_v23 }
 0x81e   : > { %v6744_v56 = vpop.eup %6743  ;;  %v5191_v34 = vmul.f32 1.442695, %v9036_v63 }
 0x81f   : > { %v5220_v25 = vsel %vm2688_vm5, %v6744_v56, 0.0  ;;  %v5138_v17 = vpop.xlane.xlu1 %5137 }
 0x820   : > { %6749 = vpow2.f32 %v5191_v34  ;;  %5221 = vadd.xlane.f32.xlu1 %v5220_v25  ;;  %v9042_v47 = vsub.f32 %v8964_v52, %v5138_v17 }
 0x822   : > { %v6746_v39 = vpop.eup %6745  ;;  %v5193_v37 = vmul.f32 1.442695, %v9042_v47 }
 0x823   : > { %v5223_v21 = vsel %vm2688_vm5, %v6746_v39, 0.0  ;;  %v5141_v62 = vpop.xlane.xlu0 %5140 }
 0x824   : > { %5224 = vadd.xlane.f32.xlu0 %v5223_v21  ;;  %6751 = vpow2.f32 %v5193_v37  ;;  %v9047_v36 = vsub.f32 %v8969_v30, %v5141_v62 }
 0x826   : > { %v6748_v1 = vpop.eup %6747  ;;  %v5195_v44 = vmul.f32 1.442695, %v9047_v36 }
 0x827   : > { %v5226_v3 = vsel %vm2688_vm5, %v6748_v1, 0.0  ;;  %v5144_v4 = vpop.xlane.xlu1 %5143 }
 0x828   : > { %5227 = vadd.xlane.f32.xlu1 %v5226_v3  ;;  %6753 = vpow2.f32 %v5195_v44  ;;  %v9052_v52 = vsub.f32 %v8974_v20, %v5144_v4 }
 0x82a   : > { %v6750_v15 = vpop.eup %6749  ;;  %v5197_v24 = vmul.f32 1.442695, %v9052_v52 }
 0x82b   : > { %v5229_v54 = vsel %vm2688_vm5, %v6750_v15, 0.0  ;;  %v5147_v14 = vpop.xlane.xlu0 %5146 }
 0x82c   : > { %5230 = vadd.xlane.f32.xlu0 %v5229_v54  ;;  %6755 = vpow2.f32 %v5197_v24  ;;  %v9056_v18 = vsub.f32 %v8979_v42, %v5147_v14 }
 0x82e   : > { %v6752_v30 = vpop.eup %6751  ;;  %v5199_v48 = vmul.f32 1.442695, %v9056_v18 }
 0x82f   : > { %v5150_v61 = vpop.xlane.xlu1 %5149  ;;  %v5232_v26 = vsel %vm2688_vm5, %v6752_v30, 0.0 }
 0x830   : > { %6757 = vpow2.f32 %v5199_v48  ;;  %v9061_v40 = vsub.f32 %v8984_v22, %v5150_v61  ;;  %5233 = vadd.xlane.f32.xlu1 %v5232_v26 }
 0x832   : > { %v6754_v20 = vpop.eup %6753  ;;  %v5201_v41 = vmul.f32 1.442695, %v9061_v40 }
 0x833   : > { %v5153_v33 = vpop.xlane.xlu0 %5152  ;;  %v5235_v13 = vsel %vm2688_vm5, %v6754_v20, 0.0 }
 0x834   : > { %6759 = vpow2.f32 %v5201_v41  ;;  %v9066_v42 = vsub.f32 %v8989_v38, %v5153_v33  ;;  %5236 = vadd.xlane.f32.xlu0 %v5235_v13 }
 0x836   : > { %v6756_v31 = vpop.eup %6755  ;;  %v5203_v11 = vmul.f32 1.442695, %v9066_v42 }
 0x837   : > { %v5156_v55 = vpop.xlane.xlu1 %5155  ;;  %v5238_v6 = vsel %vm2688_vm5, %v6756_v31, 0.0 }
 0x838   : > { %6761 = vpow2.f32 %v5203_v11  ;;  %v9071_v22 = vsub.f32 %v8994_v0, %v5156_v55  ;;  %5239 = vadd.xlane.f32.xlu1 %v5238_v6 }
 0x83a   : > { %v6758_v5 = vpop.eup %6757  ;;  %v5205_v19 = vmul.f32 1.442695, %v9071_v22 }
 0x83b   : > { %v5159_v2 = vpop.xlane.xlu0 %5158  ;;  %v5241_v49 = vsel %vm2688_vm5, %v6758_v5, 0.0 }
 0x83c   : > { %6763 = vpow2.f32 %v5205_v19  ;;  %v9076_v38 = vsub.f32 %v8999_v28, %v5159_v2  ;;  %5242 = vadd.xlane.f32.xlu0 %v5241_v49 }
 0x83e   : > { %v6760_v60 = vpop.eup %6759  ;;  %v5207_v35 = vmul.f32 1.442695, %v9076_v38 }
 0x83f   : > { %v5162_v8 = vpop.xlane.xlu1 %5161  ;;  %v5244_v50 = vsel %vm2688_vm5, %v6760_v60, 0.0 }
 0x840   : > { %6765 = vpow2.f32 %v5207_v35  ;;  %v9081_v0 = vsub.f32 %v9004_v57, %v5162_v8  ;;  %5245 = vadd.xlane.f32.xlu1 %v5244_v50 }
 0x842   : > { %v6762_v51 = vpop.eup %6761  ;;  %v5209_v16 = vmul.f32 1.442695, %v9081_v0 }
 0x843   : > { %v5247_v28 = vsel %vm2688_vm5, %v6762_v51, 0.0 }
 0x844   : > { %6767 = vpow2.f32 %v5209_v16  ;;  %5248 = vadd.xlane.f32.xlu0 %v5247_v28 }
 0x846   : > { %v6764_v59 = vpop.eup %6763 }
 0x847   : > { %v5250_v9 = vsel %vm2688_vm5, %v6764_v59, 0.0 }
 0x848   : > { %5251 = vadd.xlane.f32.xlu1 %v5250_v9 }
 0x84a   : > { %v6766_v32 = vpop.eup %6765 }
 0x84b   : > { %v5253_v57 = vsel %vm2688_vm5, %v6766_v32, 0.0 }
 0x84c   : > { %5254 = vadd.xlane.f32.xlu0 %v5253_v57 }
 0x84e   : > { %v6768_v12 = vpop.eup %6767 }
 0x84f   : > { %v5256_v58 = vsel %vm2688_vm5, %v6768_v12, 0.0 }
 0x850   : > { %5257 = vadd.xlane.f32.xlu1 %v5256_v58 }
 0x851   : > { %6928 = shalt.err (!%p6925_p9)
}
 0x852   : > { %s6929_s23 = scalar_lea.hbm %s9092_s25, 2048  ;;  %s6933_s18 = scalar_lea.hbm %s9568_s12, 4096 }
 0x853   : > { %p6930_p0 = scmp.ne.s32.totalorder %s9092_s25, %s6929_s23  ;;  %p6934_p13 = scmp.lt.u32.totalorder %s9092_s25, %s9568_s12 }
 0x854   : > { %p6935_p6 = scmp.lt.u32.totalorder %s6933_s18, %s6929_s23  ;;  %p6937_p3 = scmp.lt.u32.totalorder %s6929_s23, %s9092_s25 }
 0x855   : > { %p6931_p11 = pnand %p6930_p0, %p7225_p5 }
 0x856   : > { %p6936_p10 = por %p6935_p6, %p6934_p13 }
 0x857   : > { %p6932_p8 = pneg %p6931_p11 }
 0x858   : > { %p6938_p7 = por %p6937_p3, %p6936_p10 }
 0x85a   : > { %p6939_p12 = pnand %p6938_p7, %p6932_p8 }
 0x85c   : > { %6942 = shalt.err (!%p6939_p12)
}
 0x85d   : > { %s7003_s27 = smov 128   ;;  %s7004_s14 = smov 8  }
 0x85e   : > { %6505 = dma.vmem_to_hbm [thread:$0]  (%p7225_p5), %s9095_s5, 2048, %s9092_s25, %s5436_s20, %s7003_s27, %s7003_s27, %s7004_s14  }
 0x85f   : > { %s9569_s23 = sld [smem:[#allocation95_spill]] }
 0x865   : > { %s9125_s26 = scalar_lea.vmem %s9569_s23, %s7300_s19 }
 0x8a1   : > { %v5213_v45 = vpop.xlane.xlu0 %5212 }
 0x8a2   : > { %6769 = vlog2.f32 %v5213_v45 }
 0x8a5   : > { %v5216_v46 = vpop.xlane.xlu1 %5215 }
 0x8a6   : > { %6771 = vlog2.f32 %v5216_v46 }
 0x8a9   : > { %v5219_v23 = vpop.xlane.xlu0 %5218 }
 0x8aa   : > { %6773 = vlog2.f32 %v5219_v23 }
 0x8ac   : > { %v6770_v56 = vpop.eup %6769 }
 0x8ad   : > { %v5260_v34 = vmul.f32 0.6931472, %v6770_v56  ;;  %v5222_v25 = vpop.xlane.xlu1 %5221 }
 0x8ae   : > { %6775 = vlog2.f32 %v5222_v25 }
 0x8af   : > { %v5291_v39 = vsub.f32 %v9009_v10, %v5260_v34 }
 0x8b0   : > { %v6772_v21 = vpop.eup %6771 }
 0x8b1   : > { %5307 = vst.msk [vmem:[%s9125_s26] sm:$0xff] %vm2688_vm5, %v5291_v39  ;;  %v5262_v17 = vmul.f32 0.6931472, %v6772_v21  ;;  %v5225_v1 = vpop.xlane.xlu0 %5224 }
 0x8b2   : > { %6777 = vlog2.f32 %v5225_v1 }
 0x8b3   : > { %v5292_v37 = vsub.f32 %v9013_v27, %v5262_v17 }
 0x8b4   : > { %v6774_v3 = vpop.eup %6773 }
 0x8b5   : > { %5308 = vst.msk [vmem:[%s9125_s26 + $0x8] sm:$0xff] %vm2688_vm5, %v5292_v37  ;;  %v5264_v62 = vmul.f32 0.6931472, %v6774_v3  ;;  %v5228_v15 = vpop.xlane.xlu1 %5227 }
 0x8b6   : > { %6779 = vlog2.f32 %v5228_v15 }
 0x8b7   : > { %v5293_v44 = vsub.f32 %v9017_v53, %v5264_v62 }
 0x8b8   : > { %v6776_v54 = vpop.eup %6775 }
 0x8b9   : > { %5309 = vst.msk [vmem:[%s9125_s26 + $0x10] sm:$0xff] %vm2688_vm5, %v5293_v44  ;;  %v5266_v10 = vmul.f32 0.6931472, %v6776_v54  ;;  %v5231_v4 = vpop.xlane.xlu0 %5230 }
 0x8ba   : > { %6781 = vlog2.f32 %v5231_v4 }
 0x8bb   : > { %v5294_v24 = vsub.f32 %v9021_v43, %v5266_v10 }
 0x8bc   : > { %v6778_v14 = vpop.eup %6777 }
 0x8bd   : > { %5310 = vst.msk [vmem:[%s9125_s26 + $0x18] sm:$0xff] %vm2688_vm5, %v5294_v24  ;;  %v5268_v27 = vmul.f32 0.6931472, %v6778_v14  ;;  %v5234_v61 = vpop.xlane.xlu1 %5233 }
 0x8be   : > { %6783 = vlog2.f32 %v5234_v61 }
 0x8bf   : > { %v5295_v30 = vsub.f32 %v9026_v7, %v5268_v27 }
 0x8c0   : > { %v6780_v48 = vpop.eup %6779 }
 0x8c1   : > { %5311 = vst.msk [vmem:[%s9125_s26 + $0x20] sm:$0xff] %vm2688_vm5, %v5295_v30  ;;  %v5270_v53 = vmul.f32 0.6931472, %v6780_v48  ;;  %v5237_v41 = vpop.xlane.xlu0 %5236 }
 0x8c2   : > { %6785 = vlog2.f32 %v5237_v41 }
 0x8c3   : > { %v5296_v26 = vsub.f32 %v9031_v29, %v5270_v53 }
 0x8c4   : > { %v6782_v20 = vpop.eup %6781 }
 0x8c5   : > { %5312 = vst.msk [vmem:[%s9125_s26 + $0x28] sm:$0xff] %vm2688_vm5, %v5296_v26  ;;  %v5272_v43 = vmul.f32 0.6931472, %v6782_v20  ;;  %v5240_v7 = vpop.xlane.xlu1 %5239 }
 0x8c6   : > { %6787 = vlog2.f32 %v5240_v7 }
 0x8c7   : > { %v5297_v33 = vsub.f32 %v9036_v63, %v5272_v43 }
 0x8c8   : > { %v6784_v13 = vpop.eup %6783 }
 0x8c9   : > { %5313 = vst.msk [vmem:[%s9125_s26 + $0x30] sm:$0xff] %vm2688_vm5, %v5297_v33  ;;  %v5274_v31 = vmul.f32 0.6931472, %v6784_v13  ;;  %v5243_v11 = vpop.xlane.xlu0 %5242 }
 0x8ca   : > { %6789 = vlog2.f32 %v5243_v11 }
 0x8cb   : > { %v5298_v29 = vsub.f32 %v9042_v47, %v5274_v31 }
 0x8cc   : > { %v6786_v55 = vpop.eup %6785 }
 0x8cd   : > { %5314 = vst.msk [vmem:[%s9125_s26 + $0x38] sm:$0xff] %vm2688_vm5, %v5298_v29  ;;  %v5276_v6 = vmul.f32 0.6931472, %v6786_v55  ;;  %v5246_v5 = vpop.xlane.xlu1 %5245 }
 0x8ce   : > { %6791 = vlog2.f32 %v5246_v5 }
 0x8cf   : > { %v5299_v63 = vsub.f32 %v9047_v36, %v5276_v6 }
 0x8d0   : > { %v6788_v19 = vpop.eup %6787 }
 0x8d1   : > { %5315 = vst.msk [vmem:[%s9125_s26 + $0x40] sm:$0xff] %vm2688_vm5, %v5299_v63  ;;  %v5278_v2 = vmul.f32 0.6931472, %v6788_v19  ;;  %v5249_v49 = vpop.xlane.xlu0 %5248 }
 0x8d2   : > { %6793 = vlog2.f32 %v5249_v49 }
 0x8d3   : > { %v5300_v60 = vsub.f32 %v9052_v52, %v5278_v2 }
 0x8d4   : > { %v6790_v35 = vpop.eup %6789 }
 0x8d5   : > { %5316 = vst.msk [vmem:[%s9125_s26 + $0x48] sm:$0xff] %vm2688_vm5, %v5300_v60  ;;  %v5280_v47 = vmul.f32 0.6931472, %v6790_v35  ;;  %v5252_v8 = vpop.xlane.xlu1 %5251 }
 0x8d6   : > { %6795 = vlog2.f32 %v5252_v8 }
 0x8d7   : > { %v5301_v50 = vsub.f32 %v9056_v18, %v5280_v47 }
 0x8d8   : > { %v6792_v51 = vpop.eup %6791 }
 0x8d9   : > { %5317 = vst.msk [vmem:[%s9125_s26 + $0x50] sm:$0xff] %vm2688_vm5, %v5301_v50  ;;  %v5282_v36 = vmul.f32 0.6931472, %v6792_v51  ;;  %v5255_v16 = vpop.xlane.xlu0 %5254 }
 0x8da   : > { %6797 = vlog2.f32 %v5255_v16 }
 0x8db   : > { %v5302_v28 = vsub.f32 %v9061_v40, %v5282_v36 }
 0x8dc   : > { %v6794_v52 = vpop.eup %6793 }
 0x8dd   : > { %5318 = vst.msk [vmem:[%s9125_s26 + $0x58] sm:$0xff] %vm2688_vm5, %v5302_v28  ;;  %v5284_v59 = vmul.f32 0.6931472, %v6794_v52  ;;  %v5258_v9 = vpop.xlane.xlu1 %5257 }
 0x8de   : > { %6799 = vlog2.f32 %v5258_v9 }
 0x8df   : > { %v5303_v32 = vsub.f32 %v9066_v42, %v5284_v59 }
 0x8e0   : > { %v6796_v18 = vpop.eup %6795 }
 0x8e1   : > { %5319 = vst.msk [vmem:[%s9125_s26 + $0x60] sm:$0xff] %vm2688_vm5, %v5303_v32  ;;  %v5286_v57 = vmul.f32 0.6931472, %v6796_v18 }
 0x8e3   : > { %v5304_v12 = vsub.f32 %v9071_v22, %v5286_v57 }
 0x8e4   : > { %v6798_v58 = vpop.eup %6797 }
 0x8e5   : > { %5320 = vst.msk [vmem:[%s9125_s26 + $0x68] sm:$0xff] %vm2688_vm5, %v5304_v12  ;;  %v5288_v40 = vmul.f32 0.6931472, %v6798_v58 }
 0x8e7   : > { %v5305_v45 = vsub.f32 %v9076_v38, %v5288_v40 }
 0x8e8   : > { %v6800_v46 = vpop.eup %6799 }
 0x8e9   : > { %5321 = vst.msk [vmem:[%s9125_s26 + $0x70] sm:$0xff] %vm2688_vm5, %v5305_v45  ;;  %v5290_v23 = vmul.f32 0.6931472, %v6800_v46 }
 0x8eb   : > { %v5306_v56 = vsub.f32 %v9081_v0, %v5290_v23 }
 0x8ed   : > { %5322 = vst.msk [vmem:[%s9125_s26 + $0x78] sm:$0xff] %vm2688_vm5, %v5306_v56 }
 0x8ee PF: > { %s9570_s24 = sld [smem:[#allocation15_spill]]  ;;  %s9571_s2 = sld [smem:[#allocation16_spill]] }
 0x8ef   : > { %p9573_p1 = scmp.ge.s32.totalorder %s6989_s16, 2 }
 0x8f4   : > { %s5482_s19 = sand.u32 1, %s9570_s24   ;;  %p9572_p5 = scmp.ne.s32.totalorder %s9571_s2, 0 }
 0x8f5   : > { %s5483_s25 = scalar_lea.sflag [#allocation4], %s5482_s19 }
 0x8f6   : > { %p6522_p2 = pnand %p9573_p1, %p9572_p5 }
 0x8f8   : > { %6972 = dma.done.wait (!%p6522_p2), %s5483_s25, 2048  }
 0x8f9   : > { %6974 = vsyncadd (!%p6522_p2), %s5483_s25, 4294965248  ;;  %s9574_s5 = smov %s7221_s29  ;;  %p30_p4 = scmp.ge.s32.totalorder %s7193_s22, 4  }
 0x8fa   : > { %s9575_s29 = smov %s6981_s30  ;;  %s9576_s30 = smov %s6985_s15 }
 0x8fb   : > { %s9577_s15 = smov %s9574_s5  ;;  %s9578_s16 = smov %s7193_s22 }
 0x8fc   :  { %32 = sbr.rel (!%p30_p4) target bundleno = 15 (0xf), region = 155 }
 0x903   :  { %5504 = vsyncpa [#allocation3], 1 }
 0x904   :  { %5506 = vsyncpa [#allocation3 + $0x1], 1 }
 0x905   :  { %5507 = vsyncpa [#allocation6], 1 }
 0x906   :  { %5508 = vsyncpa [#allocation9], 1 }
 0x907   :  { %5509 = vsyncpa [#allocation4], 1 }
 0x908   :  { %5511 = vsyncpa [#allocation4 + $0x1], 1 }

</bundles_post_ra>
